<compile_context>
chip_gen: v7x
topology: tpu7x:2x2x1
jax: 0.10.0
libtpu: 0.0.40
codegen_flags: <defaults>
</compile_context>

<pallas_src>
import math
import functools

import numpy as np
import jax
import jax.numpy as jnp
from jax.experimental import pallas as pl
from jax.experimental.pallas import tpu as pltpu


# ----------------------------------------------------------------------------
# Pallas kernel
# ----------------------------------------------------------------------------
def _actor_critic_kernel(
    x_ref,       # (Bt, Cpad)        f32   state rows, (branch, time) flattened + zero pad
    wa_ref,      # (Cpad, 6*T*128)   bf16  packed actor conv weight (block-sparse)
    ba_ref,      # (1, 6*T*128)      f32   actor conv bias, tiled over t
    wc_ref,      # (Cpad, 6*T*128)   bf16  packed critic conv weight
    bc_ref,      # (1, 6*T*128)      f32   critic conv bias, tiled over t
    fcw_ref,     # (6*T*128, 128)    bf16  shared fc weight, rows ordered (branch,t,c)
    fcb_ref,     # (1, 128)          f32   fc bias
    hw_ref,      # (128, 128)        f32   fused head weight: cols [0:A)=actor, col A=critic
    hb_ref,      # (1, 128)          f32   fused head bias
    noise_ref,   # (Bt, A)           f32   standard-normal noise
    out_ref,     # (Bt, 128)         f32   packed output slab
    merge_ref,   # (2*Bt, 6*T*128)   bf16  scratch: rows [0:Bt)=actor, [Bt:2Bt)=critic
    *, sigma, A,
):
    Bt = x_ref.shape[0]

    # --- conv branches as block-sparse MXU matmuls (actor + critic halves).
    xb = x_ref[...].astype(jnp.bfloat16)                                  # (Bt, Cpad)
    ma = jnp.dot(xb, wa_ref[...], preferred_element_type=jnp.float32) + ba_ref[...]
    merge_ref[0:Bt, :] = jnp.maximum(ma, 0.0).astype(jnp.bfloat16)
    mc = jnp.dot(xb, wc_ref[...], preferred_element_type=jnp.float32) + bc_ref[...]
    merge_ref[Bt:2 * Bt, :] = jnp.maximum(mc, 0.0).astype(jnp.bfloat16)

    # --- shared fc: ONE (2Bt, 6144) x (6144, 128) bf16 MXU matmul for actor+critic.
    fc = jnp.dot(merge_ref[...], fcw_ref[...], preferred_element_type=jnp.float32)
    fc = jnp.maximum(fc + fcb_ref[...], 0.0)                              # (2Bt, 128)

    # --- fused actor/critic heads: one lane-dense (2Bt,128) x (128,128) matmul.
    head = jnp.dot(fc, hw_ref[...], preferred_element_type=jnp.float32) + hb_ref[...]

    mean = jax.nn.sigmoid(head[0:Bt, 0:A])                                # action_mean
    noise = noise_ref[...]
    action = mean + sigma * noise                                         # MVN(mean, sigma^2 I)
    # log_prob computed directly from noise (== (action-mean)/sigma exactly).
    logp = (-0.5 * jnp.sum(noise * noise, axis=-1, keepdims=True)
            - (0.5 * A * math.log(2.0 * math.pi) + A * math.log(sigma)))
    value = head[Bt:2 * Bt, A:A + 1]                                      # critic rows, col A

    # --- assemble the packed slab in registers, single full-width store.
    pieces = [action, mean, value, logp]
    pad_w = out_ref.shape[1] - (2 * A + 2)
    if pad_w > 0:
        pieces.append(jnp.zeros((Bt, pad_w), jnp.float32))
    out_ref[...] = jnp.concatenate(pieces, axis=-1)


# ----------------------------------------------------------------------------
# Wrapper
# ----------------------------------------------------------------------------
def actor_critic_forward(x, params, noise, sigma):
    B, NB, L = x.shape
    A = noise.shape[1]
    T = L - 2
    H = 128
    Cin = NB * L
    Cpad = ((Cin + 7) // 8) * 8            # pad (branch,time) columns to sublane multiple

    # Batch tiling: pad to a sublane multiple so all in-kernel row slices are
    # aligned (no pad-row handling inside the kernel).  Grid axis is "parallel"
    # (shards across v7x's two TensorCores); weights use constant index_maps so
    # they are DMA'd once and stay VMEM-resident across tiles.
    if B <= 128:
        tile = max(8, ((B + 7) // 8) * 8)
        Bp = tile
    else:
        tile = 128
        Bp = ((B + tile - 1) // tile) * tile

    x2 = x.reshape(B, Cin)
    if Bp != B or Cpad != Cin:
        x2 = jnp.pad(x2, ((0, Bp - B), (0, Cpad - Cin)))
    if Bp != B:
        noise = jnp.pad(noise, ((0, Bp - B), (0, 0)))

    grid = (Bp // tile,)
    nfc = NB * T * H

    kernel = functools.partial(_actor_critic_kernel, sigma=float(sigma), A=A)

    out = pl.pallas_call(
        kernel,
        out_shape=jax.ShapeDtypeStruct((Bp, H), jnp.float32),
        grid=grid,
        in_specs=[
            pl.BlockSpec((tile, Cpad), lambda i: (i, 0)),       # x (batch-tiled)
            pl.BlockSpec((Cpad, nfc), lambda i: (0, 0)),        # packed actor conv weight
            pl.BlockSpec((1, nfc), lambda i: (0, 0)),           # actor conv bias row
            pl.BlockSpec((Cpad, nfc), lambda i: (0, 0)),        # packed critic conv weight
            pl.BlockSpec((1, nfc), lambda i: (0, 0)),           # critic conv bias row
            pl.BlockSpec((nfc, H), lambda i: (0, 0)),           # fc weight (bf16)
            pl.BlockSpec((1, H), lambda i: (0, 0)),             # fc bias
            pl.BlockSpec((H, H), lambda i: (0, 0)),             # fused head weight
            pl.BlockSpec((1, H), lambda i: (0, 0)),             # fused head bias
            pl.BlockSpec((tile, A), lambda i: (i, 0)),          # noise (batch-tiled)
        ],
        out_specs=pl.BlockSpec((tile, H), lambda i: (i, 0)),
        scratch_shapes=[pltpu.VMEM((2 * tile, nfc), jnp.bfloat16)],
        compiler_params=pltpu.CompilerParams(
            dimension_semantics=("parallel",),
            vmem_limit_bytes=40 * 1024 * 1024),
    )(x2, params["conv_wa"], params["conv_ba_row"],
      params["conv_wc"], params["conv_bc_row"],
      params["fcw_flat"], params["fcb"],
      params["head_w"], params["head_b"], noise)

    out = out[:B]
    action = out[:, 0:A]
    mean = out[:, A:2 * A]
    value = out[:, 2 * A:2 * A + 1]
    logp = out[:, 2 * A + 1:2 * A + 2]
    return action, logp, value, mean


# ----------------------------------------------------------------------------
# Deterministic parameter init (shapes from ActorCritic.__init__)
# ----------------------------------------------------------------------------
def init_params(key, action_dim=2, state_length=10):
    H = 128                      # layer1_shape == layer2_shape
    K = 3                        # conv kernel size
    NB = 6
    L = state_length
    T = L - 2
    nfc = NB * H * T             # numFcInput == 6144 for state_length=10
    Cin = NB * L
    Cpad = ((Cin + 7) // 8) * 8

    keys = jax.random.split(key, 10)

    def u(k, shape, fan_in):
        bound = 1.0 / math.sqrt(fan_in)
        return jax.random.uniform(k, shape, jnp.float32, -bound, bound)

    wa = u(keys[0], (NB, K, H), K)         # actor conv weights [branch, k, out_c]
    ba = u(keys[1], (NB, H), K)
    wc = u(keys[2], (NB, K, H), K)         # critic conv weights
    bc = u(keys[3], (NB, H), K)
    fc_w = u(keys[4], (H, nfc), nfc)       # torch layout (out_features, in_features)
    fc_b = u(keys[5], (1, H), nfc)
    a_w = u(keys[6], (action_dim, H), H)   # actor_output torch layout
    a_b = u(keys[7], (1, action_dim), H)
    c_w = u(keys[8], (1, H), H)            # critic_output torch layout
    c_b = u(keys[9], (1, 1), H)

    # Kernel packing -----------------------------------------------------------
    # Conv as a block-sparse matmul: row = input column (branch i, time t+k),
    # column = (branch i, time t, channel c), value = w[i, k, c].
    def pack_conv(w):
        wn = np.asarray(w)
        W = np.zeros((Cpad, nfc), np.float32)
        for i in range(NB):
            for t in range(T):
                col0 = (i * T + t) * H
                for k in range(K):
                    W[i * L + t + k, col0:col0 + H] = wn[i, k]
        return jnp.asarray(W, dtype=jnp.bfloat16)

    def pack_bias(b):
        bn = np.asarray(b)                                   # (NB, H)
        row = np.tile(bn[:, None, :], (1, T, 1)).reshape(1, nfc)
        return jnp.asarray(row, dtype=jnp.float32)

    # fc weight permuted so merge column order (branch, t, c) reproduces PyTorch's
    # channel-major flatten (index i*H*T + c*T + t); stored bf16 to halve the
    # dominant HBM->VMEM transfer.
    fcw_flat = (fc_w.reshape(H, NB, H, T).transpose(1, 3, 2, 0)
                .reshape(nfc, H).astype(jnp.bfloat16))
    # Fused, zero-padded lane-dense head: cols [0:A) actor, col A critic.
    head_w = (jnp.zeros((H, H), jnp.float32)
              .at[:, :action_dim].set(a_w.T)
              .at[:, action_dim:action_dim + 1].set(c_w.T))
    head_b = (jnp.zeros((1, H), jnp.float32)
              .at[:, :action_dim].set(a_b)
              .at[:, action_dim:action_dim + 1].set(c_b))

    return {
        # raw params (used by the pure-JAX reference)
        "wa": wa, "ba": ba, "wc": wc, "bc": bc,
        "fc_w": fc_w, "fcb": fc_b,
        "aw": a_w.T, "ab": a_b, "cw": c_w.T, "cb": c_b,
        # kernel-packed params
        "conv_wa": pack_conv(wa), "conv_ba_row": pack_bias(ba),
        "conv_wc": pack_conv(wc), "conv_bc_row": pack_bias(bc),
        "fcw_flat": fcw_flat, "head_w": head_w, "head_b": head_b,
    }


# ----------------------------------------------------------------------------
# Pure-JAX reference (mirrors the PyTorch forward exactly, all f32)
# ----------------------------------------------------------------------------
def reference_forward(x, p, noise, sigma):
    B, _, L = x.shape
    T = L - 2

    def merge_of(w, b):
        outs = []
        for i in range(6):
            xi = x[:, i, :]
            patches = jnp.stack([xi[:, t:t + 3] for t in range(T)], axis=1)   # (B,T,3)
            ci = jnp.maximum(jnp.einsum("btk,kc->btc", patches, w[i])
                             + b[i][None, None, :], 0.0)                      # (B,T,C)
            # torch flatten order is (channel, time)
            outs.append(jnp.transpose(ci, (0, 2, 1)).reshape(B, -1))
        return jnp.concatenate(outs, axis=1)                                  # (B, 6144)

    fc_a = jnp.maximum(merge_of(p["wa"], p["ba"]) @ p["fc_w"].T + p["fcb"], 0.0)
    fc_c = jnp.maximum(merge_of(p["wc"], p["bc"]) @ p["fc_w"].T + p["fcb"], 0.0)

    mean = jax.nn.sigmoid(fc_a @ p["aw"] + p["ab"])
    action = mean + sigma * noise
    A = mean.shape[-1]
    diff = (action - mean) / sigma
    logp = (-0.5 * jnp.sum(diff * diff, axis=-1, keepdims=True)
            - 0.5 * A * math.log(2.0 * math.pi) - A * math.log(sigma))
    value = fc_c @ p["cw"] + p["cb"]
    return action, logp, value, mean


# ----------------------------------------------------------------------------
if __name__ == "__main__":
    B = 2
    state_length = 10            # -> conv out length 8, numFcInput = 6*128*8 = 6144
    action_dim = 2
    exploration_param = 0.05     # sigma

    key = jax.random.PRNGKey(0)
    k_params, k_x, k_noise = jax.random.split(key, 3)

    params = init_params(k_params, action_dim=action_dim, state_length=state_length)
    x = jax.random.normal(k_x, (B, 6, state_length), jnp.float32)
    noise = jax.random.normal(k_noise, (B, action_dim), jnp.float32)

    action, logp, value, mean = jax.block_until_ready(
        actor_critic_forward(x, params, noise, exploration_param))

    ref_action, ref_logp, ref_value, ref_mean = reference_forward(
        x, params, noise, exploration_param)

    # bf16 input/conv/fc weights & merge activations -> loose tolerances on
    # fc-derived outputs; logp depends only on the injected noise (f32 exact).
    assert jnp.allclose(mean, ref_mean, atol=2e-2, rtol=2e-2), "mean mismatch"
    assert jnp.allclose(action, ref_action, atol=2e-2, rtol=2e-2), "action mismatch"
    assert jnp.allclose(value, ref_value, atol=3e-2, rtol=2e-2), "value mismatch"
    assert jnp.allclose(logp, ref_logp, atol=1e-3, rtol=1e-4), "logp mismatch"

    print("KERNEL_OK")
</pallas_src>

<mosaic_0001>
module attributes {stable_mosaic.version = 11 : i64} {
  func.func @_actor_critic_kernel(%arg0: i32, %arg1: memref<8x64xf32, #tpu.memory_space<vmem>>, %arg2: memref<64x6144xbf16, #tpu.memory_space<vmem>>, %arg3: memref<1x6144xf32, #tpu.memory_space<vmem>>, %arg4: memref<64x6144xbf16, #tpu.memory_space<vmem>>, %arg5: memref<1x6144xf32, #tpu.memory_space<vmem>>, %arg6: memref<6144x128xbf16, #tpu.memory_space<vmem>>, %arg7: memref<1x128xf32, #tpu.memory_space<vmem>>, %arg8: memref<128x128xf32, #tpu.memory_space<vmem>>, %arg9: memref<1x128xf32, #tpu.memory_space<vmem>>, %arg10: memref<8x2xf32, #tpu.memory_space<vmem>>, %arg11: memref<8x128xf32, #tpu.memory_space<vmem>>, %arg12: memref<16x6144xbf16, #tpu.memory_space<vmem>>) attributes {dimension_semantics = [#tpu.dimension_semantics<parallel>], iteration_bounds = array<i64: 1>, scalar_prefetch = 0 : i64, scratch_operands = 1 : i64, tpu.core_type = #tpu.core_type<tc>, window_params = [{transform_indices = @transform_0, window_bounds = array<i64: 8, 64>}, {pipeline_mode = #tpu.pipeline_mode<synchronous>, transform_indices = @transform_1, window_bounds = array<i64: 64, 6144>}, {pipeline_mode = #tpu.pipeline_mode<synchronous>, transform_indices = @transform_2, window_bounds = array<i64: 1, 6144>}, {pipeline_mode = #tpu.pipeline_mode<synchronous>, transform_indices = @transform_3, window_bounds = array<i64: 64, 6144>}, {pipeline_mode = #tpu.pipeline_mode<synchronous>, transform_indices = @transform_4, window_bounds = array<i64: 1, 6144>}, {pipeline_mode = #tpu.pipeline_mode<synchronous>, transform_indices = @transform_5, window_bounds = array<i64: 6144, 128>}, {pipeline_mode = #tpu.pipeline_mode<synchronous>, transform_indices = @transform_6, window_bounds = array<i64: 1, 128>}, {pipeline_mode = #tpu.pipeline_mode<synchronous>, transform_indices = @transform_7, window_bounds = array<i64: 128, 128>}, {pipeline_mode = #tpu.pipeline_mode<synchronous>, transform_indices = @transform_8, window_bounds = array<i64: 1, 128>}, {transform_indices = @transform_9, window_bounds = array<i64: 8, 2>}, {transform_indices = @transform_10, window_bounds = array<i64: 8, 128>}]} {
    %c0 = arith.constant 0 : index
    %c0_0 = arith.constant 0 : index
    %0 = vector.load %arg1[%c0, %c0_0] : memref<8x64xf32, #tpu.memory_space<vmem>>, vector<8x64xf32>
    %1 = arith.truncf %0 : vector<8x64xf32> to vector<8x64xbf16>
    %c0_1 = arith.constant 0 : index
    %c0_2 = arith.constant 0 : index
    %2 = vector.load %arg2[%c0_1, %c0_2] : memref<64x6144xbf16, #tpu.memory_space<vmem>>, vector<64x6144xbf16>
    %cst = arith.constant dense<0.000000e+00> : vector<8x6144xf32>
    %3 = tpu.matmul %1, %2, %cst {dimension_numbers = #tpu.dot_dimension_numbers<[1], [0], [0], [1], [0, 0, 1, 1], [], []>} : vector<8x64xbf16>, vector<64x6144xbf16>, vector<8x6144xf32> -> vector<8x6144xf32>
    %c0_3 = arith.constant 0 : index
    %c0_4 = arith.constant 0 : index
    %4 = vector.load %arg3[%c0_3, %c0_4] : memref<1x6144xf32, #tpu.memory_space<vmem>>, vector<1x6144xf32>
    %5 = vector.broadcast %4 : vector<1x6144xf32> to vector<8x6144xf32>
    %6 = arith.addf %3, %5 : vector<8x6144xf32>
    %cst_5 = arith.constant 0.000000e+00 : f32
    %7 = vector.broadcast %cst_5 : f32 to vector<8x6144xf32>
    %8 = arith.maximumf %6, %7 : vector<8x6144xf32>
    %9 = arith.truncf %8 : vector<8x6144xf32> to vector<8x6144xbf16>
    %c0_6 = arith.constant 0 : index
    %c0_7 = arith.constant 0 : index
    %10 = vector.load %arg12[%c0_6, %c0_7] : memref<16x6144xbf16, #tpu.memory_space<vmem>>, vector<8x6144xbf16>
    tpu.vector_store %arg12[%c0_6, %c0_7], %9 {strides = array<i32>} : memref<16x6144xbf16, #tpu.memory_space<vmem>>, vector<8x6144xbf16>,
    %c0_8 = arith.constant 0 : index
    %c0_9 = arith.constant 0 : index
    %11 = vector.load %arg4[%c0_8, %c0_9] : memref<64x6144xbf16, #tpu.memory_space<vmem>>, vector<64x6144xbf16>
    %cst_10 = arith.constant dense<0.000000e+00> : vector<8x6144xf32>
    %12 = tpu.matmul %1, %11, %cst_10 {dimension_numbers = #tpu.dot_dimension_numbers<[1], [0], [0], [1], [0, 0, 1, 1], [], []>} : vector<8x64xbf16>, vector<64x6144xbf16>, vector<8x6144xf32> -> vector<8x6144xf32>
    %c0_11 = arith.constant 0 : index
    %c0_12 = arith.constant 0 : index
    %13 = vector.load %arg5[%c0_11, %c0_12] : memref<1x6144xf32, #tpu.memory_space<vmem>>, vector<1x6144xf32>
    %14 = vector.broadcast %13 : vector<1x6144xf32> to vector<8x6144xf32>
    %15 = arith.addf %12, %14 : vector<8x6144xf32>
    %cst_13 = arith.constant 0.000000e+00 : f32
    %16 = vector.broadcast %cst_13 : f32 to vector<8x6144xf32>
    %17 = arith.maximumf %15, %16 : vector<8x6144xf32>
    %18 = arith.truncf %17 : vector<8x6144xf32> to vector<8x6144xbf16>
    %c8 = arith.constant 8 : index
    %c0_14 = arith.constant 0 : index
    %19 = vector.load %arg12[%c8, %c0_14] : memref<16x6144xbf16, #tpu.memory_space<vmem>>, vector<8x6144xbf16>
    tpu.vector_store %arg12[%c8, %c0_14], %18 {strides = array<i32>} : memref<16x6144xbf16, #tpu.memory_space<vmem>>, vector<8x6144xbf16>,
    %c0_15 = arith.constant 0 : index
    %c0_16 = arith.constant 0 : index
    %20 = vector.load %arg12[%c0_15, %c0_16] : memref<16x6144xbf16, #tpu.memory_space<vmem>>, vector<16x6144xbf16>
    %c0_17 = arith.constant 0 : index
    %c0_18 = arith.constant 0 : index
    %21 = vector.load %arg6[%c0_17, %c0_18] : memref<6144x128xbf16, #tpu.memory_space<vmem>>, vector<6144x128xbf16>
    %cst_19 = arith.constant dense<0.000000e+00> : vector<16x128xf32>
    %22 = tpu.matmul %20, %21, %cst_19 {dimension_numbers = #tpu.dot_dimension_numbers<[1], [0], [0], [1], [0, 0, 1, 1], [], []>} : vector<16x6144xbf16>, vector<6144x128xbf16>, vector<16x128xf32> -> vector<16x128xf32>
    %c0_20 = arith.constant 0 : index
    %c0_21 = arith.constant 0 : index
    %23 = vector.load %arg7[%c0_20, %c0_21] : memref<1x128xf32, #tpu.memory_space<vmem>>, vector<1x128xf32>
    %24 = vector.broadcast %23 : vector<1x128xf32> to vector<16x128xf32>
    %25 = arith.addf %22, %24 : vector<16x128xf32>
    %cst_22 = arith.constant 0.000000e+00 : f32
    %26 = vector.broadcast %cst_22 : f32 to vector<16x128xf32>
    %27 = arith.maximumf %25, %26 : vector<16x128xf32>
    %c0_23 = arith.constant 0 : index
    %c0_24 = arith.constant 0 : index
    %28 = vector.load %arg8[%c0_23, %c0_24] : memref<128x128xf32, #tpu.memory_space<vmem>>, vector<128x128xf32>
    %cst_25 = arith.constant dense<0.000000e+00> : vector<16x128xf32>
    %29 = tpu.matmul %27, %28, %cst_25 {dimension_numbers = #tpu.dot_dimension_numbers<[1], [0], [0], [1], [0, 0, 1, 1], [], []>} : vector<16x128xf32>, vector<128x128xf32>, vector<16x128xf32> -> vector<16x128xf32>
    %c0_26 = arith.constant 0 : index
    %c0_27 = arith.constant 0 : index
    %30 = vector.load %arg9[%c0_26, %c0_27] : memref<1x128xf32, #tpu.memory_space<vmem>>, vector<1x128xf32>
    %31 = vector.broadcast %30 : vector<1x128xf32> to vector<16x128xf32>
    %32 = arith.addf %29, %31 : vector<16x128xf32>
    %33 = vector.extract_strided_slice %32 {offsets = [0, 0], sizes = [8, 2], strides = [1, 1]} : vector<16x128xf32> to vector<8x2xf32>
    %34 = arith.negf %33 : vector<8x2xf32>
    %35 = math.exp %34 : vector<8x2xf32>
    %cst_28 = arith.constant 1.000000e+00 : f32
    %36 = vector.broadcast %cst_28 : f32 to vector<8x2xf32>
    %37 = arith.addf %36, %35 : vector<8x2xf32>
    %38 = arith.divf %36, %37 : vector<8x2xf32>
    %c0_29 = arith.constant 0 : index
    %c0_30 = arith.constant 0 : index
    %39 = vector.load %arg10[%c0_29, %c0_30] : memref<8x2xf32, #tpu.memory_space<vmem>>, vector<8x2xf32>
    %cst_31 = arith.constant 5.000000e-02 : f32
    %40 = vector.broadcast %cst_31 : f32 to vector<8x2xf32>
    %41 = arith.mulf %40, %39 : vector<8x2xf32>
    %42 = arith.addf %38, %41 : vector<8x2xf32>
    %43 = arith.mulf %39, %39 : vector<8x2xf32>
    %cst_32 = arith.constant dense<0.000000e+00> : vector<8xf32>
    %44 = vector.multi_reduction <add>, %43, %cst_32 [1] : vector<8x2xf32> to vector<8xf32>
    %45 = vector.shape_cast %44 : vector<8xf32> to vector<8x1xf32>
    %cst_33 = arith.constant -5.000000e-01 : f32
    %46 = vector.broadcast %cst_33 : f32 to vector<8x1xf32>
    %47 = arith.mulf %46, %45 : vector<8x1xf32>
    %cst_34 = arith.constant -4.15358734 : f32
    %48 = vector.broadcast %cst_34 : f32 to vector<8x1xf32>
    %49 = arith.subf %47, %48 : vector<8x1xf32>
    %50 = vector.extract_strided_slice %32 {offsets = [8, 2], sizes = [8, 1], strides = [1, 1]} : vector<16x128xf32> to vector<8x1xf32>
    %cst_35 = arith.constant 0.000000e+00 : f32
    %51 = vector.broadcast %cst_35 : f32 to vector<8x122xf32>
    %52 = tpu.concatenate %42, %38, %50, %49, %51 in 1 : vector<8x2xf32>, vector<8x2xf32>, vector<8x1xf32>, vector<8x1xf32>, vector<8x122xf32> -> vector<8x128xf32>
    %c0_36 = arith.constant 0 : index
    %c0_37 = arith.constant 0 : index
    %53 = vector.load %arg11[%c0_36, %c0_37] : memref<8x128xf32, #tpu.memory_space<vmem>>, vector<8x128xf32>
    tpu.vector_store %arg11[%c0_36, %c0_37], %52 {strides = array<i32>} : memref<8x128xf32, #tpu.memory_space<vmem>>, vector<8x128xf32>,
    return
  }
  func.func @transform_0(%arg0: i32) -> (i32, i32) {
    %c0_i32 = arith.constant 0 : i32
    %c0_i32_0 = arith.constant 0 : i32
    return %arg0, %c0_i32 : i32, i32
  }
  func.func @transform_1(%arg0: i32) -> (i32, i32) {
    %c0_i32 = arith.constant 0 : i32
    %c0_i32_0 = arith.constant 0 : i32
    %c0_i32_1 = arith.constant 0 : i32
    return %c0_i32, %c0_i32_0 : i32, i32
  }
  func.func @transform_2(%arg0: i32) -> (i32, i32) {
    %c0_i32 = arith.constant 0 : i32
    %c0_i32_0 = arith.constant 0 : i32
    %c0_i32_1 = arith.constant 0 : i32
    return %c0_i32, %c0_i32_0 : i32, i32
  }
  func.func @transform_3(%arg0: i32) -> (i32, i32) {
    %c0_i32 = arith.constant 0 : i32
    %c0_i32_0 = arith.constant 0 : i32
    %c0_i32_1 = arith.constant 0 : i32
    return %c0_i32, %c0_i32_0 : i32, i32
  }
  func.func @transform_4(%arg0: i32) -> (i32, i32) {
    %c0_i32 = arith.constant 0 : i32
    %c0_i32_0 = arith.constant 0 : i32
    %c0_i32_1 = arith.constant 0 : i32
    return %c0_i32, %c0_i32_0 : i32, i32
  }
  func.func @transform_5(%arg0: i32) -> (i32, i32) {
    %c0_i32 = arith.constant 0 : i32
    %c0_i32_0 = arith.constant 0 : i32
    %c0_i32_1 = arith.constant 0 : i32
    return %c0_i32, %c0_i32_0 : i32, i32
  }
  func.func @transform_6(%arg0: i32) -> (i32, i32) {
    %c0_i32 = arith.constant 0 : i32
    %c0_i32_0 = arith.constant 0 : i32
    %c0_i32_1 = arith.constant 0 : i32
    return %c0_i32, %c0_i32_0 : i32, i32
  }
  func.func @transform_7(%arg0: i32) -> (i32, i32) {
    %c0_i32 = arith.constant 0 : i32
    %c0_i32_0 = arith.constant 0 : i32
    %c0_i32_1 = arith.constant 0 : i32
    return %c0_i32, %c0_i32_0 : i32, i32
  }
  func.func @transform_8(%arg0: i32) -> (i32, i32) {
    %c0_i32 = arith.constant 0 : i32
    %c0_i32_0 = arith.constant 0 : i32
    %c0_i32_1 = arith.constant 0 : i32
    return %c0_i32, %c0_i32_0 : i32, i32
  }
  func.func @transform_9(%arg0: i32) -> (i32, i32) {
    %c0_i32 = arith.constant 0 : i32
    %c0_i32_0 = arith.constant 0 : i32
    return %arg0, %c0_i32 : i32, i32
  }
  func.func @transform_10(%arg0: i32) -> (i32, i32) {
    %c0_i32 = arith.constant 0 : i32
    %c0_i32_0 = arith.constant 0 : i32
    return %arg0, %c0_i32 : i32, i32
  }
}

</mosaic_0001>

<bundles_post_ra>
// kernel: tpu_custom_call.1
= control target key start
LH: loop header
LB: loop body
LE: loop exit
PB: predicated region body
PF: predicated region fallthrough
CT: control target
= control target key end

     0   :  { %15 = vsyncpa [#allocation4], 0  ;;  %s12315_s0 = inlined_call_operand.hbm [shape: f32[8,64], index: 0, kind: input, shape index: {}]   ;;  %s12316_s1 = inlined_call_operand.hbm [shape: bf16[64,6144], index: 1, kind: input, shape index: {}]   ;;  %s12317_s2 = inlined_call_operand.hbm [shape: f32[1,6144], index: 2, kind: input, shape index: {}]   ;;  %s12318_s3 = inlined_call_operand.hbm [shape: bf16[64,6144], index: 3, kind: input, shape index: {}]   ;;  %s12319_s4 = inlined_call_operand.hbm [shape: f32[1,6144], index: 4, kind: input, shape index: {}]   ;;  %s12320_s5 = inlined_call_operand.hbm [shape: bf16[6144,128], index: 5, kind: input, shape index: {}]   ;;  %s12321_s6 = inlined_call_operand.hbm [shape: f32[1,128], index: 6, kind: input, shape index: {}]   ;;  %s12322_s7 = inlined_call_operand.hbm [shape: f32[128,128], index: 7, kind: input, shape index: {}]   ;;  %s12323_s8 = inlined_call_operand.hbm [shape: f32[1,128], index: 8, kind: input, shape index: {}]   ;;  %s12324_s9 = inlined_call_operand.vmem [shape: f32[8,2], index: 9, kind: input, shape index: {}]   ;;  %s12325_s10 = inlined_call_operand.hbm [shape: f32[8,128], index: 10, kind: output, shape index: {}]  }
   0x1   :  { %16 = vsyncpa [#allocation7], 0 }
   0x2   :  { %17 = vsyncpa [#allocation10], 0 }
   0x3   :  { %18 = vsyncpa [#allocation13], 0 }
   0x4   :  { %19 = vsyncpa [#allocation16], 0 }
   0x5   :  { %20 = vsyncpa [#allocation5], 0  ;;  %s11696_s13 = smov [#allocation6]   ;;  %s11464_s17 = scalar_lea.hbm %s12316_s1, 24576 }
   0x6   :  { %s36_s14 = sshll.u32 %s11696_s13, 4  ;;  %p11465_p0 = scmp.ne.s32.totalorder %s12316_s1, %s11464_s17  ;;  %s37_s14 = int_to_ptr.vmem [resolvable:$true] %s36_s14 }
   0x7   :  { %p11468_p1 = scmp.lt.u32.totalorder %s11464_s17, %s12316_s1 }
   0x9   :  { %p11470_p2 = pnand %p11468_p1, %p11465_p0 }
   0xb   :  { %11473 = shalt.err (!%p11470_p2)
}
   0xc   :  { %s11474_s22 = scalar_lea.vmem %s37_s14, 24576  ;;  %p11479_p4 = scmp.lt.s32.totalorder %s37_s14, %s37_s14 }
   0xd   :  { %p11475_p3 = scmp.ne.s32.totalorder %s37_s14, %s11474_s22  ;;  %p11480_p5 = scmp.lt.s32.totalorder %s11474_s22, %s11474_s22 }
   0xf   :  { %p11481_p6 = por %p11480_p5, %p11479_p4 }
  0x11   :  { %p11482_p7 = pnand %p11481_p6, %p11475_p3 }
  0x13   :  { %11485 = shalt.err (!%p11482_p7)
}
  0x14   :  { %s11697_s23 = smov 3072   ;;  %s11698_s24 = smov 192  }
  0x15   :  { %42 = dma.hbm_to_vmem [thread:$0]  %s12316_s1, 24576, %s37_s14, [#allocation7], %s11697_s23, %s11697_s23, %s11698_s24  }
  0x16   :  { %s11699_s27 = smov [#allocation9]   ;;  %s11700_s29 = smov [#allocation12]  }
  0x17   :  { %s58_s28 = sshll.u32 %s11699_s27, 4  ;;  %s80_s30 = sshll.u32 %s11700_s29, 4  ;;  %s59_s28 = int_to_ptr.vmem [resolvable:$true] %s58_s28  ;;  %s81_s30 = int_to_ptr.vmem [resolvable:$true] %s80_s30 }
  0x18   :  { %s11486_s13 = scalar_lea.hbm %s12318_s3, 24576 }
  0x19   :  { %p11487_p8 = scmp.ne.s32.totalorder %s12318_s3, %s11486_s13  ;;  %p11490_p9 = scmp.lt.u32.totalorder %s11486_s13, %s12318_s3 }
  0x1b   :  { %p11492_p10 = pnand %p11490_p9, %p11487_p8 }
  0x1d   :  { %11495 = shalt.err (!%p11492_p10)
}
  0x1e   :  { %s11496_s1 = scalar_lea.vmem %s59_s28, 24576  ;;  %p11501_p12 = scmp.lt.s32.totalorder %s59_s28, %s59_s28 }
  0x1f   :  { %p11497_p11 = scmp.ne.s32.totalorder %s59_s28, %s11496_s1  ;;  %p11502_p13 = scmp.lt.s32.totalorder %s11496_s1, %s11496_s1 }
  0x21   :  { %p11503_p0 = por %p11502_p13, %p11501_p12 }
  0x23   :  { %p11504_p1 = pnand %p11503_p0, %p11497_p11 }
  0x25   :  { %11507 = shalt.err (!%p11504_p1)
}
  0x26   :  { %64 = dma.hbm_to_vmem [thread:$0]  %s12318_s3, 24576, %s59_s28, [#allocation10], %s11697_s23, %s11697_s23, %s11698_s24  }
  0x27   :  { %s11508_s22 = scalar_lea.hbm %s12320_s5, 49152 }
  0x28   :  { %p11509_p2 = scmp.ne.s32.totalorder %s12320_s5, %s11508_s22  ;;  %p11512_p3 = scmp.lt.u32.totalorder %s11508_s22, %s12320_s5 }
  0x2a   :  { %p11514_p4 = pnand %p11512_p3, %p11509_p2 }
  0x2c   :  { %11517 = shalt.err (!%p11514_p4)
}
  0x2d   :  { %s11518_s11 = scalar_lea.vmem %s81_s30, 49152  ;;  %p11523_p6 = scmp.lt.s32.totalorder %s81_s30, %s81_s30 }
  0x2e   :  { %p11519_p5 = scmp.ne.s32.totalorder %s81_s30, %s11518_s11  ;;  %p11524_p7 = scmp.lt.s32.totalorder %s11518_s11, %s11518_s11 }
  0x30   :  { %p11525_p8 = por %p11524_p7, %p11523_p6 }
  0x32   :  { %p11526_p9 = pnand %p11525_p8, %p11519_p5 }
  0x34   :  { %11529 = shalt.err (!%p11526_p9)
}
  0x35   :  { %s11701_s3 = smov 64   ;;  %s11702_s23 = smov 4  }
  0x36   :  { %86 = dma.hbm_to_vmem [thread:$0]  %s12320_s5, 49152, %s81_s30, [#allocation13], %s11701_s3, %s11701_s3, %s11702_s23  }
  0x37   :  { %s11703_s12 = smov [#allocation15]   ;;  %s11530_s17 = scalar_lea.hbm %s12322_s7, 2048 }
  0x38   :  { %s102_s13 = sshll.u32 %s11703_s12, 4  ;;  %p11531_p10 = scmp.ne.s32.totalorder %s12322_s7, %s11530_s17  ;;  %s103_s13 = int_to_ptr.vmem [resolvable:$true] %s102_s13 }
  0x39   :  { %p11534_p11 = scmp.lt.u32.totalorder %s11530_s17, %s12322_s7 }
  0x3b   :  { %p11536_p12 = pnand %p11534_p11, %p11531_p10 }
  0x3d   :  { %11539 = shalt.err (!%p11536_p12)
}
  0x3e   :  { %s11540_s20 = scalar_lea.vmem %s103_s13, 2048  ;;  %p11545_p0 = scmp.lt.s32.totalorder %s103_s13, %s103_s13 }
  0x3f   :  { %p11541_p13 = scmp.ne.s32.totalorder %s103_s13, %s11540_s20  ;;  %p11546_p1 = scmp.lt.s32.totalorder %s11540_s20, %s11540_s20 }
  0x41   :  { %p11547_p2 = por %p11546_p1, %p11545_p0 }
  0x43   :  { %p11548_p3 = pnand %p11547_p2, %p11541_p13 }
  0x45   :  { %11551 = shalt.err (!%p11548_p3)
}
  0x46   :  { %s11704_s5 = smov 128   ;;  %s11705_s30 = smov 8  }
  0x47   :  { %108 = dma.hbm_to_vmem [thread:$0]  %s12322_s7, 2048, %s103_s13, [#allocation16], %s11704_s5, %s11704_s5, %s11705_s30  }
  0x48   :  { %s11706_s25 = smov [#allocation3]   ;;  %s11707_s27 = smov [#allocation8]  }
  0x49   :  { %s27_s26 = sshll.u32 %s11706_s25, 4  ;;  %s49_s29 = sshll.u32 %s11707_s27, 4  ;;  %s28_s26 = int_to_ptr.vmem [resolvable:$true] %s27_s26  ;;  %s50_s29 = int_to_ptr.vmem [resolvable:$true] %s49_s29 }
  0x4a   :  { %s11552_s23 = scalar_lea.hbm %s12315_s0, 128 }
  0x4b   :  { %p11553_p4 = scmp.ne.s32.totalorder %s12315_s0, %s11552_s23  ;;  %p11556_p5 = scmp.lt.u32.totalorder %s11552_s23, %s12315_s0 }
  0x4d   :  { %p11558_p6 = pnand %p11556_p5, %p11553_p4 }
  0x4f   :  { %11561 = shalt.err (!%p11558_p6)
}
  0x50   :  { %s11562_s7 = scalar_lea.vmem %s28_s26, 128  ;;  %p11567_p8 = scmp.lt.s32.totalorder %s28_s26, %s28_s26 }
  0x51   :  { %p11563_p7 = scmp.ne.s32.totalorder %s28_s26, %s11562_s7  ;;  %p11568_p9 = scmp.lt.s32.totalorder %s11562_s7, %s11562_s7 }
  0x53   :  { %p11569_p10 = por %p11568_p9, %p11567_p8 }
  0x55   :  { %p11570_p11 = pnand %p11569_p10, %p11563_p7 }
  0x57   :  { %11573 = shalt.err (!%p11570_p11)
}
  0x58   :  { %30 = dma.hbm_to_vmem [thread:$0]  %s12315_s0, 128, %s28_s26, [#allocation4]  }
  0x59   :  { %s11574_s1 = scalar_lea.hbm %s12317_s2, 768 }
  0x5a   :  { %p11575_p12 = scmp.ne.s32.totalorder %s12317_s2, %s11574_s1  ;;  %p11578_p13 = scmp.lt.u32.totalorder %s11574_s1, %s12317_s2 }
  0x5c   :  { %p11580_p0 = pnand %p11578_p13, %p11575_p12 }
  0x5e   :  { %11583 = shalt.err (!%p11580_p0)
}
  0x5f   :  { %s11584_s30 = scalar_lea.vmem %s50_s29, 768  ;;  %p11589_p2 = scmp.lt.s32.totalorder %s50_s29, %s50_s29 }
  0x60   :  { %p11585_p1 = scmp.ne.s32.totalorder %s50_s29, %s11584_s30  ;;  %p11590_p3 = scmp.lt.s32.totalorder %s11584_s30, %s11584_s30 }
  0x62   :  { %p11591_p4 = por %p11590_p3, %p11589_p2 }
  0x64   :  { %p11592_p5 = pnand %p11591_p4, %p11585_p1 }
  0x66   :  { %11595 = shalt.err (!%p11592_p5)
}
  0x67   :  { %52 = dma.hbm_to_vmem [thread:$0]  %s12317_s2, 768, %s50_s29, [#allocation7]  }
  0x68   :  { %s11708_s22 = smov [#allocation11]   ;;  %s11709_s26 = smov [#allocation14]  }
  0x69   :  { %s71_s25 = sshll.u32 %s11708_s22, 4  ;;  %s93_s27 = sshll.u32 %s11709_s26, 4  ;;  %s72_s25 = int_to_ptr.vmem [resolvable:$true] %s71_s25  ;;  %s94_s27 = int_to_ptr.vmem [resolvable:$true] %s93_s27 }
  0x6a   :  { %s11596_s23 = scalar_lea.hbm %s12319_s4, 768 }
  0x6b   :  { %p11597_p6 = scmp.ne.s32.totalorder %s12319_s4, %s11596_s23  ;;  %p11600_p7 = scmp.lt.u32.totalorder %s11596_s23, %s12319_s4 }
  0x6d   :  { %p11602_p8 = pnand %p11600_p7, %p11597_p6 }
  0x6f   :  { %11605 = shalt.err (!%p11602_p8)
}
  0x70   :  { %s11606_s2 = scalar_lea.vmem %s72_s25, 768  ;;  %p11611_p10 = scmp.lt.s32.totalorder %s72_s25, %s72_s25 }
  0x71   :  { %p11607_p9 = scmp.ne.s32.totalorder %s72_s25, %s11606_s2  ;;  %p11612_p11 = scmp.lt.s32.totalorder %s11606_s2, %s11606_s2 }
  0x73   :  { %p11613_p12 = por %p11612_p11, %p11611_p10 }
  0x75   :  { %p11614_p13 = pnand %p11613_p12, %p11607_p9 }
  0x77   :  { %11617 = shalt.err (!%p11614_p13)
}
  0x78   :  { %74 = dma.hbm_to_vmem [thread:$0]  %s12319_s4, 768, %s72_s25, [#allocation10]  }
  0x79   :  { %s11618_s17 = scalar_lea.hbm %s12321_s6, 16 }
  0x7a   :  { %p11619_p0 = scmp.ne.s32.totalorder %s12321_s6, %s11618_s17  ;;  %p11622_p1 = scmp.lt.u32.totalorder %s11618_s17, %s12321_s6 }
  0x7c   :  { %p11624_p2 = pnand %p11622_p1, %p11619_p0 }
  0x7e   :  { %11627 = shalt.err (!%p11624_p2)
}
  0x7f   :  { %s11628_s20 = scalar_lea.vmem %s94_s27, 16  ;;  %s11632_s5 = scalar_lea.vmem %s94_s27, 32 }
  0x80   :  { %p11629_p3 = scmp.ne.s32.totalorder %s94_s27, %s11628_s20  ;;  %p11633_p4 = scmp.lt.s32.totalorder %s94_s27, %s94_s27 }
  0x81   :  { %p11634_p5 = scmp.lt.s32.totalorder %s11632_s5, %s11628_s20 }
  0x83   :  { %p11635_p6 = por %p11634_p5, %p11633_p4 }
  0x85   :  { %p11636_p7 = pnand %p11635_p6, %p11629_p3 }
  0x87   :  { %11639 = shalt.err (!%p11636_p7)
}
  0x88   :  { %96 = dma.hbm_to_vmem [thread:$0]  %s12321_s6, 16, %s94_s27, [#allocation13]  }
  0x89   :  { %s11710_s0 = smov [#allocation17]   ;;  %s11640_s26 = scalar_lea.hbm %s12323_s8, 16 }
  0x8a   :  { %s115_s21 = sshll.u32 %s11710_s0, 4  ;;  %p11641_p8 = scmp.ne.s32.totalorder %s12323_s8, %s11640_s26  ;;  %s116_s21 = int_to_ptr.vmem [resolvable:$true] %s115_s21 }
  0x8b   :  { %p11644_p9 = scmp.lt.u32.totalorder %s11640_s26, %s12323_s8 }
  0x8d   :  { %p11646_p10 = pnand %p11644_p9, %p11641_p8 }
  0x8f   :  { %11649 = shalt.err (!%p11646_p10)
}
  0x90   :  { %s11650_s28 = scalar_lea.vmem %s116_s21, 16  ;;  %s11654_s6 = scalar_lea.vmem %s116_s21, 32 }
  0x91   :  { %p11651_p11 = scmp.ne.s32.totalorder %s116_s21, %s11650_s28  ;;  %p11655_p12 = scmp.lt.s32.totalorder %s116_s21, %s116_s21 }
  0x92   :  { %p11656_p13 = scmp.lt.s32.totalorder %s11654_s6, %s11650_s28 }
  0x94   :  { %p11657_p0 = por %p11656_p13, %p11655_p12 }
  0x96   :  { %p11658_p1 = pnand %p11657_p0, %p11651_p11 }
  0x98   :  { %11661 = shalt.err (!%p11658_p1)
}
  0x99   :  { %118 = dma.hbm_to_vmem [thread:$0]  %s12323_s8, 16, %s116_s21, [#allocation16]  }
  0x9a   :  { %11684 = dma.done.wait [#allocation4], 128  }
  0x9b   :  { %11685 = vsyncadd [#allocation4], 4294967168 }
  0x9c   :  { %11686 = dma.done.wait [#allocation7], 25344  }
  0x9d   :  { %11687 = vsyncadd [#allocation7], 4294941952 }
  0x9e   :  { %11688 = dma.done.wait [#allocation10], 25344  }
  0x9f   :  { %11689 = vsyncadd [#allocation10], 4294941952 }
  0xa0   :  { %11690 = dma.done.wait [#allocation13], 49168  }
  0xa1   :  { %11691 = vsyncadd [#allocation13], 4294918128 }
  0xa2   :  { %11692 = dma.done.wait [#allocation16], 2064  }
  0xa3   :  { %11693 = vsyncadd [#allocation16], 4294965232  ;;  %v11711_v0 = vmov 0   ;;  %v151_v1 = vld [vmem:[#allocation6] sm:$0xff]  ;;  %v153_v3 = vld [vmem:[#allocation6 + $0x10] sm:$0xff]  ;;  %vm1555_vm0 = vcmask 523264  }
  0xa4   :  { %1591 = vmatprep.mubr.bf16.mxu1 %v11711_v0  ;;  %1673 = vmatprep.mubr.bf16.mxu0 %v11711_v0  ;;  %v175_v2 = vld [vmem:[#allocation6 + $0xc0] sm:$0xff]  ;;  %v177_v5 = vld [vmem:[#allocation6 + $0xd0] sm:$0xff]  ;;  %v152_v31 = vld [vmem:[#allocation6 + $0x8] sm:$0xff]  ;;  %vm9584_vm1 = vcmask 15360   ;;  %vm9599_vm2 = vcmask 31744   ;;  %vm9601_vm3 = vcmask 39936  }
  0xa5   :  { %v9626_v4 = vcombine.high %v151_v1, %v175_v2  ;;  %v9625_v6 = vcombine.low %v151_v1, %v175_v2  ;;  %v199_v7 = vld [vmem:[#allocation6 + $0x180] sm:$0xff]  ;;  %v9630_v9 = vcombine.high %v153_v3, %v177_v5  ;;  %v9629_v10 = vcombine.low %v153_v3, %v177_v5  ;;  %v201_v12 = vld [vmem:[#allocation6 + $0x190] sm:$0xff]  ;;  %v176_v32 = vld [vmem:[#allocation6 + $0xc8] sm:$0xff]  ;;  %s11713_s2 = smov [#allocation18]  }
  0xa6   :  { %v223_v8 = vld [vmem:[#allocation6 + $0x240] sm:$0xff]  ;;  %v225_v13 = vld [vmem:[#allocation6 + $0x250] sm:$0xff]  ;;  %v149_v36 = vld [vmem:[#allocation3] sm:$0xff]  ;;  %v9628_v38 = vcombine.high %v152_v31, %v176_v32  ;;  %v9627_v45 = vcombine.low %v152_v31, %v176_v32  ;;  %s9612_s29 = sshll.u32 %s11713_s2, 4  ;;  %vm9603_vm4 = vcmask 48128   ;;  %s9613_s29 = int_to_ptr.vmem [resolvable:$true] %s9612_s29 }
  0xa7   :  { %v9674_v11 = vcombine.high %v199_v7, %v223_v8  ;;  %v247_v14 = vld [vmem:[#allocation6 + $0x300] sm:$0xff]  ;;  %1559 = vmatprep.subr.bf16.mxu1 %v9626_v4  ;;  %v9678_v15 = vcombine.high %v201_v12, %v225_v13  ;;  %v249_v17 = vld [vmem:[#allocation6 + $0x310] sm:$0xff]  ;;  %1641 = vmatprep.subr.bf16.mxu0 %v9630_v9  ;;  %v9673_v19 = vcombine.low %v199_v7, %v223_v8  ;;  %v200_v40 = vld [vmem:[#allocation6 + $0x188] sm:$0xff]  ;;  %s11662_s7 = scalar_lea.vmem %s9613_s29, 128  ;;  %p11667_p3 = scmp.lt.s32.totalorder %s9613_s29, %s9613_s29 }
  0xa8   :  { %v271_v16 = vld [vmem:[#allocation6 + $0x3c0] sm:$0xff]  ;;  %v273_v18 = vld [vmem:[#allocation6 + $0x3d0] sm:$0xff]  ;;  %1560 = vmatpush1.bf16.msra.mxu1 %v9625_v6  ;;  %1642 = vmatpush1.bf16.msra.mxu0 %v9629_v10  ;;  %v9677_v20 = vcombine.low %v201_v12, %v225_v13  ;;  %v224_v41 = vld [vmem:[#allocation6 + $0x248] sm:$0xff]  ;;  %v11879_v42 = vpack.c.bf16 %v149_v36, %v149_v36  ;;  %p11663_p2 = scmp.ne.s32.totalorder %s9613_s29, %s11662_s7  ;;  %p11668_p4 = scmp.lt.s32.totalorder %s11662_s7, %s11662_s7 }
  0xa9   :  { %1561 = vmatprep.subr.bf16.mxu1 %v9674_v11  ;;  %v9722_v21 = vcombine.high %v247_v14, %v271_v16  ;;  %1643 = vmatprep.subr.bf16.mxu0 %v9678_v15  ;;  %v9726_v22 = vcombine.high %v249_v17, %v273_v18  ;;  %v295_v23 = vld [vmem:[#allocation6 + $0x480] sm:$0xff]  ;;  %v297_v25 = vld [vmem:[#allocation6 + $0x490] sm:$0xff]  ;;  %v9721_v27 = vcombine.low %v247_v14, %v271_v16  ;;  %v248_v49 = vld [vmem:[#allocation6 + $0x308] sm:$0xff] }
  0xaa   :  { %v319_v24 = vld [vmem:[#allocation6 + $0x540] sm:$0xff]  ;;  %v321_v26 = vld [vmem:[#allocation6 + $0x550] sm:$0xff]  ;;  %v9725_v28 = vcombine.low %v249_v17, %v273_v18  ;;  %v9676_v47 = vcombine.high %v200_v40, %v224_v41  ;;  %v272_v50 = vld [vmem:[#allocation6 + $0x3c8] sm:$0xff]  ;;  %v9675_v53 = vcombine.low %v200_v40, %v224_v41  ;;  %p11669_p5 = por %p11668_p4, %p11667_p3 }
  0xab   :  { %v9770_v29 = vcombine.high %v295_v23, %v319_v24  ;;  %v9774_v30 = vcombine.high %v297_v25, %v321_v26  ;;  %v155_v33 = vld [vmem:[#allocation6 + $0x20] sm:$0xff]  ;;  %v9769_v35 = vcombine.low %v295_v23, %v319_v24  ;;  %v9773_v37 = vcombine.low %v297_v25, %v321_v26  ;;  %v296_v57 = vld [vmem:[#allocation6 + $0x488] sm:$0xff]  ;;  %v154_v2 = vld [vmem:[#allocation6 + $0x18] sm:$0xff] }
  0xac   :  { %1562 = vmatpush1.bf16.msra.mxu1 %v9673_v19  ;;  %1644 = vmatpush1.bf16.msra.mxu0 %v9677_v20  ;;  %v179_v34 = vld [vmem:[#allocation6 + $0xe0] sm:$0xff]  ;;  %v9724_v55 = vcombine.high %v248_v49, %v272_v50  ;;  %v320_v58 = vld [vmem:[#allocation6 + $0x548] sm:$0xff]  ;;  %v9723_v61 = vcombine.low %v248_v49, %v272_v50  ;;  %v178_v3 = vld [vmem:[#allocation6 + $0xd8] sm:$0xff]  ;;  %p11670_p6 = pnand %p11669_p5, %p11663_p2 }
  0xad   :  { %1563 = vmatprep.subr.bf16.mxu1 %v9722_v21  ;;  %1645 = vmatprep.subr.bf16.mxu0 %v9726_v22  ;;  %v9634_v39 = vcombine.high %v155_v33, %v179_v34  ;;  %v203_v43 = vld [vmem:[#allocation6 + $0x1a0] sm:$0xff]  ;;  %v9633_v46 = vcombine.low %v155_v33, %v179_v34  ;;  %v9772_v63 = vcombine.high %v296_v57, %v320_v58  ;;  %v157_v4 = vld [vmem:[#allocation6 + $0x30] sm:$0xff]  ;;  %v202_v10 = vld [vmem:[#allocation6 + $0x198] sm:$0xff] }
  0xae   :  { %v227_v44 = vld [vmem:[#allocation6 + $0x260] sm:$0xff]  ;;  %v181_v5 = vld [vmem:[#allocation6 + $0xf0] sm:$0xff]  ;;  %v9771_v6 = vcombine.low %v296_v57, %v320_v58  ;;  %v9632_v8 = vcombine.high %v154_v2, %v178_v3  ;;  %v226_v11 = vld [vmem:[#allocation6 + $0x258] sm:$0xff]  ;;  %v9631_v14 = vcombine.low %v154_v2, %v178_v3 }
  0xaf   :  { %v9682_v48 = vcombine.high %v203_v43, %v227_v44  ;;  %v251_v51 = vld [vmem:[#allocation6 + $0x320] sm:$0xff]  ;;  %v9681_v54 = vcombine.low %v203_v43, %v227_v44  ;;  %v9638_v9 = vcombine.high %v157_v4, %v181_v5  ;;  %v205_v12 = vld [vmem:[#allocation6 + $0x1b0] sm:$0xff]  ;;  %v9637_v15 = vcombine.low %v157_v4, %v181_v5  ;;  %v250_v18 = vld [vmem:[#allocation6 + $0x318] sm:$0xff] }
  0xb0   :  { %1564 = vmatpush1.bf16.msra.mxu1 %v9721_v27  ;;  %1646 = vmatpush1.bf16.msra.mxu0 %v9725_v28  ;;  %v275_v52 = vld [vmem:[#allocation6 + $0x3e0] sm:$0xff]  ;;  %v229_v13 = vld [vmem:[#allocation6 + $0x270] sm:$0xff]  ;;  %v9680_v16 = vcombine.high %v202_v10, %v226_v11  ;;  %v274_v19 = vld [vmem:[#allocation6 + $0x3d8] sm:$0xff]  ;;  %v9679_v22 = vcombine.low %v202_v10, %v226_v11 }
  0xb1   :  { %1565 = vmatprep.subr.bf16.mxu1 %v9770_v29  ;;  %1647 = vmatprep.subr.bf16.mxu0 %v9774_v30  ;;  %v9730_v56 = vcombine.high %v251_v51, %v275_v52  ;;  %v299_v59 = vld [vmem:[#allocation6 + $0x4a0] sm:$0xff]  ;;  %v9729_v62 = vcombine.low %v251_v51, %v275_v52  ;;  %v9686_v17 = vcombine.high %v205_v12, %v229_v13  ;;  %v253_v20 = vld [vmem:[#allocation6 + $0x330] sm:$0xff]  ;;  %v298_v26 = vld [vmem:[#allocation6 + $0x498] sm:$0xff] }
  0xb2   :  { %v323_v60 = vld [vmem:[#allocation6 + $0x560] sm:$0xff]  ;;  %v277_v21 = vld [vmem:[#allocation6 + $0x3f0] sm:$0xff]  ;;  %v9685_v23 = vcombine.low %v205_v12, %v229_v13  ;;  %v9728_v24 = vcombine.high %v250_v18, %v274_v19  ;;  %v322_v27 = vld [vmem:[#allocation6 + $0x558] sm:$0xff]  ;;  %v9727_v30 = vcombine.low %v250_v18, %v274_v19 }
  0xb3   :  { %v9778_v1 = vcombine.high %v299_v59, %v323_v60  ;;  %v9777_v7 = vcombine.low %v299_v59, %v323_v60  ;;  %v9734_v25 = vcombine.high %v253_v20, %v277_v21  ;;  %v301_v28 = vld [vmem:[#allocation6 + $0x4b0] sm:$0xff]  ;;  %v9733_v31 = vcombine.low %v253_v20, %v277_v21  ;;  %v156_v34 = vld [vmem:[#allocation6 + $0x28] sm:$0xff]  ;;  %v159_v36 = vld [vmem:[#allocation6 + $0x40] sm:$0xff] }
  0xb4   :  { %1566 = vmatpush1.bf16.msra.mxu1 %v9769_v35  ;;  %1648 = vmatpush1.bf16.msra.mxu0 %v9773_v37  ;;  %v325_v29 = vld [vmem:[#allocation6 + $0x570] sm:$0xff]  ;;  %v9776_v32 = vcombine.high %v298_v26, %v322_v27  ;;  %v180_v35 = vld [vmem:[#allocation6 + $0xe8] sm:$0xff]  ;;  %v183_v37 = vld [vmem:[#allocation6 + $0x100] sm:$0xff] }
  0xb5   :  { %1600 = vmatprep.subr.bf16.mxu1 %v9628_v38  ;;  %1723 = vmatprep.subr.bf16.mxu0 %v9634_v39  ;;  %v9782_v33 = vcombine.high %v301_v28, %v325_v29  ;;  %v9775_v38 = vcombine.low %v298_v26, %v322_v27  ;;  %v9781_v39 = vcombine.low %v301_v28, %v325_v29  ;;  %v204_v43 = vld [vmem:[#allocation6 + $0x1a8] sm:$0xff]  ;;  %v158_v4 = vld [vmem:[#allocation6 + $0x38] sm:$0xff]  ;;  %v257_v21 = vld [vmem:[#allocation6 + $0x350] sm:$0xff] }
  0xb6   :  { %v9636_v40 = vcombine.high %v156_v34, %v180_v35  ;;  %v9642_v41 = vcombine.high %v159_v36, %v183_v37  ;;  %v228_v44 = vld [vmem:[#allocation6 + $0x268] sm:$0xff]  ;;  %v182_v5 = vld [vmem:[#allocation6 + $0xf8] sm:$0xff]  ;;  %v305_v29 = vld [vmem:[#allocation6 + $0x4d0] sm:$0xff] }
  0xb7   :  { %9817 = vmatmul.mubr.msk.bf16.vlgmr.msra.gmra.mrb[0].mxu1 %vm1555_vm0, %v11879_v42  ;;  %9819 = vmatmul.mubr.msk.bf16.vlgmr.msra.gmra.mrb[0].mxu0 %vm1555_vm0, %v11879_v42  ;;  %v9684_v49 = vcombine.high %v204_v43, %v228_v44  ;;  %v252_v51 = vld [vmem:[#allocation6 + $0x328] sm:$0xff]  ;;  %v9640_v10 = vcombine.high %v158_v4, %v182_v5  ;;  %v206_v12 = vld [vmem:[#allocation6 + $0x1b8] sm:$0xff] }
  0xb8   :  { %1601 = vmatpush1.bf16.msra.mxu1 %v9627_v45  ;;  %1724 = vmatpush1.bf16.msra.mxu0 %v9633_v46  ;;  %v207_v45 = vld [vmem:[#allocation6 + $0x1c0] sm:$0xff]  ;;  %v276_v52 = vld [vmem:[#allocation6 + $0x3e8] sm:$0xff]  ;;  %v230_v13 = vld [vmem:[#allocation6 + $0x278] sm:$0xff] }
  0xb9   :  { %1602 = vmatprep.subr.bf16.mxu1 %v9676_v47  ;;  %1725 = vmatprep.subr.bf16.mxu0 %v9682_v48  ;;  %v231_v46 = vld [vmem:[#allocation6 + $0x280] sm:$0xff]  ;;  %v9635_v47 = vcombine.low %v156_v34, %v180_v35  ;;  %v9641_v48 = vcombine.low %v159_v36, %v183_v37  ;;  %v9732_v57 = vcombine.high %v252_v51, %v276_v52  ;;  %v300_v59 = vld [vmem:[#allocation6 + $0x4a8] sm:$0xff]  ;;  %v254_v19 = vld [vmem:[#allocation6 + $0x338] sm:$0xff] }
  0xba   :  { %1632 = vmatprep.mubr.bf16.mxu1 %v11711_v0  ;;  %1755 = vmatprep.mubr.bf16.mxu0 %v11711_v0  ;;  %v9690_v50 = vcombine.high %v207_v45, %v231_v46  ;;  %v324_v60 = vld [vmem:[#allocation6 + $0x568] sm:$0xff]  ;;  %v9688_v18 = vcombine.high %v206_v12, %v230_v13  ;;  %v278_v20 = vld [vmem:[#allocation6 + $0x3f8] sm:$0xff]  ;;  %v163_v37 = vld [vmem:[#allocation6 + $0x60] sm:$0xff] }
  0xbb   :  { %v9780_v2 = vcombine.high %v300_v59, %v324_v60  ;;  %v9736_v26 = vcombine.high %v254_v19, %v278_v20  ;;  %v302_v27 = vld [vmem:[#allocation6 + $0x4b8] sm:$0xff]  ;;  %v160_v35 = vld [vmem:[#allocation6 + $0x48] sm:$0xff] }
  0xbc   :  { %1603 = vmatpush1.bf16.msra.mxu1 %v9675_v53  ;;  %1726 = vmatpush1.bf16.msra.mxu0 %v9681_v54  ;;  %v255_v53 = vld [vmem:[#allocation6 + $0x340] sm:$0xff]  ;;  %v326_v28 = vld [vmem:[#allocation6 + $0x578] sm:$0xff]  ;;  %v184_v36 = vld [vmem:[#allocation6 + $0x108] sm:$0xff] }
  0xbd   :  { %1604 = vmatprep.subr.bf16.mxu1 %v9724_v55  ;;  %1727 = vmatprep.subr.bf16.mxu0 %v9730_v56  ;;  %v279_v54 = vld [vmem:[#allocation6 + $0x400] sm:$0xff]  ;;  %v9683_v55 = vcombine.low %v204_v43, %v228_v44  ;;  %v9689_v56 = vcombine.low %v207_v45, %v231_v46  ;;  %v9784_v34 = vcombine.high %v302_v27, %v326_v28  ;;  %v208_v44 = vld [vmem:[#allocation6 + $0x1c8] sm:$0xff] }
  0xbe   :  { %v9738_v58 = vcombine.high %v255_v53, %v279_v54  ;;  %v9644_v43 = vcombine.high %v160_v35, %v184_v36  ;;  %v232_v45 = vld [vmem:[#allocation6 + $0x288] sm:$0xff]  ;;  %v211_v46 = vld [vmem:[#allocation6 + $0x1e0] sm:$0xff] }
  0xc0   :  { %1605 = vmatpush1.bf16.msra.mxu1 %v9723_v61  ;;  %1728 = vmatpush1.bf16.msra.mxu0 %v9729_v62  ;;  %v303_v61 = vld [vmem:[#allocation6 + $0x4c0] sm:$0xff] }
  0xc1   :  { %1606 = vmatprep.subr.bf16.mxu1 %v9772_v63  ;;  %1729 = vmatprep.subr.bf16.mxu0 %v9778_v1  ;;  %v327_v62 = vld [vmem:[#allocation6 + $0x580] sm:$0xff]  ;;  %v9731_v63 = vcombine.low %v252_v51, %v276_v52  ;;  %v9737_v1 = vcombine.low %v255_v53, %v279_v54  ;;  %v9692_v51 = vcombine.high %v208_v44, %v232_v45  ;;  %v256_v52 = vld [vmem:[#allocation6 + $0x348] sm:$0xff] }
  0xc2   :  { %v9786_v3 = vcombine.high %v303_v61, %v327_v62  ;;  %v280_v53 = vld [vmem:[#allocation6 + $0x408] sm:$0xff]  ;;  %v259_v54 = vld [vmem:[#allocation6 + $0x360] sm:$0xff] }
  0xc4   :  { %1607 = vmatpush1.bf16.msra.mxu1 %v9771_v6  ;;  %1730 = vmatpush1.bf16.msra.mxu0 %v9777_v7  ;;  %v161_v6 = vld [vmem:[#allocation6 + $0x50] sm:$0xff] }
  0xc5   :  { %1682 = vmatprep.subr.bf16.mxu1 %v9632_v8  ;;  %1805 = vmatprep.subr.bf16.mxu0 %v9638_v9  ;;  %v185_v7 = vld [vmem:[#allocation6 + $0x110] sm:$0xff]  ;;  %v9779_v8 = vcombine.low %v300_v59, %v324_v60  ;;  %v9785_v9 = vcombine.low %v303_v61, %v327_v62  ;;  %v9740_v59 = vcombine.high %v256_v52, %v280_v53  ;;  %v304_v60 = vld [vmem:[#allocation6 + $0x4c8] sm:$0xff]  ;;  %v307_v62 = vld [vmem:[#allocation6 + $0x4e0] sm:$0xff] }
  0xc6   :  { %v9646_v11 = vcombine.high %v161_v6, %v185_v7  ;;  %v328_v61 = vld [vmem:[#allocation6 + $0x588] sm:$0xff] }
  0xc7   :  { %9818 = vmatmul.mubr.msk.bf16.vlgmr.msra.gmra.mrb[4].mxu1 %vm1555_vm0, %v11879_v42  ;;  %9821 = vmatmul.mubr.msk.bf16.vlgmr.msra.gmra.mrb[4].mxu0 %vm1555_vm0, %v11879_v42 }
  0xc8   :  { %1683 = vmatpush1.bf16.msra.mxu1 %v9631_v14  ;;  %1806 = vmatpush1.bf16.msra.mxu0 %v9637_v15  ;;  %v209_v14 = vld [vmem:[#allocation6 + $0x1d0] sm:$0xff] }
  0xc9   :  { %1684 = vmatprep.subr.bf16.mxu1 %v9680_v16  ;;  %1807 = vmatprep.subr.bf16.mxu0 %v9686_v17  ;;  %v233_v15 = vld [vmem:[#allocation6 + $0x290] sm:$0xff]  ;;  %v9639_v16 = vcombine.low %v158_v4, %v182_v5  ;;  %v9645_v17 = vcombine.low %v161_v6, %v185_v7  ;;  %v9788_v4 = vcombine.high %v304_v60, %v328_v61  ;;  %v162_v5 = vld [vmem:[#allocation6 + $0x58] sm:$0xff] }
  0xca   :  { %1714 = vmatprep.mubr.bf16.mxu1 %v11711_v0  ;;  %1837 = vmatprep.mubr.bf16.mxu0 %v11711_v0  ;;  %v186_v6 = vld [vmem:[#allocation6 + $0x118] sm:$0xff]  ;;  %v165_v7 = vld [vmem:[#allocation6 + $0x70] sm:$0xff] }
  0xcc   :  { %1685 = vmatpush1.bf16.msra.mxu1 %v9679_v22  ;;  %1808 = vmatpush1.bf16.msra.mxu0 %v9685_v23  ;;  %v9694_v22 = vcombine.high %v209_v14, %v233_v15  ;;  %v281_v23 = vld [vmem:[#allocation6 + $0x410] sm:$0xff] }
  0xcd   :  { %1686 = vmatprep.subr.bf16.mxu1 %v9728_v24  ;;  %1809 = vmatprep.subr.bf16.mxu0 %v9734_v25  ;;  %v9687_v24 = vcombine.low %v206_v12, %v230_v13  ;;  %v9693_v25 = vcombine.low %v209_v14, %v233_v15  ;;  %v9648_v12 = vcombine.high %v162_v5, %v186_v6  ;;  %v210_v13 = vld [vmem:[#allocation6 + $0x1d8] sm:$0xff]  ;;  %v213_v15 = vld [vmem:[#allocation6 + $0x1f0] sm:$0xff] }
  0xce   :  { %v234_v14 = vld [vmem:[#allocation6 + $0x298] sm:$0xff] }
  0xd0   :  { %1687 = vmatpush1.bf16.msra.mxu1 %v9727_v30  ;;  %1810 = vmatpush1.bf16.msra.mxu0 %v9733_v31  ;;  %v9742_v30 = vcombine.high %v257_v21, %v281_v23  ;;  %v329_v31 = vld [vmem:[#allocation6 + $0x590] sm:$0xff] }
  0xd1   :  { %1688 = vmatprep.subr.bf16.mxu1 %v9776_v32  ;;  %1811 = vmatprep.subr.bf16.mxu0 %v9782_v33  ;;  %v9735_v32 = vcombine.low %v254_v19, %v278_v20  ;;  %v9741_v33 = vcombine.low %v257_v21, %v281_v23  ;;  %v9696_v20 = vcombine.high %v210_v13, %v234_v14  ;;  %v258_v21 = vld [vmem:[#allocation6 + $0x358] sm:$0xff] }
  0xd4   :  { %1689 = vmatpush1.bf16.msra.mxu1 %v9775_v38  ;;  %1812 = vmatpush1.bf16.msra.mxu0 %v9781_v39  ;;  %v9790_v38 = vcombine.high %v305_v29, %v329_v31  ;;  %v187_v39 = vld [vmem:[#allocation6 + $0x120] sm:$0xff] }
  0xd5   :  { %1764 = vmatprep.subr.bf16.mxu1 %v9636_v40  ;;  %1887 = vmatprep.subr.bf16.mxu0 %v9642_v41  ;;  %v9783_v40 = vcombine.low %v302_v27, %v326_v28  ;;  %v9789_v41 = vcombine.low %v305_v29, %v329_v31  ;;  %v306_v29 = vld [vmem:[#allocation6 + $0x4d8] sm:$0xff] }
  0xd7   :  { %9820 = vmatmul.mubr.msk.bf16.vlgmr.msra.gmra.mrb[8].mxu1 %vm1555_vm0, %v11879_v42  ;;  %9823 = vmatmul.mubr.msk.bf16.vlgmr.msra.gmra.mrb[8].mxu0 %vm1555_vm0, %v11879_v42 }
  0xd8   :  { %1765 = vmatpush1.bf16.msra.mxu1 %v9635_v47  ;;  %1888 = vmatpush1.bf16.msra.mxu0 %v9641_v48  ;;  %v9650_v47 = vcombine.high %v163_v37, %v187_v39  ;;  %v235_v48 = vld [vmem:[#allocation6 + $0x2a0] sm:$0xff] }
  0xd9   :  { %1766 = vmatprep.subr.bf16.mxu1 %v9684_v49  ;;  %1889 = vmatprep.subr.bf16.mxu0 %v9690_v50  ;;  %v9643_v49 = vcombine.low %v160_v35, %v184_v36  ;;  %v9649_v50 = vcombine.low %v163_v37, %v187_v39  ;;  %v164_v37 = vld [vmem:[#allocation6 + $0x68] sm:$0xff]  ;;  %v167_v39 = vld [vmem:[#allocation6 + $0x80] sm:$0xff] }
  0xda   :  { %1796 = vmatprep.mubr.bf16.mxu1 %v11711_v0  ;;  %1919 = vmatprep.mubr.bf16.mxu0 %v11711_v0 }
  0xdc   :  { %1767 = vmatpush1.bf16.msra.mxu1 %v9683_v55  ;;  %1890 = vmatpush1.bf16.msra.mxu0 %v9689_v56  ;;  %v9698_v55 = vcombine.high %v211_v46, %v235_v48  ;;  %v283_v56 = vld [vmem:[#allocation6 + $0x420] sm:$0xff] }
  0xdd   :  { %1768 = vmatprep.subr.bf16.mxu1 %v9732_v57  ;;  %1891 = vmatprep.subr.bf16.mxu0 %v9738_v58  ;;  %v9691_v57 = vcombine.low %v208_v44, %v232_v45  ;;  %v9697_v58 = vcombine.low %v211_v46, %v235_v48  ;;  %v212_v46 = vld [vmem:[#allocation6 + $0x1e8] sm:$0xff]  ;;  %v215_v48 = vld [vmem:[#allocation6 + $0x200] sm:$0xff] }
  0xe0   :  { %1769 = vmatpush1.bf16.msra.mxu1 %v9731_v63  ;;  %1892 = vmatpush1.bf16.msra.mxu0 %v9737_v1  ;;  %v9746_v63 = vcombine.high %v259_v54, %v283_v56  ;;  %v331_v1 = vld [vmem:[#allocation6 + $0x5a0] sm:$0xff] }
  0xe1   :  { %1770 = vmatprep.subr.bf16.mxu1 %v9780_v2  ;;  %1893 = vmatprep.subr.bf16.mxu0 %v9786_v3  ;;  %v9739_v2 = vcombine.low %v256_v52, %v280_v53  ;;  %v9745_v3 = vcombine.low %v259_v54, %v283_v56  ;;  %v260_v54 = vld [vmem:[#allocation6 + $0x368] sm:$0xff]  ;;  %v263_v56 = vld [vmem:[#allocation6 + $0x380] sm:$0xff] }
  0xe4   :  { %1771 = vmatpush1.bf16.msra.mxu1 %v9779_v8  ;;  %1894 = vmatpush1.bf16.msra.mxu0 %v9785_v9  ;;  %v9794_v8 = vcombine.high %v307_v62, %v331_v1  ;;  %v189_v9 = vld [vmem:[#allocation6 + $0x130] sm:$0xff] }
  0xe5   :  { %1846 = vmatprep.subr.bf16.mxu1 %v9640_v10  ;;  %1969 = vmatprep.subr.bf16.mxu0 %v9646_v11  ;;  %v9787_v10 = vcombine.low %v304_v60, %v328_v61  ;;  %v9793_v11 = vcombine.low %v307_v62, %v331_v1  ;;  %v9653_v19 = vcombine.low %v165_v7, %v189_v9  ;;  %v308_v62 = vld [vmem:[#allocation6 + $0x4e8] sm:$0xff]  ;;  %v311_v1 = vld [vmem:[#allocation6 + $0x500] sm:$0xff] }
  0xe7   :  { %9822 = vmatmul.mubr.msk.bf16.vlgmr.msra.gmra.mrb[12].mxu1 %vm1555_vm0, %v11879_v42  ;;  %9825 = vmatmul.mubr.msk.bf16.vlgmr.msra.gmra.mrb[12].mxu0 %vm1555_vm0, %v11879_v42 }
  0xe8   :  { %1847 = vmatpush1.bf16.msra.mxu1 %v9639_v16  ;;  %1970 = vmatpush1.bf16.msra.mxu0 %v9645_v17  ;;  %v9654_v16 = vcombine.high %v165_v7, %v189_v9  ;;  %v237_v17 = vld [vmem:[#allocation6 + $0x2b0] sm:$0xff]  ;;  %v166_v7 = vld [vmem:[#allocation6 + $0x78] sm:$0xff] }
  0xe9   :  { %1848 = vmatprep.subr.bf16.mxu1 %v9688_v18  ;;  %1971 = vmatprep.subr.bf16.mxu0 %v9694_v22  ;;  %v9647_v18 = vcombine.low %v162_v5, %v186_v6  ;;  %v282_v22 = vld [vmem:[#allocation6 + $0x418] sm:$0xff]  ;;  %v9702_v23 = vcombine.high %v213_v15, %v237_v17  ;;  %v9701_v27 = vcombine.low %v213_v15, %v237_v17  ;;  %v169_v9 = vld [vmem:[#allocation6 + $0x90] sm:$0xff] }
  0xea   :  { %1878 = vmatprep.mubr.bf16.mxu1 %v11711_v0  ;;  %2001 = vmatprep.mubr.bf16.mxu0 %v11711_v0  ;;  %v9744_v28 = vcombine.high %v258_v21, %v282_v22  ;;  %v214_v15 = vld [vmem:[#allocation6 + $0x1f8] sm:$0xff]  ;;  %v217_v17 = vld [vmem:[#allocation6 + $0x210] sm:$0xff] }
  0xec   :  { %1849 = vmatpush1.bf16.msra.mxu1 %v9687_v24  ;;  %1972 = vmatpush1.bf16.msra.mxu0 %v9693_v25  ;;  %v261_v24 = vld [vmem:[#allocation6 + $0x370] sm:$0xff] }
  0xed   :  { %1850 = vmatprep.subr.bf16.mxu1 %v9736_v26  ;;  %1973 = vmatprep.subr.bf16.mxu0 %v9742_v30  ;;  %v285_v25 = vld [vmem:[#allocation6 + $0x430] sm:$0xff]  ;;  %v9695_v26 = vcombine.low %v210_v13, %v234_v14  ;;  %v330_v30 = vld [vmem:[#allocation6 + $0x598] sm:$0xff] }
  0xee   :  { %v9750_v31 = vcombine.high %v261_v24, %v285_v25  ;;  %v9749_v35 = vcombine.low %v261_v24, %v285_v25  ;;  %v9792_v36 = vcombine.high %v306_v29, %v330_v30  ;;  %v286_v24 = vld [vmem:[#allocation6 + $0x438] sm:$0xff]  ;;  %v265_v25 = vld [vmem:[#allocation6 + $0x390] sm:$0xff] }
  0xf0   :  { %1851 = vmatpush1.bf16.msra.mxu1 %v9735_v32  ;;  %1974 = vmatpush1.bf16.msra.mxu0 %v9741_v33  ;;  %v309_v32 = vld [vmem:[#allocation6 + $0x4f0] sm:$0xff] }
  0xf1   :  { %1852 = vmatprep.subr.bf16.mxu1 %v9784_v34  ;;  %1975 = vmatprep.subr.bf16.mxu0 %v9790_v38  ;;  %v333_v33 = vld [vmem:[#allocation6 + $0x5b0] sm:$0xff]  ;;  %v9743_v34 = vcombine.low %v258_v21, %v282_v22  ;;  %v188_v38 = vld [vmem:[#allocation6 + $0x128] sm:$0xff] }
  0xf2   :  { %v9797_v44 = vcombine.low %v309_v32, %v333_v33  ;;  %v9652_v45 = vcombine.high %v164_v37, %v188_v38 }
  0xf4   :  { %1853 = vmatpush1.bf16.msra.mxu1 %v9783_v40  ;;  %1976 = vmatpush1.bf16.msra.mxu0 %v9789_v41  ;;  %v9798_v40 = vcombine.high %v309_v32, %v333_v33  ;;  %v191_v41 = vld [vmem:[#allocation6 + $0x140] sm:$0xff]  ;;  %v334_v32 = vld [vmem:[#allocation6 + $0x5b8] sm:$0xff]  ;;  %v313_v33 = vld [vmem:[#allocation6 + $0x510] sm:$0xff] }
  0xf5   :  { %1928 = vmatprep.subr.bf16.mxu1 %v9644_v43  ;;  %2051 = vmatprep.subr.bf16.mxu0 %v9650_v47  ;;  %v9791_v43 = vcombine.low %v306_v29, %v330_v30  ;;  %v236_v47 = vld [vmem:[#allocation6 + $0x2a8] sm:$0xff]  ;;  %v9657_v52 = vcombine.low %v167_v39, %v191_v41 }
  0xf6   :  { %v9700_v53 = vcombine.high %v212_v46, %v236_v47 }
  0xf7   :  { %9824 = vmatmul.mubr.msk.bf16.vlgmr.msra.gmra.mrb[16].mxu1 %vm1555_vm0, %v11879_v42  ;;  %9827 = vmatmul.mubr.msk.bf16.vlgmr.msra.gmra.mrb[16].mxu0 %vm1555_vm0, %v11879_v42 }
  0xf8   :  { %1929 = vmatpush1.bf16.msra.mxu1 %v9643_v49  ;;  %2052 = vmatpush1.bf16.msra.mxu0 %v9649_v50  ;;  %v9658_v49 = vcombine.high %v167_v39, %v191_v41  ;;  %v239_v50 = vld [vmem:[#allocation6 + $0x2c0] sm:$0xff]  ;;  %v168_v39 = vld [vmem:[#allocation6 + $0x88] sm:$0xff] }
  0xf9   :  { %1930 = vmatprep.subr.bf16.mxu1 %v9692_v51  ;;  %2053 = vmatprep.subr.bf16.mxu0 %v9698_v55  ;;  %v9651_v51 = vcombine.low %v164_v37, %v188_v38  ;;  %v284_v55 = vld [vmem:[#allocation6 + $0x428] sm:$0xff]  ;;  %v9705_v60 = vcombine.low %v215_v48, %v239_v50  ;;  %v171_v41 = vld [vmem:[#allocation6 + $0xa0] sm:$0xff] }
  0xfa   :  { %1960 = vmatprep.mubr.bf16.mxu1 %v11711_v0  ;;  %2083 = vmatprep.mubr.bf16.mxu0 %v11711_v0  ;;  %v9748_v61 = vcombine.high %v260_v54, %v284_v55 }
  0xfc   :  { %1931 = vmatpush1.bf16.msra.mxu1 %v9691_v57  ;;  %2054 = vmatpush1.bf16.msra.mxu0 %v9697_v58  ;;  %v9706_v57 = vcombine.high %v215_v48, %v239_v50  ;;  %v287_v58 = vld [vmem:[#allocation6 + $0x440] sm:$0xff]  ;;  %v216_v48 = vld [vmem:[#allocation6 + $0x208] sm:$0xff] }
  0xfd   :  { %1932 = vmatprep.subr.bf16.mxu1 %v9740_v59  ;;  %2055 = vmatprep.subr.bf16.mxu0 %v9746_v63  ;;  %v9699_v59 = vcombine.low %v212_v46, %v236_v47  ;;  %v332_v63 = vld [vmem:[#allocation6 + $0x5a8] sm:$0xff]  ;;  %v9753_v5 = vcombine.low %v263_v56, %v287_v58  ;;  %v219_v50 = vld [vmem:[#allocation6 + $0x220] sm:$0xff] }
  0xfe   :  { %v9796_v6 = vcombine.high %v308_v62, %v332_v63 }
 0x100   :  { %1933 = vmatpush1.bf16.msra.mxu1 %v9739_v2  ;;  %2056 = vmatpush1.bf16.msra.mxu0 %v9745_v3  ;;  %v9754_v2 = vcombine.high %v263_v56, %v287_v58  ;;  %v335_v3 = vld [vmem:[#allocation6 + $0x5c0] sm:$0xff]  ;;  %v264_v56 = vld [vmem:[#allocation6 + $0x388] sm:$0xff] }
 0x101   :  { %1934 = vmatprep.subr.bf16.mxu1 %v9788_v4  ;;  %2057 = vmatprep.subr.bf16.mxu0 %v9794_v8  ;;  %v9747_v4 = vcombine.low %v260_v54, %v284_v55  ;;  %v190_v8 = vld [vmem:[#allocation6 + $0x138] sm:$0xff]  ;;  %v9801_v13 = vcombine.low %v311_v1, %v335_v3 }
 0x102   :  { %v9656_v14 = vcombine.high %v166_v7, %v190_v8 }
 0x104   :  { %1935 = vmatpush1.bf16.msra.mxu1 %v9787_v10  ;;  %2058 = vmatpush1.bf16.msra.mxu0 %v9793_v11  ;;  %v9802_v10 = vcombine.high %v311_v1, %v335_v3  ;;  %v193_v11 = vld [vmem:[#allocation6 + $0x150] sm:$0xff]  ;;  %v312_v1 = vld [vmem:[#allocation6 + $0x508] sm:$0xff]  ;;  %v315_v3 = vld [vmem:[#allocation6 + $0x520] sm:$0xff] }
 0x105   :  { %2010 = vmatprep.subr.bf16.mxu1 %v9648_v12  ;;  %2133 = vmatprep.subr.bf16.mxu0 %v9654_v16  ;;  %v9795_v12 = vcombine.low %v308_v62, %v332_v63  ;;  %v238_v16 = vld [vmem:[#allocation6 + $0x2b8] sm:$0xff]  ;;  %v9661_v21 = vcombine.low %v169_v9, %v193_v11 }
 0x106   :  { %v9704_v22 = vcombine.high %v214_v15, %v238_v16 }
 0x107   :  { %9826 = vmatmul.mubr.msk.bf16.vlgmr.msra.gmra.mrb[20].mxu1 %vm1555_vm0, %v11879_v42  ;;  %9829 = vmatmul.mubr.msk.bf16.vlgmr.msra.gmra.mrb[20].mxu0 %vm1555_vm0, %v11879_v42 }
 0x108   :  { %2011 = vmatpush1.bf16.msra.mxu1 %v9647_v18  ;;  %2134 = vmatpush1.bf16.msra.mxu0 %v9653_v19  ;;  %v9662_v18 = vcombine.high %v169_v9, %v193_v11  ;;  %v241_v19 = vld [vmem:[#allocation6 + $0x2d0] sm:$0xff]  ;;  %v170_v9 = vld [vmem:[#allocation6 + $0x98] sm:$0xff] }
 0x109   :  { %2012 = vmatprep.subr.bf16.mxu1 %v9696_v20  ;;  %2135 = vmatprep.subr.bf16.mxu0 %v9702_v23  ;;  %v9655_v20 = vcombine.low %v166_v7, %v190_v8  ;;  %v262_v23 = vld [vmem:[#allocation6 + $0x378] sm:$0xff]  ;;  %v9709_v29 = vcombine.low %v217_v17, %v241_v19  ;;  %v173_v11 = vld [vmem:[#allocation6 + $0xb0] sm:$0xff] }
 0x10a   :  { %2042 = vmatprep.mubr.bf16.mxu1 %v11711_v0  ;;  %2165 = vmatprep.mubr.bf16.mxu0 %v11711_v0  ;;  %v9752_v30 = vcombine.high %v262_v23, %v286_v24 }
 0x10c   :  { %2013 = vmatpush1.bf16.msra.mxu1 %v9695_v26  ;;  %2136 = vmatpush1.bf16.msra.mxu0 %v9701_v27  ;;  %v9710_v26 = vcombine.high %v217_v17, %v241_v19  ;;  %v289_v27 = vld [vmem:[#allocation6 + $0x450] sm:$0xff]  ;;  %v218_v17 = vld [vmem:[#allocation6 + $0x218] sm:$0xff] }
 0x10d   :  { %2014 = vmatprep.subr.bf16.mxu1 %v9744_v28  ;;  %2137 = vmatprep.subr.bf16.mxu0 %v9750_v31  ;;  %v9703_v28 = vcombine.low %v214_v15, %v238_v16  ;;  %v310_v31 = vld [vmem:[#allocation6 + $0x4f8] sm:$0xff]  ;;  %v9757_v37 = vcombine.low %v265_v25, %v289_v27  ;;  %v221_v19 = vld [vmem:[#allocation6 + $0x230] sm:$0xff] }
 0x10e   :  { %v9800_v38 = vcombine.high %v310_v31, %v334_v32 }
 0x110   :  { %2015 = vmatpush1.bf16.msra.mxu1 %v9743_v34  ;;  %2138 = vmatpush1.bf16.msra.mxu0 %v9749_v35  ;;  %v9758_v34 = vcombine.high %v265_v25, %v289_v27  ;;  %v337_v35 = vld [vmem:[#allocation6 + $0x5d0] sm:$0xff]  ;;  %v266_v25 = vld [vmem:[#allocation6 + $0x398] sm:$0xff] }
 0x111   :  { %2016 = vmatprep.subr.bf16.mxu1 %v9792_v36  ;;  %2139 = vmatprep.subr.bf16.mxu0 %v9798_v40  ;;  %v9751_v36 = vcombine.low %v262_v23, %v286_v24  ;;  %v192_v40 = vld [vmem:[#allocation6 + $0x148] sm:$0xff]  ;;  %v9805_v46 = vcombine.low %v313_v33, %v337_v35  ;;  %v269_v27 = vld [vmem:[#allocation6 + $0x3b0] sm:$0xff] }
 0x112   :  { %v9660_v47 = vcombine.high %v168_v39, %v192_v40 }
 0x114   :  { %2017 = vmatpush1.bf16.msra.mxu1 %v9791_v43  ;;  %2140 = vmatpush1.bf16.msra.mxu0 %v9797_v44  ;;  %v9806_v43 = vcombine.high %v313_v33, %v337_v35  ;;  %v195_v44 = vld [vmem:[#allocation6 + $0x160] sm:$0xff]  ;;  %v314_v33 = vld [vmem:[#allocation6 + $0x518] sm:$0xff]  ;;  %v317_v35 = vld [vmem:[#allocation6 + $0x530] sm:$0xff] }
 0x115   :  { %2092 = vmatprep.subr.bf16.mxu1 %v9652_v45  ;;  %2215 = vmatprep.subr.bf16.mxu0 %v9658_v49  ;;  %v9799_v45 = vcombine.low %v310_v31, %v334_v32  ;;  %v240_v49 = vld [vmem:[#allocation6 + $0x2c8] sm:$0xff]  ;;  %v9665_v54 = vcombine.low %v171_v41, %v195_v44 }
 0x116   :  { %v9708_v55 = vcombine.high %v216_v48, %v240_v49 }
 0x117   :  { %9828 = vmatmul.mubr.msk.bf16.vlgmr.msra.gmra.mrb[24].mxu1 %vm1555_vm0, %v11879_v42  ;;  %9831 = vmatmul.mubr.msk.bf16.vlgmr.msra.gmra.mrb[24].mxu0 %vm1555_vm0, %v11879_v42 }
 0x118   :  { %2093 = vmatpush1.bf16.msra.mxu1 %v9651_v51  ;;  %2216 = vmatpush1.bf16.msra.mxu0 %v9657_v52  ;;  %v9666_v51 = vcombine.high %v171_v41, %v195_v44  ;;  %v243_v52 = vld [vmem:[#allocation6 + $0x2e0] sm:$0xff]  ;;  %v172_v41 = vld [vmem:[#allocation6 + $0xa8] sm:$0xff]  ;;  %v2687_v44 = vld [vmem:[#allocation9] sm:$0xff] }
 0x119   :  { %2094 = vmatprep.subr.bf16.mxu1 %v9700_v53  ;;  %2217 = vmatprep.subr.bf16.mxu0 %v9706_v57  ;;  %v9659_v53 = vcombine.low %v168_v39, %v192_v40  ;;  %v288_v57 = vld [vmem:[#allocation6 + $0x448] sm:$0xff]  ;;  %v9714_v58 = vcombine.high %v219_v50, %v243_v52  ;;  %v9713_v62 = vcombine.low %v219_v50, %v243_v52  ;;  %v2735_v52 = vld [vmem:[#allocation9 + $0x180] sm:$0xff] }
 0x11a   :  { %2124 = vmatprep.mubr.bf16.mxu1 %v11711_v0  ;;  %2247 = vmatprep.mubr.bf16.mxu0 %v11711_v0  ;;  %v9756_v63 = vcombine.high %v264_v56, %v288_v57  ;;  %v220_v50 = vld [vmem:[#allocation6 + $0x228] sm:$0xff] }
 0x11c   :  { %2095 = vmatpush1.bf16.msra.mxu1 %v9699_v59  ;;  %2218 = vmatpush1.bf16.msra.mxu0 %v9705_v60  ;;  %v267_v59 = vld [vmem:[#allocation6 + $0x3a0] sm:$0xff] }
 0x11d   :  { %2096 = vmatprep.subr.bf16.mxu1 %v9748_v61  ;;  %2219 = vmatprep.subr.bf16.mxu0 %v9754_v2  ;;  %v291_v60 = vld [vmem:[#allocation6 + $0x460] sm:$0xff]  ;;  %v9707_v61 = vcombine.low %v216_v48, %v240_v49  ;;  %v336_v2 = vld [vmem:[#allocation6 + $0x5c8] sm:$0xff] }
 0x11e   :  { %v9761_v7 = vcombine.low %v267_v59, %v291_v60  ;;  %v9804_v8 = vcombine.high %v312_v1, %v336_v2 }
 0x120   :  { %2097 = vmatpush1.bf16.msra.mxu1 %v9747_v4  ;;  %2220 = vmatpush1.bf16.msra.mxu0 %v9753_v5  ;;  %v9762_v4 = vcombine.high %v267_v59, %v291_v60  ;;  %v339_v5 = vld [vmem:[#allocation6 + $0x5e0] sm:$0xff]  ;;  %v292_v59 = vld [vmem:[#allocation6 + $0x468] sm:$0xff] }
 0x121   :  { %2098 = vmatprep.subr.bf16.mxu1 %v9796_v6  ;;  %2221 = vmatprep.subr.bf16.mxu0 %v9802_v10  ;;  %v9755_v6 = vcombine.low %v264_v56, %v288_v57  ;;  %v194_v10 = vld [vmem:[#allocation6 + $0x158] sm:$0xff]  ;;  %v9809_v15 = vcombine.low %v315_v3, %v339_v5 }
 0x122   :  { %v9664_v16 = vcombine.high %v170_v9, %v194_v10 }
 0x124   :  { %2099 = vmatpush1.bf16.msra.mxu1 %v9795_v12  ;;  %2222 = vmatpush1.bf16.msra.mxu0 %v9801_v13  ;;  %v9810_v12 = vcombine.high %v315_v3, %v339_v5  ;;  %v197_v13 = vld [vmem:[#allocation6 + $0x170] sm:$0xff]  ;;  %v316_v3 = vld [vmem:[#allocation6 + $0x528] sm:$0xff] }
 0x125   :  { %2174 = vmatprep.subr.bf16.mxu1 %v9656_v14  ;;  %2297 = vmatprep.subr.bf16.mxu0 %v9662_v18  ;;  %v9803_v14 = vcombine.low %v312_v1, %v336_v2  ;;  %v242_v18 = vld [vmem:[#allocation6 + $0x2d8] sm:$0xff]  ;;  %v9669_v23 = vcombine.low %v173_v11, %v197_v13  ;;  %v2831_v5 = vld [vmem:[#allocation9 + $0x480] sm:$0xff] }
 0x126   :  { %v9712_v24 = vcombine.high %v218_v17, %v242_v18 }
 0x127   :  { %9830 = vmatmul.mubr.msk.bf16.vlgmr.msra.gmra.mrb[28].mxu1 %vm1555_vm0, %v11879_v42  ;;  %9833 = vmatmul.mubr.msk.bf16.vlgmr.msra.gmra.mrb[28].mxu0 %vm1555_vm0, %v11879_v42 }
 0x128   :  { %2175 = vmatpush1.bf16.msra.mxu1 %v9655_v20  ;;  %2298 = vmatpush1.bf16.msra.mxu0 %v9661_v21  ;;  %v9670_v20 = vcombine.high %v173_v11, %v197_v13  ;;  %v245_v21 = vld [vmem:[#allocation6 + $0x2f0] sm:$0xff]  ;;  %v174_v11 = vld [vmem:[#allocation6 + $0xb8] sm:$0xff]  ;;  %v2689_v13 = vld [vmem:[#allocation9 + $0x10] sm:$0xff] }
 0x129   :  { %2176 = vmatprep.subr.bf16.mxu1 %v9704_v22  ;;  %2299 = vmatprep.subr.bf16.mxu0 %v9710_v26  ;;  %v9663_v22 = vcombine.low %v170_v9, %v194_v10  ;;  %v290_v26 = vld [vmem:[#allocation6 + $0x458] sm:$0xff]  ;;  %v9717_v31 = vcombine.low %v221_v19, %v245_v21 }
 0x12a   :  { %2206 = vmatprep.mubr.bf16.mxu1 %v11711_v0  ;;  %2329 = vmatprep.mubr.bf16.mxu0 %v11711_v0  ;;  %v9760_v32 = vcombine.high %v266_v25, %v290_v26 }
 0x12c   :  { %2177 = vmatpush1.bf16.msra.mxu1 %v9703_v28  ;;  %2300 = vmatpush1.bf16.msra.mxu0 %v9709_v29  ;;  %v9718_v28 = vcombine.high %v221_v19, %v245_v21  ;;  %v293_v29 = vld [vmem:[#allocation6 + $0x470] sm:$0xff]  ;;  %v222_v19 = vld [vmem:[#allocation6 + $0x238] sm:$0xff]  ;;  %v2737_v21 = vld [vmem:[#allocation9 + $0x190] sm:$0xff] }
 0x12d   :  { %2178 = vmatprep.subr.bf16.mxu1 %v9752_v30  ;;  %2301 = vmatprep.subr.bf16.mxu0 %v9758_v34  ;;  %v9711_v30 = vcombine.low %v218_v17, %v242_v18  ;;  %v338_v34 = vld [vmem:[#allocation6 + $0x5d8] sm:$0xff]  ;;  %v9765_v39 = vcombine.low %v269_v27, %v293_v29 }
 0x12e   :  { %v9808_v40 = vcombine.high %v314_v33, %v338_v34 }
 0x130   :  { %2179 = vmatpush1.bf16.msra.mxu1 %v9751_v36  ;;  %2302 = vmatpush1.bf16.msra.mxu0 %v9757_v37  ;;  %v9766_v36 = vcombine.high %v269_v27, %v293_v29  ;;  %v341_v37 = vld [vmem:[#allocation6 + $0x5f0] sm:$0xff]  ;;  %v270_v27 = vld [vmem:[#allocation6 + $0x3b8] sm:$0xff]  ;;  %v2785_v29 = vld [vmem:[#allocation9 + $0x310] sm:$0xff] }
 0x131   :  { %2180 = vmatprep.subr.bf16.mxu1 %v9800_v38  ;;  %2303 = vmatprep.subr.bf16.mxu0 %v9806_v43  ;;  %v9759_v38 = vcombine.low %v266_v25, %v290_v26  ;;  %v196_v43 = vld [vmem:[#allocation6 + $0x168] sm:$0xff]  ;;  %v9813_v48 = vcombine.low %v317_v35, %v341_v37 }
 0x132   :  { %v9668_v49 = vcombine.high %v172_v41, %v196_v43 }
 0x134   :  { %2181 = vmatpush1.bf16.msra.mxu1 %v9799_v45  ;;  %2304 = vmatpush1.bf16.msra.mxu0 %v9805_v46  ;;  %v9814_v45 = vcombine.high %v317_v35, %v341_v37  ;;  %v2711_v46 = vld [vmem:[#allocation9 + $0xc0] sm:$0xff]  ;;  %v318_v35 = vld [vmem:[#allocation6 + $0x538] sm:$0xff]  ;;  %v2833_v37 = vld [vmem:[#allocation9 + $0x490] sm:$0xff] }
 0x135   :  { %2256 = vmatprep.subr.bf16.mxu1 %v9660_v47  ;;  %2379 = vmatprep.subr.bf16.mxu0 %v9666_v51  ;;  %v9807_v47 = vcombine.low %v314_v33, %v338_v34  ;;  %v244_v51 = vld [vmem:[#allocation6 + $0x2e8] sm:$0xff]  ;;  %v9841_v56 = vcombine.low %v2687_v44, %v2711_v46 }
 0x136   :  { %v9716_v57 = vcombine.high %v220_v50, %v244_v51 }
 0x137   :  { %9832 = vmatmul.mubr.msk.bf16.vlgmr.msra.gmra.mrb[32].mxu1 %vm1555_vm0, %v11879_v42  ;;  %9835 = vmatmul.mubr.msk.bf16.vlgmr.msra.gmra.mrb[32].mxu0 %vm1555_vm0, %v11879_v42 }
 0x138   :  { %2257 = vmatpush1.bf16.msra.mxu1 %v9659_v53  ;;  %2380 = vmatpush1.bf16.msra.mxu0 %v9665_v54  ;;  %v9842_v53 = vcombine.high %v2687_v44, %v2711_v46  ;;  %v2759_v54 = vld [vmem:[#allocation9 + $0x240] sm:$0xff]  ;;  %v2688_v44 = vld [vmem:[#allocation9 + $0x8] sm:$0xff] }
 0x139   :  { %2258 = vmatprep.subr.bf16.mxu1 %v9708_v55  ;;  %2381 = vmatprep.subr.bf16.mxu0 %v9714_v58  ;;  %v9667_v55 = vcombine.low %v172_v41, %v196_v43  ;;  %v268_v58 = vld [vmem:[#allocation6 + $0x3a8] sm:$0xff]  ;;  %v9890_v60 = vcombine.high %v2735_v52, %v2759_v54  ;;  %v9889_v1 = vcombine.low %v2735_v52, %v2759_v54  ;;  %v2691_v46 = vld [vmem:[#allocation9 + $0x20] sm:$0xff]  ;;  %v2736_v52 = vld [vmem:[#allocation9 + $0x188] sm:$0xff] }
 0x13a   :  { %2288 = vmatprep.mubr.bf16.mxu1 %v11711_v0  ;;  %2411 = vmatprep.mubr.bf16.mxu0 %v11711_v0  ;;  %v9764_v2 = vcombine.high %v268_v58, %v292_v59  ;;  %v2739_v54 = vld [vmem:[#allocation9 + $0x1a0] sm:$0xff] }
 0x13c   :  { %2259 = vmatpush1.bf16.msra.mxu1 %v9707_v61  ;;  %2382 = vmatpush1.bf16.msra.mxu0 %v9713_v62  ;;  %v2783_v61 = vld [vmem:[#allocation9 + $0x300] sm:$0xff] }
 0x13d   :  { %2260 = vmatprep.subr.bf16.mxu1 %v9756_v63  ;;  %2383 = vmatprep.subr.bf16.mxu0 %v9762_v4  ;;  %v2807_v62 = vld [vmem:[#allocation9 + $0x3c0] sm:$0xff]  ;;  %v9715_v63 = vcombine.low %v220_v50, %v244_v51  ;;  %v340_v4 = vld [vmem:[#allocation6 + $0x5e8] sm:$0xff] }
 0x13e   :  { %v9937_v9 = vcombine.low %v2783_v61, %v2807_v62  ;;  %v9812_v10 = vcombine.high %v316_v3, %v340_v4 }
 0x140   :  { %2261 = vmatpush1.bf16.msra.mxu1 %v9755_v6  ;;  %2384 = vmatpush1.bf16.msra.mxu0 %v9761_v7  ;;  %v9938_v6 = vcombine.high %v2783_v61, %v2807_v62  ;;  %v2855_v7 = vld [vmem:[#allocation9 + $0x540] sm:$0xff]  ;;  %v2808_v61 = vld [vmem:[#allocation9 + $0x3c8] sm:$0xff] }
 0x141   :  { %2262 = vmatprep.subr.bf16.mxu1 %v9804_v8  ;;  %2385 = vmatprep.subr.bf16.mxu0 %v9810_v12  ;;  %v9763_v8 = vcombine.low %v268_v58, %v292_v59  ;;  %v198_v12 = vld [vmem:[#allocation6 + $0x178] sm:$0xff]  ;;  %v9985_v17 = vcombine.low %v2831_v5, %v2855_v7 }
 0x142   :  { %v9672_v18 = vcombine.high %v174_v11, %v198_v12 }
 0x144   :  { %2263 = vmatpush1.bf16.msra.mxu1 %v9803_v14  ;;  %2386 = vmatpush1.bf16.msra.mxu0 %v9809_v15  ;;  %v9986_v14 = vcombine.high %v2831_v5, %v2855_v7  ;;  %v2713_v15 = vld [vmem:[#allocation9 + $0xd0] sm:$0xff]  ;;  %v2832_v5 = vld [vmem:[#allocation9 + $0x488] sm:$0xff]  ;;  %v2835_v7 = vld [vmem:[#allocation9 + $0x4a0] sm:$0xff] }
 0x145   :  { %2338 = vmatprep.subr.bf16.mxu1 %v9664_v16  ;;  %2461 = vmatprep.subr.bf16.mxu0 %v9670_v20  ;;  %v9811_v16 = vcombine.low %v316_v3, %v340_v4  ;;  %v246_v20 = vld [vmem:[#allocation6 + $0x2f8] sm:$0xff]  ;;  %v9845_v25 = vcombine.low %v2689_v13, %v2713_v15 }
 0x146   :  { %v9720_v26 = vcombine.high %v222_v19, %v246_v20 }
 0x147   :  { %9834 = vmatmul.mubr.msk.bf16.vlgmr.msra.gmra.mrb[36].mxu1 %vm1555_vm0, %v11879_v42  ;;  %9837 = vmatmul.mubr.msk.bf16.vlgmr.msra.gmra.mrb[36].mxu0 %vm1555_vm0, %v11879_v42 }
 0x148   :  { %2339 = vmatpush1.bf16.msra.mxu1 %v9663_v22  ;;  %2462 = vmatpush1.bf16.msra.mxu0 %v9669_v23  ;;  %v9846_v22 = vcombine.high %v2689_v13, %v2713_v15  ;;  %v2761_v23 = vld [vmem:[#allocation9 + $0x250] sm:$0xff]  ;;  %v2714_v15 = vld [vmem:[#allocation9 + $0xd8] sm:$0xff] }
 0x149   :  { %2340 = vmatprep.subr.bf16.mxu1 %v9712_v24  ;;  %2463 = vmatprep.subr.bf16.mxu0 %v9718_v28  ;;  %v9671_v24 = vcombine.low %v174_v11, %v198_v12  ;;  %v294_v28 = vld [vmem:[#allocation6 + $0x478] sm:$0xff]  ;;  %v9893_v33 = vcombine.low %v2737_v21, %v2761_v23 }
 0x14a   :  { %2370 = vmatprep.mubr.bf16.mxu1 %v11711_v0  ;;  %2493 = vmatprep.mubr.bf16.mxu0 %v11711_v0  ;;  %v9768_v34 = vcombine.high %v270_v27, %v294_v28 }
 0x14c   :  { %2341 = vmatpush1.bf16.msra.mxu1 %v9711_v30  ;;  %2464 = vmatpush1.bf16.msra.mxu0 %v9717_v31  ;;  %v9894_v30 = vcombine.high %v2737_v21, %v2761_v23  ;;  %v2809_v31 = vld [vmem:[#allocation9 + $0x3d0] sm:$0xff] }
 0x14d   :  { %2342 = vmatprep.subr.bf16.mxu1 %v9760_v32  ;;  %2465 = vmatprep.subr.bf16.mxu0 %v9766_v36  ;;  %v9719_v32 = vcombine.low %v222_v19, %v246_v20  ;;  %v342_v36 = vld [vmem:[#allocation6 + $0x5f8] sm:$0xff]  ;;  %v9941_v41 = vcombine.low %v2785_v29, %v2809_v31  ;;  %v2717_v19 = vld [vmem:[#allocation9 + $0xf0] sm:$0xff] }
 0x14e   :  { %v9816_v43 = vcombine.high %v318_v35, %v342_v36 }
 0x150   :  { %2343 = vmatpush1.bf16.msra.mxu1 %v9759_v38  ;;  %2466 = vmatpush1.bf16.msra.mxu0 %v9765_v39  ;;  %v9942_v38 = vcombine.high %v2785_v29, %v2809_v31  ;;  %v2857_v39 = vld [vmem:[#allocation9 + $0x550] sm:$0xff] }
 0x151   :  { %2344 = vmatprep.subr.bf16.mxu1 %v9808_v40  ;;  %2467 = vmatprep.subr.bf16.mxu0 %v9814_v45  ;;  %v9767_v40 = vcombine.low %v270_v27, %v294_v28  ;;  %v2712_v45 = vld [vmem:[#allocation9 + $0xc8] sm:$0xff]  ;;  %v9989_v50 = vcombine.low %v2833_v37, %v2857_v39  ;;  %v2741_v27 = vld [vmem:[#allocation9 + $0x1b0] sm:$0xff] }
 0x152   :  { %v9844_v51 = vcombine.high %v2688_v44, %v2712_v45  ;;  %v11967_v29 = vld [vmem:[#allocation8] sm:$0xff] }
 0x154   :  { %2345 = vmatpush1.bf16.msra.mxu1 %v9807_v47  ;;  %2468 = vmatpush1.bf16.msra.mxu0 %v9813_v48  ;;  %v9990_v47 = vcombine.high %v2833_v37, %v2857_v39  ;;  %v2715_v48 = vld [vmem:[#allocation9 + $0xe0] sm:$0xff]  ;;  %v2789_v37 = vld [vmem:[#allocation9 + $0x330] sm:$0xff] }
 0x155   :  { %2420 = vmatprep.subr.bf16.mxu1 %v9668_v49  ;;  %4091 = vmatprep.subr.bf16.mxu0 %v9842_v53  ;;  %v9815_v49 = vcombine.low %v318_v35, %v342_v36  ;;  %v2760_v53 = vld [vmem:[#allocation9 + $0x248] sm:$0xff]  ;;  %v9849_v58 = vcombine.low %v2691_v46, %v2715_v48  ;;  %v2786_v35 = vld [vmem:[#allocation9 + $0x318] sm:$0xff] }
 0x156   :  { %v9892_v59 = vcombine.high %v2736_v52, %v2760_v53  ;;  %v2810_v36 = vld [vmem:[#allocation9 + $0x3d8] sm:$0xff] }
 0x157   :  { %9836 = vmatmul.mubr.msk.bf16.vlgmr.msra.gmra.mrb[40].mxu1 %vm1555_vm0, %v11879_v42  ;;  %9839 = vmatmul.mubr.msk.bf16.vlgmr.msra.gmra.mrb[40].mxu0 %vm1555_vm0, %v11879_v42 }
 0x158   :  { %2421 = vmatpush1.bf16.msra.mxu1 %v9667_v55  ;;  %4092 = vmatpush1.bf16.msra.mxu0 %v9841_v56  ;;  %v9850_v55 = vcombine.high %v2691_v46, %v2715_v48  ;;  %v2763_v56 = vld [vmem:[#allocation9 + $0x260] sm:$0xff]  ;;  %v2834_v48 = vld [vmem:[#allocation9 + $0x498] sm:$0xff] }
 0x159   :  { %2422 = vmatprep.subr.bf16.mxu1 %v9716_v57  ;;  %4093 = vmatprep.subr.bf16.mxu0 %v9890_v60  ;;  %v9843_v57 = vcombine.low %v2688_v44, %v2712_v45  ;;  %v2784_v60 = vld [vmem:[#allocation9 + $0x308] sm:$0xff]  ;;  %v9898_v62 = vcombine.high %v2739_v54, %v2763_v56  ;;  %v9897_v3 = vcombine.low %v2739_v54, %v2763_v56  ;;  %v2861_v54 = vld [vmem:[#allocation9 + $0x570] sm:$0xff] }
 0x15a   :  { %2452 = vmatprep.mubr.bf16.mxu1 %v11711_v0  ;;  %4123 = vmatprep.mubr.bf16.mxu0 %v11711_v0  ;;  %v9940_v4 = vcombine.high %v2784_v60, %v2808_v61  ;;  %v9939_v11 = vcombine.low %v2784_v60, %v2808_v61  ;;  %v9943_v60 = vcombine.low %v2786_v35, %v2810_v36 }
 0x15c   :  { %2423 = vmatpush1.bf16.msra.mxu1 %v9715_v63  ;;  %4094 = vmatpush1.bf16.msra.mxu0 %v9889_v1  ;;  %v2787_v63 = vld [vmem:[#allocation9 + $0x320] sm:$0xff] }
 0x15d   :  { %2424 = vmatprep.subr.bf16.mxu1 %v9764_v2  ;;  %4095 = vmatprep.subr.bf16.mxu0 %v9938_v6  ;;  %v2811_v1 = vld [vmem:[#allocation9 + $0x3e0] sm:$0xff]  ;;  %v9891_v2 = vcombine.low %v2736_v52, %v2760_v53  ;;  %v2856_v6 = vld [vmem:[#allocation9 + $0x548] sm:$0xff] }
 0x15e   :  { %v9945_v12 = vcombine.low %v2787_v63, %v2811_v1  ;;  %v9988_v13 = vcombine.high %v2832_v5, %v2856_v6  ;;  %v9987_v20 = vcombine.low %v2832_v5, %v2856_v6  ;;  %v2716_v5 = vld [vmem:[#allocation9 + $0xe8] sm:$0xff] }
 0x160   :  { %2425 = vmatpush1.bf16.msra.mxu1 %v9763_v8  ;;  %4096 = vmatpush1.bf16.msra.mxu0 %v9937_v9  ;;  %v355_v8 = vlaneseq  ;;  %v9946_v9 = vcombine.high %v2787_v63, %v2811_v1 }
 0x161   :  { %2426 = vmatprep.subr.bf16.mxu1 %v9812_v10  ;;  %4097 = vmatprep.subr.bf16.mxu0 %v9986_v14  ;;  %v2859_v10 = vld [vmem:[#allocation9 + $0x560] sm:$0xff]  ;;  %v2690_v14 = vld [vmem:[#allocation9 + $0x18] sm:$0xff] }
 0x162   :  { %v9993_v21 = vcombine.low %v2835_v7, %v2859_v10 }
 0x164   :  { %2427 = vmatpush1.bf16.msra.mxu1 %v9811_v16  ;;  %4098 = vmatpush1.bf16.msra.mxu0 %v9985_v17  ;;  %v2693_v16 = vld [vmem:[#allocation9 + $0x30] sm:$0xff]  ;;  %v11959_v17 = vshrl.u32 %v355_v8, 7 }
 0x165   :  { %2502 = vmatprep.subr.bf16.mxu1 %v9672_v18  ;;  %4173 = vmatprep.subr.bf16.mxu0 %v9846_v22  ;;  %v9994_v18 = vcombine.high %v2835_v7, %v2859_v10  ;;  %v9848_v22 = vcombine.high %v2690_v14, %v2714_v15  ;;  %v9854_v28 = vcombine.high %v2693_v16, %v2717_v19  ;;  %v2695_v10 = vld [vmem:[#allocation9 + $0x40] sm:$0xff] }
 0x166   :  { %v11962_v23 = vsub.s32 0, %v11959_v17  ;;  %v11970_v31 = vsub.s32 4, %v11959_v17 }
 0x167   :  { %9838 = vmatmul.mubr.msk.bf16.vlgmr.msra.gmra.mrb[44].mxu1 %vm1555_vm0, %v11879_v42  ;;  %10033 = vmatmul.mubr.msk.bf16.vlgmr.msra.gmra.mrb[44].mxu0 %vm1555_vm0, %v11879_v42 }
 0x168   :  { %2503 = vmatpush1.bf16.msra.mxu1 %v9671_v24  ;;  %4174 = vmatpush1.bf16.msra.mxu0 %v9845_v25  ;;  %v11965_v24 = vsub.s32 1, %v11959_v17  ;;  %v2738_v25 = vld [vmem:[#allocation9 + $0x198] sm:$0xff]  ;;  %v374_v45 = vrot.slane %v11967_v29, %v11970_v31 }
 0x169   :  { %2504 = vmatprep.subr.bf16.mxu1 %v9720_v26  ;;  %4175 = vmatprep.subr.bf16.mxu0 %v9894_v30  ;;  %v2762_v26 = vld [vmem:[#allocation9 + $0x258] sm:$0xff]  ;;  %v2765_v30 = vld [vmem:[#allocation9 + $0x270] sm:$0xff] }
 0x16a   :  { %2534 = vmatprep.mubr.bf16.mxu1 %v11711_v0  ;;  %4205 = vmatprep.mubr.bf16.mxu0 %v11711_v0  ;;  %v9902_v39 = vcombine.high %v2741_v27, %v2765_v30  ;;  %v9895_v44 = vcombine.low %v2738_v25, %v2762_v26  ;;  %v9901_v46 = vcombine.low %v2741_v27, %v2765_v30  ;;  %v2743_v27 = vld [vmem:[#allocation9 + $0x1c0] sm:$0xff] }
 0x16c   :  { %2505 = vmatpush1.bf16.msra.mxu1 %v9719_v32  ;;  %4176 = vmatpush1.bf16.msra.mxu0 %v9893_v33  ;;  %v9847_v32 = vcombine.low %v2690_v14, %v2714_v15  ;;  %v9853_v33 = vcombine.low %v2693_v16, %v2717_v19  ;;  %v2719_v14 = vld [vmem:[#allocation9 + $0x100] sm:$0xff] }
 0x16d   :  { %2506 = vmatprep.subr.bf16.mxu1 %v9768_v34  ;;  %4177 = vmatprep.subr.bf16.mxu0 %v9942_v38  ;;  %v9896_v34 = vcombine.high %v2738_v25, %v2762_v26  ;;  %v11973_v38 = vsub.s32 5, %v11959_v17  ;;  %v2740_v25 = vld [vmem:[#allocation9 + $0x1a8] sm:$0xff]  ;;  %v9858_v30 = vcombine.high %v2695_v10, %v2719_v14 }
 0x16e   :  { %v2764_v26 = vld [vmem:[#allocation9 + $0x268] sm:$0xff] }
 0x170   :  { %2507 = vmatpush1.bf16.msra.mxu1 %v9767_v40  ;;  %4178 = vmatpush1.bf16.msra.mxu0 %v9941_v41  ;;  %v2813_v40 = vld [vmem:[#allocation9 + $0x3f0] sm:$0xff]  ;;  %v358_v41 = vrot.slane %v11967_v29, %v11962_v23 }
 0x171   :  { %2508 = vmatprep.subr.bf16.mxu1 %v9816_v43  ;;  %4179 = vmatprep.subr.bf16.mxu0 %v9990_v47  ;;  %v362_v43 = vrot.slane %v11967_v29, %v11965_v24  ;;  %v9944_v47 = vcombine.high %v2786_v35, %v2810_v36  ;;  %v9950_v53 = vcombine.high %v2789_v37, %v2813_v40  ;;  %v2788_v35 = vld [vmem:[#allocation9 + $0x328] sm:$0xff] }
 0x172   :  { %v2812_v36 = vld [vmem:[#allocation9 + $0x3e8] sm:$0xff] }
 0x174   :  { %2509 = vmatpush1.bf16.msra.mxu1 %v9815_v49  ;;  %4180 = vmatpush1.bf16.msra.mxu0 %v9989_v50  ;;  %v2858_v49 = vld [vmem:[#allocation9 + $0x558] sm:$0xff]  ;;  %v2837_v50 = vld [vmem:[#allocation9 + $0x4b0] sm:$0xff] }
 0x175   :  { %4132 = vmatprep.subr.bf16.mxu1 %v9844_v51  ;;  %4255 = vmatprep.subr.bf16.mxu0 %v9850_v55  ;;  %v378_v51 = vrot.slane %v11967_v29, %v11973_v38 }
 0x177   :  { %9840 = vmatmul.mubr.msk.bf16.vlgmr.msra.gmra.mrb[48].mxu1 %vm1555_vm0, %v11879_v42  ;;  %10035 = vmatmul.mubr.msk.bf16.vlgmr.msra.gmra.mrb[48].mxu0 %vm1555_vm0, %v11879_v42 }
 0x178   :  { %4133 = vmatpush1.bf16.msra.mxu1 %v9843_v57  ;;  %4256 = vmatpush1.bf16.msra.mxu0 %v9849_v58 }
 0x179   :  { %4134 = vmatprep.subr.bf16.mxu1 %v9892_v59  ;;  %4257 = vmatprep.subr.bf16.mxu0 %v9898_v62 }
 0x17a   :  { %4164 = vmatprep.mubr.bf16.mxu1 %v11711_v0  ;;  %4287 = vmatprep.mubr.bf16.mxu0 %v11711_v0 }
 0x17c   :  { %4135 = vmatpush1.bf16.msra.mxu1 %v9891_v2  ;;  %4258 = vmatpush1.bf16.msra.mxu0 %v9897_v3  ;;  %v9949_v2 = vcombine.low %v2789_v37, %v2813_v40  ;;  %v9992_v3 = vcombine.high %v2834_v48, %v2858_v49  ;;  %v9857_v37 = vcombine.low %v2695_v10, %v2719_v14  ;;  %v2791_v40 = vld [vmem:[#allocation9 + $0x340] sm:$0xff] }
 0x17d   :  { %4136 = vmatprep.subr.bf16.mxu1 %v9940_v4  ;;  %4259 = vmatprep.subr.bf16.mxu0 %v9946_v9  ;;  %v2692_v4 = vld [vmem:[#allocation9 + $0x28] sm:$0xff]  ;;  %v9998_v9 = vcombine.high %v2837_v50, %v2861_v54 }
 0x180   :  { %4137 = vmatpush1.bf16.msra.mxu1 %v9939_v11  ;;  %4260 = vmatpush1.bf16.msra.mxu0 %v9945_v12 }
 0x181   :  { %4138 = vmatprep.subr.bf16.mxu1 %v9988_v13  ;;  %4261 = vmatprep.subr.bf16.mxu0 %v9994_v18  ;;  %v9991_v18 = vcombine.low %v2834_v48, %v2858_v49  ;;  %v12005_v48 = vld [vmem:[#allocation9 + $0x4a8] sm:$0xff] }
 0x184   :  { %4139 = vmatpush1.bf16.msra.mxu1 %v9987_v20  ;;  %4262 = vmatpush1.bf16.msra.mxu0 %v9993_v21  ;;  %v9997_v20 = vcombine.low %v2837_v50, %v2861_v54  ;;  %v9852_v21 = vcombine.high %v2692_v4, %v2716_v5 }
 0x185   :  { %4214 = vmatprep.subr.bf16.mxu1 %v9848_v22  ;;  %4337 = vmatprep.subr.bf16.mxu0 %v9854_v28  ;;  %v11990_v22 = vsub.s32 2, %v11959_v17 }
 0x187   :  { %10034 = vmatmul.mubr.msk.bf16.vlgmr.msra.gmra.mrb[52].mxu1 %vm1555_vm0, %v11879_v42  ;;  %10037 = vmatmul.mubr.msk.bf16.vlgmr.msra.gmra.mrb[52].mxu0 %vm1555_vm0, %v11879_v42 }
 0x188   :  { %4215 = vmatpush1.bf16.msra.mxu1 %v9847_v32  ;;  %4338 = vmatpush1.bf16.msra.mxu0 %v9853_v33  ;;  %v11993_v32 = vsub.s32 3, %v11959_v17  ;;  %v2767_v33 = vld [vmem:[#allocation9 + $0x280] sm:$0xff] }
 0x189   :  { %4216 = vmatprep.subr.bf16.mxu1 %v9896_v34  ;;  %4339 = vmatprep.subr.bf16.mxu0 %v9902_v39  ;;  %v9851_v34 = vcombine.low %v2692_v4, %v2716_v5  ;;  %v9900_v39 = vcombine.high %v2740_v25, %v2764_v26  ;;  %v9905_v50 = vcombine.low %v2743_v27, %v2767_v33 }
 0x18a   :  { %v1593_v52 = vpop.f32.mrb[0].mxu1  ;;  %4246 = vmatprep.mubr.bf16.mxu1 %v11711_v0  ;;  %4369 = vmatprep.mubr.bf16.mxu0 %v11711_v0  ;;  %v1675_v57 = vpop.f32.mrb[0].mxu0 }
 0x18b   :  { %v1594_v55 = vadd.f32 %v1593_v52, %v358_v41  ;;  %v1595_v56 = vpop.f32.mrb[1].mxu1  ;;  %v1676_v61 = vadd.f32 %v1675_v57, %v374_v45  ;;  %v1677_v62 = vpop.f32.mrb[1].mxu0  ;;  %v2815_v41 = vld [vmem:[#allocation9 + $0x400] sm:$0xff]  ;;  %v366_v45 = vrot.slane %v11967_v29, %v11990_v22  ;;  %v2860_v52 = vld [vmem:[#allocation9 + $0x568] sm:$0xff] }
 0x18c   :  { %v1596_v58 = vadd.f32 %v1595_v56, %v362_v43  ;;  %v1597_v59 = vpop.f32.mrb[2].mxu1  ;;  %4217 = vmatpush1.bf16.msra.mxu1 %v9895_v44  ;;  %4340 = vmatpush1.bf16.msra.mxu0 %v9901_v46  ;;  %v1678_v6 = vadd.f32 %v1677_v62, %v378_v51  ;;  %v1679_v7 = vpop.f32.mrb[2].mxu0  ;;  %v11995_v43 = vld [vmem:[#allocation8 + $0x8] sm:$0xff]  ;;  %v9906_v44 = vcombine.high %v2743_v27, %v2767_v33  ;;  %v2863_v57 = vld [vmem:[#allocation9 + $0x580] sm:$0xff]  ;;  %v12016_v33 = vsub.s32 6, %v11959_v17 }
 0x18d   :  { %v2543_v63 = vmax.f32 %v1594_v55, 0.0  ;;  %v1598_v1 = vpop.f32.mrb[3].mxu1  ;;  %4218 = vmatprep.subr.bf16.mxu1 %v9944_v47  ;;  %4341 = vmatprep.subr.bf16.mxu0 %v9950_v53  ;;  %v2547_v11 = vmax.f32 %v1676_v61, 0.0  ;;  %v1680_v12 = vpop.f32.mrb[3].mxu0  ;;  %v370_v46 = vrot.slane %v11967_v29, %v11993_v32  ;;  %v9899_v47 = vcombine.low %v2740_v25, %v2764_v26  ;;  %v2839_v53 = vld [vmem:[#allocation9 + $0x4c0] sm:$0xff]  ;;  %v2694_v7 = vld [vmem:[#allocation9 + $0x38] sm:$0xff] }
 0x18e   :  { %v2544_v8 = vmax.f32 %v1596_v58, 0.0  ;;  %v2548_v15 = vmax.f32 %v1678_v6, 0.0  ;;  %v390_v49 = vrot.slane %v11995_v43, %v11962_v23  ;;  %v9948_v51 = vcombine.high %v2788_v35, %v2812_v36  ;;  %v2742_v26 = vld [vmem:[#allocation9 + $0x1b8] sm:$0xff] }
 0x18f   :  { %v2591_v13 = vpack.c.bf16 %v2543_v63, %v2543_v63  ;;  %v2595_v19 = vpack.c.bf16 %v2547_v11, %v2547_v11  ;;  %v394_v54 = vrot.slane %v11995_v43, %v11965_v24  ;;  %v9954_v56 = vcombine.high %v2791_v40, %v2815_v41  ;;  %v2766_v27 = vld [vmem:[#allocation9 + $0x278] sm:$0xff] }
 0x190   :  { %v2592_v16 = vpack.c.bf16 %v2544_v8, %v2544_v8  ;;  %4219 = vmatpush1.bf16.msra.mxu1 %v9943_v60  ;;  %4342 = vmatpush1.bf16.msra.mxu0 %v9949_v2  ;;  %v2596_v28 = vpack.c.bf16 %v2548_v15, %v2548_v15  ;;  %v9947_v63 = vcombine.low %v2788_v35, %v2812_v36  ;;  %v2718_v8 = vld [vmem:[#allocation9 + $0xf8] sm:$0xff]  ;;  %v2745_v35 = vld [vmem:[#allocation9 + $0x1d0] sm:$0xff] }
 0x191   :  { %2639 = vst [vmem:[#allocation2] sm:$0xf] %v2591_v13  ;;  %4220 = vmatprep.subr.bf16.mxu1 %v9992_v3  ;;  %4343 = vmatprep.subr.bf16.mxu0 %v9998_v9  ;;  %2643 = vst [vmem:[#allocation2 + $0x20] sm:$0xf] %v2595_v19  ;;  %v9953_v5 = vcombine.low %v2791_v40, %v2815_v41  ;;  %v9996_v6 = vcombine.high %v12005_v48, %v2860_v52  ;;  %v2697_v13 = vld [vmem:[#allocation9 + $0x50] sm:$0xff]  ;;  %v2790_v41 = vld [vmem:[#allocation9 + $0x338] sm:$0xff] }
 0x192   :  { %2640 = vst [vmem:[#allocation2 + $0x8] sm:$0xf] %v2592_v16  ;;  %2644 = vst [vmem:[#allocation2 + $0x28] sm:$0xf] %v2596_v28  ;;  %v10002_v12 = vcombine.high %v2839_v53, %v2863_v57  ;;  %v10001_v25 = vcombine.low %v2839_v53, %v2863_v57  ;;  %v2769_v36 = vld [vmem:[#allocation9 + $0x290] sm:$0xff]  ;;  %v9855_v40 = vcombine.low %v2694_v7, %v2718_v8 }
 0x193   :  { %v9909_v53 = vcombine.low %v2745_v35, %v2769_v36 }
 0x194   :  { %4221 = vmatpush1.bf16.msra.mxu1 %v9991_v18  ;;  %4344 = vmatpush1.bf16.msra.mxu0 %v9997_v20  ;;  %v2721_v18 = vld [vmem:[#allocation9 + $0x110] sm:$0xff] }
 0x195   :  { %4296 = vmatprep.subr.bf16.mxu1 %v9852_v21  ;;  %4419 = vmatprep.subr.bf16.mxu0 %v9858_v30  ;;  %v9995_v21 = vcombine.low %v12005_v48, %v2860_v52  ;;  %v9856_v30 = vcombine.high %v2694_v7, %v2718_v8  ;;  %v2817_v48 = vld [vmem:[#allocation9 + $0x410] sm:$0xff]  ;;  %v406_v52 = vrot.slane %v11995_v43, %v11970_v31 }
 0x197   :  { %10036 = vmatmul.mubr.msk.bf16.vlgmr.msra.gmra.mrb[56].mxu1 %vm1555_vm0, %v11879_v42  ;;  %10039 = vmatmul.mubr.msk.bf16.vlgmr.msra.gmra.mrb[56].mxu0 %vm1555_vm0, %v11879_v42 }
 0x198   :  { %4297 = vmatpush1.bf16.msra.mxu1 %v9851_v34  ;;  %4420 = vmatpush1.bf16.msra.mxu0 %v9857_v37  ;;  %v12019_v34 = vsub.s32 7, %v11959_v17  ;;  %v9910_v17 = vcombine.high %v2745_v35, %v2769_v36  ;;  %v2744_v36 = vld [vmem:[#allocation9 + $0x1c8] sm:$0xff] }
 0x199   :  { %4298 = vmatprep.subr.bf16.mxu1 %v9900_v39  ;;  %4421 = vmatprep.subr.bf16.mxu0 %v9906_v44  ;;  %v9862_v39 = vcombine.high %v2697_v13, %v2721_v18  ;;  %v2814_v44 = vld [vmem:[#allocation9 + $0x3f8] sm:$0xff] }
 0x19a   :  { %v1634_v55 = vpop.f32.mrb[4].mxu1  ;;  %4328 = vmatprep.mubr.bf16.mxu1 %v11711_v0  ;;  %4451 = vmatprep.mubr.bf16.mxu0 %v11711_v0  ;;  %v1757_v60 = vpop.f32.mrb[4].mxu0 }
 0x19b   :  { %v1635_v58 = vadd.f32 %v1634_v55, %v366_v45  ;;  %v1636_v59 = vpop.f32.mrb[5].mxu1  ;;  %v1758_v1 = vadd.f32 %v1757_v60, %v390_v49  ;;  %v1759_v2 = vpop.f32.mrb[5].mxu0  ;;  %v9861_v45 = vcombine.low %v2697_v13, %v2721_v18  ;;  %v382_v49 = vrot.slane %v11967_v29, %v12016_v33  ;;  %v2838_v55 = vld [vmem:[#allocation9 + $0x4b8] sm:$0xff] }
 0x19c   :  { %v1637_v61 = vadd.f32 %v1636_v59, %v370_v46  ;;  %v1638_v62 = vpop.f32.mrb[6].mxu1  ;;  %4299 = vmatpush1.bf16.msra.mxu1 %v9899_v47  ;;  %4422 = vmatpush1.bf16.msra.mxu0 %v9905_v50  ;;  %v1760_v9 = vadd.f32 %v1759_v2, %v394_v54  ;;  %v1761_v10 = vpop.f32.mrb[6].mxu0  ;;  %v9904_v46 = vcombine.high %v2742_v26, %v2766_v27  ;;  %v2793_v47 = vld [vmem:[#allocation9 + $0x350] sm:$0xff]  ;;  %v2862_v59 = vld [vmem:[#allocation9 + $0x578] sm:$0xff] }
 0x19d   :  { %v2545_v3 = vmax.f32 %v1635_v58, 0.0  ;;  %v1639_v4 = vpop.f32.mrb[7].mxu1  ;;  %4300 = vmatprep.subr.bf16.mxu1 %v9948_v51  ;;  %4423 = vmatprep.subr.bf16.mxu0 %v9954_v56  ;;  %v2551_v14 = vmax.f32 %v1758_v1, 0.0  ;;  %v1762_v15 = vpop.f32.mrb[7].mxu0  ;;  %v386_v50 = vrot.slane %v11967_v29, %v12019_v34  ;;  %v9903_v51 = vcombine.low %v2742_v26, %v2766_v27  ;;  %v2865_v62 = vld [vmem:[#allocation9 + $0x590] sm:$0xff]  ;;  %v2696_v10 = vld [vmem:[#allocation9 + $0x48] sm:$0xff] }
 0x19e   :  { %v2546_v11 = vmax.f32 %v1637_v61, 0.0  ;;  %v2552_v19 = vmax.f32 %v1760_v9, 0.0  ;;  %v9952_v54 = vcombine.high %v2790_v41, %v2814_v44  ;;  %v410_v56 = vrot.slane %v11995_v43, %v11973_v38  ;;  %v2841_v61 = vld [vmem:[#allocation9 + $0x4d0] sm:$0xff] }
 0x19f   :  { %v2593_v16 = vpack.c.bf16 %v2545_v3, %v2545_v3  ;;  %v2599_v28 = vpack.c.bf16 %v2551_v14, %v2551_v14  ;;  %v9958_v58 = vcombine.high %v2793_v47, %v2817_v48  ;;  %v9951_v3 = vcombine.low %v2790_v41, %v2814_v44  ;;  %v2747_v41 = vld [vmem:[#allocation9 + $0x1e0] sm:$0xff] }
 0x1a0   :  { %v2594_v20 = vpack.c.bf16 %v2546_v11, %v2546_v11  ;;  %4301 = vmatpush1.bf16.msra.mxu1 %v9947_v63  ;;  %4424 = vmatpush1.bf16.msra.mxu0 %v9953_v5  ;;  %v2600_v37 = vpack.c.bf16 %v2552_v19, %v2552_v19  ;;  %v9957_v8 = vcombine.low %v2793_v47, %v2817_v48  ;;  %v2720_v11 = vld [vmem:[#allocation9 + $0x108] sm:$0xff]  ;;  %v2771_v44 = vld [vmem:[#allocation9 + $0x2a0] sm:$0xff] }
 0x1a1   :  { %2641 = vst [vmem:[#allocation2 + $0x10] sm:$0xf] %v2593_v16  ;;  %4302 = vmatprep.subr.bf16.mxu1 %v9996_v6  ;;  %4425 = vmatprep.subr.bf16.mxu0 %v10002_v12  ;;  %2647 = vst [vmem:[#allocation2 + $0x40] sm:$0xf] %v2599_v28  ;;  %v10000_v9 = vcombine.high %v2838_v55, %v2862_v59  ;;  %v10006_v15 = vcombine.high %v2841_v61, %v2865_v62  ;;  %v2699_v16 = vld [vmem:[#allocation9 + $0x60] sm:$0xff]  ;;  %v2816_v47 = vld [vmem:[#allocation9 + $0x408] sm:$0xff] }
 0x1a2   :  { %2642 = vst [vmem:[#allocation2 + $0x18] sm:$0xf] %v2594_v20  ;;  %2648 = vst [vmem:[#allocation2 + $0x48] sm:$0xf] %v2600_v37  ;;  %v9999_v27 = vcombine.low %v2838_v55, %v2862_v59  ;;  %v9860_v35 = vcombine.high %v2696_v10, %v2720_v11  ;;  %v2768_v37 = vld [vmem:[#allocation9 + $0x288] sm:$0xff]  ;;  %v12035_v48 = vld [vmem:[#allocation8 + $0x10] sm:$0xff] }
 0x1a3   :  { %v9907_v55 = vcombine.low %v2744_v36, %v2768_v37  ;;  %v2840_v59 = vld [vmem:[#allocation9 + $0x4c8] sm:$0xff] }
 0x1a4   :  { %4303 = vmatpush1.bf16.msra.mxu1 %v9995_v21  ;;  %4426 = vmatpush1.bf16.msra.mxu0 %v10001_v25  ;;  %v2723_v21 = vld [vmem:[#allocation9 + $0x120] sm:$0xff] }
 0x1a5   :  { %4378 = vmatprep.subr.bf16.mxu1 %v9856_v30  ;;  %4501 = vmatprep.subr.bf16.mxu0 %v9862_v39  ;;  %v10005_v30 = vcombine.low %v2841_v61, %v2865_v62  ;;  %v2864_v62 = vld [vmem:[#allocation9 + $0x588] sm:$0xff] }
 0x1a7   :  { %10038 = vmatmul.mubr.msk.bf16.vlgmr.msra.gmra.mrb[60].mxu1 %vm1555_vm0, %v11879_v42  ;;  %10041 = vmatmul.mubr.msk.bf16.vlgmr.msra.gmra.mrb[60].mxu0 %vm1555_vm0, %v11879_v42 }
 0x1a8   :  { %4379 = vmatpush1.bf16.msra.mxu1 %v9855_v40  ;;  %4502 = vmatpush1.bf16.msra.mxu0 %v9861_v45  ;;  %v9866_v40 = vcombine.high %v2699_v16, %v2723_v21  ;;  %v9859_v45 = vcombine.low %v2696_v10, %v2720_v11 }
 0x1a9   :  { %4380 = vmatprep.subr.bf16.mxu1 %v9904_v46  ;;  %4503 = vmatprep.subr.bf16.mxu0 %v9910_v17  ;;  %v2792_v46 = vld [vmem:[#allocation9 + $0x348] sm:$0xff]  ;;  %v9865_v17 = vcombine.low %v2699_v16, %v2723_v21  ;;  %v2701_v21 = vld [vmem:[#allocation9 + $0x70] sm:$0xff] }
 0x1aa   :  { %v1716_v57 = vpop.f32.mrb[8].mxu1  ;;  %4410 = vmatprep.mubr.bf16.mxu1 %v11711_v0  ;;  %4533 = vmatprep.mubr.bf16.mxu0 %v11711_v0  ;;  %v1839_v63 = vpop.f32.mrb[8].mxu0 }
 0x1ab   :  { %v1717_v60 = vadd.f32 %v1716_v57, %v382_v49  ;;  %v1718_v29 = vpop.f32.mrb[9].mxu1  ;;  %v1840_v4 = vadd.f32 %v1839_v63, %v406_v52  ;;  %v1841_v5 = vpop.f32.mrb[9].mxu0  ;;  %v9908_v49 = vcombine.high %v2744_v36, %v2768_v37  ;;  %v2795_v52 = vld [vmem:[#allocation9 + $0x360] sm:$0xff]  ;;  %v9913_v57 = vcombine.low %v2747_v41, %v2771_v44  ;;  %v2746_v37 = vld [vmem:[#allocation9 + $0x1d8] sm:$0xff] }
 0x1ac   :  { %v1719_v1 = vadd.f32 %v1718_v29, %v386_v50  ;;  %v1720_v2 = vpop.f32.mrb[10].mxu1  ;;  %4381 = vmatpush1.bf16.msra.mxu1 %v9903_v51  ;;  %4504 = vmatpush1.bf16.msra.mxu0 %v9909_v53  ;;  %v1842_v12 = vadd.f32 %v1841_v5, %v410_v56  ;;  %v1843_v13 = vpop.f32.mrb[10].mxu0  ;;  %v9914_v50 = vcombine.high %v2747_v41, %v2771_v44  ;;  %v2819_v53 = vld [vmem:[#allocation9 + $0x420] sm:$0xff] }
 0x1ad   :  { %v2549_v6 = vmax.f32 %v1717_v60, 0.0  ;;  %v1721_v7 = vpop.f32.mrb[11].mxu1  ;;  %4382 = vmatprep.subr.bf16.mxu1 %v9952_v54  ;;  %4505 = vmatprep.subr.bf16.mxu0 %v9958_v58  ;;  %v2555_v18 = vmax.f32 %v1840_v4, 0.0  ;;  %v1844_v19 = vpop.f32.mrb[11].mxu0  ;;  %v398_v51 = vrot.slane %v11995_v43, %v11990_v22  ;;  %v402_v54 = vrot.slane %v11995_v43, %v11993_v32  ;;  %v2843_v2 = vld [vmem:[#allocation9 + $0x4e0] sm:$0xff] }
 0x1ae   :  { %v2550_v14 = vmax.f32 %v1719_v1, 0.0  ;;  %v2556_v25 = vmax.f32 %v1842_v12, 0.0  ;;  %v422_v56 = vrot.slane %v12035_v48, %v11962_v23  ;;  %v9956_v58 = vcombine.high %v2792_v46, %v2816_v47 }
 0x1af   :  { %v2597_v20 = vpack.c.bf16 %v2549_v6, %v2549_v6  ;;  %v2603_v28 = vpack.c.bf16 %v2555_v18, %v2555_v18  ;;  %v426_v60 = vrot.slane %v12035_v48, %v11965_v24  ;;  %v9962_v61 = vcombine.high %v2795_v52, %v2819_v53 }
 0x1b0   :  { %v2598_v26 = vpack.c.bf16 %v2550_v14, %v2550_v14  ;;  %4383 = vmatpush1.bf16.msra.mxu1 %v9951_v3  ;;  %4506 = vmatpush1.bf16.msra.mxu0 %v9957_v8  ;;  %v2604_v39 = vpack.c.bf16 %v2556_v25, %v2556_v25  ;;  %v2867_v3 = vld [vmem:[#allocation9 + $0x5a0] sm:$0xff]  ;;  %v9955_v7 = vcombine.low %v2792_v46, %v2816_v47  ;;  %v2698_v8 = vld [vmem:[#allocation9 + $0x58] sm:$0xff] }
 0x1b1   :  { %2645 = vst [vmem:[#allocation2 + $0x30] sm:$0xf] %v2597_v20  ;;  %4384 = vmatprep.subr.bf16.mxu1 %v10000_v9  ;;  %4507 = vmatprep.subr.bf16.mxu0 %v10006_v15  ;;  %2651 = vst [vmem:[#allocation2 + $0x60] sm:$0xf] %v2603_v28  ;;  %v9961_v13 = vcombine.low %v2795_v52, %v2819_v53  ;;  %v10004_v14 = vcombine.high %v2840_v59, %v2864_v62  ;;  %v2722_v15 = vld [vmem:[#allocation9 + $0x118] sm:$0xff]  ;;  %v2725_v28 = vld [vmem:[#allocation9 + $0x130] sm:$0xff] }
 0x1b2   :  { %2646 = vst [vmem:[#allocation2 + $0x38] sm:$0xf] %v2598_v26  ;;  %2652 = vst [vmem:[#allocation2 + $0x68] sm:$0xf] %v2604_v39  ;;  %v10010_v20 = vcombine.high %v2843_v2, %v2867_v3  ;;  %v10003_v36 = vcombine.low %v2840_v59, %v2864_v62  ;;  %v2770_v39 = vld [vmem:[#allocation9 + $0x298] sm:$0xff]  ;;  %v10009_v41 = vcombine.low %v2843_v2, %v2867_v3 }
 0x1b3   :  { %v9864_v44 = vcombine.high %v2698_v8, %v2722_v15  ;;  %v9870_v47 = vcombine.high %v2701_v21, %v2725_v28  ;;  %v9869_v52 = vcombine.low %v2701_v21, %v2725_v28  ;;  %v9912_v53 = vcombine.high %v2746_v37, %v2770_v39  ;;  %v2866_v3 = vld [vmem:[#allocation9 + $0x598] sm:$0xff] }
 0x1b4   :  { %4385 = vmatpush1.bf16.msra.mxu1 %v9999_v27  ;;  %4508 = vmatpush1.bf16.msra.mxu0 %v10005_v30  ;;  %v9911_v59 = vcombine.low %v2746_v37, %v2770_v39 }
 0x1b5   :  { %4460 = vmatprep.subr.bf16.mxu1 %v9860_v35  ;;  %4583 = vmatprep.subr.bf16.mxu0 %v9866_v40 }
 0x1b7   :  { %10040 = vmatmul.mubr.msk.bf16.vlgmr.msra.gmra.mrb[64].mxu1 %vm1555_vm0, %v11879_v42  ;;  %10043 = vmatmul.mubr.msk.bf16.vlgmr.msra.gmra.mrb[64].mxu0 %vm1555_vm0, %v11879_v42 }
 0x1b8   :  { %4461 = vmatpush1.bf16.msra.mxu1 %v9859_v45  ;;  %4584 = vmatpush1.bf16.msra.mxu0 %v9865_v17  ;;  %v2749_v45 = vld [vmem:[#allocation9 + $0x1f0] sm:$0xff] }
 0x1b9   :  { %4462 = vmatprep.subr.bf16.mxu1 %v9908_v49  ;;  %4585 = vmatprep.subr.bf16.mxu0 %v9914_v50  ;;  %v2773_v17 = vld [vmem:[#allocation9 + $0x2b0] sm:$0xff]  ;;  %v9863_v49 = vcombine.low %v2698_v8, %v2722_v15  ;;  %v2794_v50 = vld [vmem:[#allocation9 + $0x358] sm:$0xff] }
 0x1ba   :  { %v1798_v29 = vpop.f32.mrb[12].mxu1  ;;  %4492 = vmatprep.mubr.bf16.mxu1 %v11711_v0  ;;  %4615 = vmatprep.mubr.bf16.mxu0 %v11711_v0  ;;  %v1921_v4 = vpop.f32.mrb[12].mxu0 }
 0x1bb   :  { %v1799_v63 = vadd.f32 %v1798_v29, %v398_v51  ;;  %v1800_v1 = vpop.f32.mrb[13].mxu1  ;;  %v1922_v9 = vadd.f32 %v1921_v4, %v422_v56  ;;  %v1923_v10 = vpop.f32.mrb[13].mxu0  ;;  %v2818_v51 = vld [vmem:[#allocation9 + $0x418] sm:$0xff]  ;;  %v9918_v56 = vcombine.high %v2749_v45, %v2773_v17  ;;  %v438_v29 = vrot.slane %v12035_v48, %v11970_v31 }
 0x1bc   :  { %v1801_v5 = vadd.f32 %v1800_v1, %v402_v54  ;;  %v1802_v6 = vpop.f32.mrb[14].mxu1  ;;  %4463 = vmatpush1.bf16.msra.mxu1 %v9907_v55  ;;  %4586 = vmatpush1.bf16.msra.mxu0 %v9913_v57  ;;  %v1924_v16 = vadd.f32 %v1923_v10, %v426_v60  ;;  %v1925_v18 = vpop.f32.mrb[14].mxu0  ;;  %v2797_v54 = vld [vmem:[#allocation9 + $0x370] sm:$0xff]  ;;  %v414_v57 = vrot.slane %v11995_v43, %v12016_v33  ;;  %v2842_v60 = vld [vmem:[#allocation9 + $0x4d8] sm:$0xff] }
 0x1bd   :  { %v2553_v11 = vmax.f32 %v1799_v63, 0.0  ;;  %v1803_v12 = vpop.f32.mrb[15].mxu1  ;;  %4464 = vmatprep.subr.bf16.mxu1 %v9956_v58  ;;  %4587 = vmatprep.subr.bf16.mxu0 %v9962_v61  ;;  %v2559_v25 = vmax.f32 %v1922_v9, 0.0  ;;  %v1926_v26 = vpop.f32.mrb[15].mxu0  ;;  %v2821_v55 = vld [vmem:[#allocation9 + $0x430] sm:$0xff]  ;;  %v418_v58 = vrot.slane %v11995_v43, %v12019_v34  ;;  %v9917_v61 = vcombine.low %v2749_v45, %v2773_v17  ;;  %v2751_v17 = vld [vmem:[#allocation9 + $0x200] sm:$0xff] }
 0x1be   :  { %v2554_v19 = vmax.f32 %v1801_v5, 0.0  ;;  %v2560_v30 = vmax.f32 %v1924_v16, 0.0  ;;  %v9960_v62 = vcombine.high %v2794_v50, %v2818_v51  ;;  %v442_v63 = vrot.slane %v12035_v48, %v11973_v38  ;;  %v2845_v5 = vld [vmem:[#allocation9 + $0x4f0] sm:$0xff] }
 0x1bf   :  { %v2601_v27 = vpack.c.bf16 %v2553_v11, %v2553_v11  ;;  %v2607_v40 = vpack.c.bf16 %v2559_v25, %v2559_v25  ;;  %v9966_v2 = vcombine.high %v2797_v54, %v2821_v55  ;;  %v2869_v6 = vld [vmem:[#allocation9 + $0x5b0] sm:$0xff]  ;;  %v9959_v10 = vcombine.low %v2794_v50, %v2818_v51  ;;  %v2700_v11 = vld [vmem:[#allocation9 + $0x68] sm:$0xff] }
 0x1c0   :  { %v2602_v35 = vpack.c.bf16 %v2554_v19, %v2554_v19  ;;  %4465 = vmatpush1.bf16.msra.mxu1 %v9955_v7  ;;  %4588 = vmatpush1.bf16.msra.mxu0 %v9961_v13  ;;  %v2608_v46 = vpack.c.bf16 %v2560_v30, %v2560_v30  ;;  %v9965_v16 = vcombine.low %v2797_v54, %v2821_v55  ;;  %v2724_v19 = vld [vmem:[#allocation9 + $0x128] sm:$0xff] }
 0x1c1   :  { %2649 = vst [vmem:[#allocation2 + $0x50] sm:$0xf] %v2601_v27  ;;  %4466 = vmatprep.subr.bf16.mxu1 %v10004_v14  ;;  %4589 = vmatprep.subr.bf16.mxu0 %v10010_v20  ;;  %2655 = vst [vmem:[#allocation2 + $0x80] sm:$0xf] %v2607_v40  ;;  %v10008_v18 = vcombine.high %v2842_v60, %v2866_v3  ;;  %v10014_v26 = vcombine.high %v2845_v5, %v2869_v6  ;;  %v2703_v27 = vld [vmem:[#allocation9 + $0x80] sm:$0xff] }
 0x1c2   :  { %2650 = vst [vmem:[#allocation2 + $0x58] sm:$0xf] %v2602_v35  ;;  %2656 = vst [vmem:[#allocation2 + $0x88] sm:$0xf] %v2608_v46  ;;  %v10007_v40 = vcombine.low %v2842_v60, %v2866_v3  ;;  %v10013_v46 = vcombine.low %v2845_v5, %v2869_v6  ;;  %v2799_v60 = vld [vmem:[#allocation9 + $0x380] sm:$0xff] }
 0x1c4   :  { %4467 = vmatpush1.bf16.msra.mxu1 %v10003_v36  ;;  %4590 = vmatpush1.bf16.msra.mxu0 %v10009_v41  ;;  %v2727_v36 = vld [vmem:[#allocation9 + $0x140] sm:$0xff]  ;;  %v2748_v41 = vld [vmem:[#allocation9 + $0x1e8] sm:$0xff] }
 0x1c5   :  { %4542 = vmatprep.subr.bf16.mxu1 %v9864_v44  ;;  %4665 = vmatprep.subr.bf16.mxu0 %v9870_v47  ;;  %v2772_v44 = vld [vmem:[#allocation9 + $0x2a8] sm:$0xff]  ;;  %v9868_v47 = vcombine.high %v2700_v11, %v2724_v19  ;;  %v9874_v51 = vcombine.high %v2703_v27, %v2727_v36  ;;  %v9873_v54 = vcombine.low %v2703_v27, %v2727_v36  ;;  %v2705_v36 = vld [vmem:[#allocation9 + $0x90] sm:$0xff] }
 0x1c6   :  { %v9916_v55 = vcombine.high %v2748_v41, %v2772_v44 }
 0x1c7   :  { %10042 = vmatmul.mubr.msk.bf16.vlgmr.msra.gmra.mrb[68].mxu1 %vm1555_vm0, %v11879_v42  ;;  %10045 = vmatmul.mubr.msk.bf16.vlgmr.msra.gmra.mrb[68].mxu0 %vm1555_vm0, %v11879_v42 }
 0x1c8   :  { %4543 = vmatpush1.bf16.msra.mxu1 %v9863_v49  ;;  %4666 = vmatpush1.bf16.msra.mxu0 %v9869_v52  ;;  %v2775_v49 = vld [vmem:[#allocation9 + $0x2c0] sm:$0xff]  ;;  %v9867_v52 = vcombine.low %v2700_v11, %v2724_v19 }
 0x1c9   :  { %4544 = vmatprep.subr.bf16.mxu1 %v9912_v53  ;;  %4667 = vmatprep.subr.bf16.mxu0 %v9918_v56  ;;  %v2796_v53 = vld [vmem:[#allocation9 + $0x368] sm:$0xff]  ;;  %v9921_v3 = vcombine.low %v2751_v17, %v2775_v49 }
 0x1ca   :  { %v1880_v1 = vpop.f32.mrb[16].mxu1  ;;  %4574 = vmatprep.mubr.bf16.mxu1 %v11711_v0  ;;  %4697 = vmatprep.mubr.bf16.mxu0 %v11711_v0  ;;  %v2003_v7 = vpop.f32.mrb[16].mxu0  ;;  %v2820_v56 = vld [vmem:[#allocation9 + $0x428] sm:$0xff] }
 0x1cb   :  { %v1881_v4 = vadd.f32 %v1880_v1, %v414_v57  ;;  %v1882_v43 = vpop.f32.mrb[17].mxu1  ;;  %v2004_v12 = vadd.f32 %v2003_v7, %v438_v29  ;;  %v2005_v13 = vpop.f32.mrb[17].mxu0  ;;  %v12065_v57 = vld [vmem:[#allocation8 + $0x18] sm:$0xff]  ;;  %v2823_v29 = vld [vmem:[#allocation9 + $0x440] sm:$0xff] }
 0x1cc   :  { %v1883_v8 = vadd.f32 %v1882_v43, %v418_v58  ;;  %v1884_v9 = vpop.f32.mrb[18].mxu1  ;;  %4545 = vmatpush1.bf16.msra.mxu1 %v9911_v59  ;;  %4668 = vmatpush1.bf16.msra.mxu0 %v9917_v61  ;;  %v2006_v20 = vadd.f32 %v2005_v13, %v442_v63  ;;  %v2007_v21 = vpop.f32.mrb[18].mxu0  ;;  %v9922_v58 = vcombine.high %v2751_v17, %v2775_v49  ;;  %v2844_v63 = vld [vmem:[#allocation9 + $0x4e8] sm:$0xff]  ;;  %v2847_v43 = vld [vmem:[#allocation9 + $0x500] sm:$0xff]  ;;  %v2774_v17 = vld [vmem:[#allocation9 + $0x2b8] sm:$0xff] }
 0x1cd   :  { %v2557_v14 = vmax.f32 %v1881_v4, 0.0  ;;  %v1885_v15 = vpop.f32.mrb[19].mxu1  ;;  %4546 = vmatprep.subr.bf16.mxu1 %v9960_v62  ;;  %4669 = vmatprep.subr.bf16.mxu0 %v9966_v2  ;;  %v2563_v28 = vmax.f32 %v2004_v12, 0.0  ;;  %v2008_v30 = vpop.f32.mrb[19].mxu0  ;;  %v430_v59 = vrot.slane %v12035_v48, %v11990_v22  ;;  %v434_v61 = vrot.slane %v12035_v48, %v11993_v32  ;;  %v2868_v1 = vld [vmem:[#allocation9 + $0x5a8] sm:$0xff] }
 0x1ce   :  { %v2558_v25 = vmax.f32 %v1883_v8, 0.0  ;;  %v2564_v37 = vmax.f32 %v2006_v20, 0.0  ;;  %v9915_v62 = vcombine.low %v2748_v41, %v2772_v44  ;;  %v454_v2 = vrot.slane %v12065_v57, %v11962_v23  ;;  %v2871_v8 = vld [vmem:[#allocation9 + $0x5c0] sm:$0xff]  ;;  %v2729_v41 = vld [vmem:[#allocation9 + $0x150] sm:$0xff] }
 0x1cf   :  { %v2605_v35 = vpack.c.bf16 %v2557_v14, %v2557_v14  ;;  %v2611_v45 = vpack.c.bf16 %v2563_v28, %v2563_v28  ;;  %v9964_v4 = vcombine.high %v2796_v53, %v2820_v56  ;;  %v458_v5 = vrot.slane %v12065_v57, %v11965_v24 }
 0x1d0   :  { %v2606_v39 = vpack.c.bf16 %v2558_v25, %v2558_v25  ;;  %4547 = vmatpush1.bf16.msra.mxu1 %v9959_v10  ;;  %4670 = vmatpush1.bf16.msra.mxu0 %v9965_v16  ;;  %v2612_v50 = vpack.c.bf16 %v2564_v37, %v2564_v37  ;;  %v9970_v7 = vcombine.high %v2799_v60, %v2823_v29  ;;  %v2702_v25 = vld [vmem:[#allocation9 + $0x78] sm:$0xff] }
 0x1d1   :  { %2653 = vst [vmem:[#allocation2 + $0x70] sm:$0xf] %v2605_v35  ;;  %4548 = vmatprep.subr.bf16.mxu1 %v10008_v18  ;;  %4671 = vmatprep.subr.bf16.mxu0 %v10014_v26  ;;  %2659 = vst [vmem:[#allocation2 + $0xa0] sm:$0xf] %v2611_v45  ;;  %v9963_v14 = vcombine.low %v2796_v53, %v2820_v56  ;;  %v9969_v20 = vcombine.low %v2799_v60, %v2823_v29  ;;  %v2726_v26 = vld [vmem:[#allocation9 + $0x138] sm:$0xff]  ;;  %v2777_v53 = vld [vmem:[#allocation9 + $0x2d0] sm:$0xff] }
 0x1d2   :  { %2654 = vst [vmem:[#allocation2 + $0x78] sm:$0xf] %v2606_v39  ;;  %2660 = vst [vmem:[#allocation2 + $0xa8] sm:$0xf] %v2612_v50  ;;  %v10012_v21 = vcombine.high %v2844_v63, %v2868_v1  ;;  %v10018_v35 = vcombine.high %v2847_v43, %v2871_v8  ;;  %v10017_v50 = vcombine.low %v2847_v43, %v2871_v8  ;;  %v2798_v60 = vld [vmem:[#allocation9 + $0x378] sm:$0xff]  ;;  %v2849_v8 = vld [vmem:[#allocation9 + $0x510] sm:$0xff] }
 0x1d3   :  { %v9871_v56 = vcombine.low %v2702_v25, %v2726_v26  ;;  %v2822_v29 = vld [vmem:[#allocation9 + $0x438] sm:$0xff] }
 0x1d4   :  { %4549 = vmatpush1.bf16.msra.mxu1 %v10007_v40  ;;  %4672 = vmatpush1.bf16.msra.mxu0 %v10013_v46  ;;  %v10011_v46 = vcombine.low %v2844_v63, %v2868_v1  ;;  %v2801_v63 = vld [vmem:[#allocation9 + $0x390] sm:$0xff]  ;;  %v2870_v43 = vld [vmem:[#allocation9 + $0x5b8] sm:$0xff] }
 0x1d5   :  { %4624 = vmatprep.subr.bf16.mxu1 %v9868_v47  ;;  %4747 = vmatprep.subr.bf16.mxu0 %v9874_v51  ;;  %v2750_v47 = vld [vmem:[#allocation9 + $0x1f8] sm:$0xff]  ;;  %v9872_v51 = vcombine.high %v2702_v25, %v2726_v26  ;;  %v2825_v1 = vld [vmem:[#allocation9 + $0x450] sm:$0xff] }
 0x1d6   :  { %v9973_v26 = vcombine.low %v2801_v63, %v2825_v1 }
 0x1d7   :  { %10044 = vmatmul.mubr.msk.bf16.vlgmr.msra.gmra.mrb[72].mxu1 %vm1555_vm0, %v11879_v42  ;;  %10047 = vmatmul.mubr.msk.bf16.vlgmr.msra.gmra.mrb[72].mxu0 %vm1555_vm0, %v11879_v42 }
 0x1d8   :  { %4625 = vmatpush1.bf16.msra.mxu1 %v9867_v52  ;;  %4748 = vmatpush1.bf16.msra.mxu0 %v9873_v54  ;;  %v2753_v52 = vld [vmem:[#allocation9 + $0x210] sm:$0xff] }
 0x1d9   :  { %4626 = vmatprep.subr.bf16.mxu1 %v9916_v55  ;;  %4749 = vmatprep.subr.bf16.mxu0 %v9922_v58  ;;  %v9878_v55 = vcombine.high %v2705_v36, %v2729_v41  ;;  %v9877_v58 = vcombine.low %v2705_v36, %v2729_v41 }
 0x1da   :  { %v1962_v6 = vpop.f32.mrb[20].mxu1  ;;  %4656 = vmatprep.mubr.bf16.mxu1 %v11711_v0  ;;  %4779 = vmatprep.mubr.bf16.mxu0 %v11711_v0  ;;  %v2085_v11 = vpop.f32.mrb[20].mxu0 }
 0x1db   :  { %v1963_v9 = vadd.f32 %v1962_v6, %v430_v59  ;;  %v1964_v10 = vpop.f32.mrb[21].mxu1  ;;  %v2086_v15 = vadd.f32 %v2085_v11, %v454_v2  ;;  %v2087_v16 = vpop.f32.mrb[21].mxu0  ;;  %v9920_v59 = vcombine.high %v2750_v47, %v2774_v17  ;;  %v450_v2 = vrot.slane %v12035_v48, %v12019_v34 }
 0x1dc   :  { %v1965_v12 = vadd.f32 %v1964_v10, %v434_v61  ;;  %v1966_v13 = vpop.f32.mrb[22].mxu1  ;;  %4627 = vmatpush1.bf16.msra.mxu1 %v9915_v62  ;;  %4750 = vmatpush1.bf16.msra.mxu0 %v9921_v3  ;;  %v2088_v27 = vadd.f32 %v2087_v16, %v458_v5  ;;  %v2089_v28 = vpop.f32.mrb[22].mxu0  ;;  %v9926_v61 = vcombine.high %v2753_v52, %v2777_v53 }
 0x1dd   :  { %v2561_v18 = vmax.f32 %v1963_v9, 0.0  ;;  %v1967_v19 = vpop.f32.mrb[23].mxu1  ;;  %4628 = vmatprep.subr.bf16.mxu1 %v9964_v4  ;;  %4751 = vmatprep.subr.bf16.mxu0 %v9970_v7  ;;  %v2567_v37 = vmax.f32 %v2086_v15, 0.0  ;;  %v2090_v39 = vpop.f32.mrb[23].mxu0  ;;  %v446_v62 = vrot.slane %v12035_v48, %v12016_v33  ;;  %v9919_v3 = vcombine.low %v2750_v47, %v2774_v17  ;;  %v2846_v4 = vld [vmem:[#allocation9 + $0x4f8] sm:$0xff]  ;;  %v2704_v28 = vld [vmem:[#allocation9 + $0x88] sm:$0xff] }
 0x1de   :  { %v2562_v30 = vmax.f32 %v1965_v12, 0.0  ;;  %v2568_v44 = vmax.f32 %v2088_v27, 0.0  ;;  %v470_v5 = vrot.slane %v12065_v57, %v11970_v31  ;;  %v9925_v6 = vcombine.low %v2753_v52, %v2777_v53  ;;  %v2873_v12 = vld [vmem:[#allocation9 + $0x5d0] sm:$0xff] }
 0x1df   :  { %v2609_v40 = vpack.c.bf16 %v2561_v18, %v2561_v18  ;;  %v2615_v49 = vpack.c.bf16 %v2567_v37, %v2567_v37  ;;  %v9968_v7 = vcombine.high %v2798_v60, %v2822_v29  ;;  %v474_v9 = vrot.slane %v12065_v57, %v11973_v38 }
 0x1e0   :  { %v2610_v45 = vpack.c.bf16 %v2562_v30, %v2562_v30  ;;  %4629 = vmatpush1.bf16.msra.mxu1 %v9963_v14  ;;  %4752 = vmatpush1.bf16.msra.mxu0 %v9969_v20  ;;  %v2616_v54 = vpack.c.bf16 %v2568_v44, %v2568_v44  ;;  %v9974_v11 = vcombine.high %v2801_v63, %v2825_v1  ;;  %v2728_v30 = vld [vmem:[#allocation9 + $0x148] sm:$0xff]  ;;  %v12095_v1 = vld [vmem:[#allocation8 + $0x20] sm:$0xff] }
 0x1e1   :  { %2657 = vst [vmem:[#allocation2 + $0x90] sm:$0xf] %v2609_v40  ;;  %4630 = vmatprep.subr.bf16.mxu1 %v10012_v21  ;;  %4753 = vmatprep.subr.bf16.mxu0 %v10018_v35  ;;  %2663 = vst [vmem:[#allocation2 + $0xc0] sm:$0xf] %v2615_v49  ;;  %v9967_v18 = vcombine.low %v2798_v60, %v2822_v29  ;;  %v10016_v27 = vcombine.high %v2846_v4, %v2870_v43  ;;  %v2707_v40 = vld [vmem:[#allocation9 + $0xa0] sm:$0xff]  ;;  %v2800_v29 = vld [vmem:[#allocation9 + $0x388] sm:$0xff] }
 0x1e2   :  { %2658 = vst [vmem:[#allocation2 + $0x98] sm:$0xf] %v2610_v45  ;;  %2664 = vst [vmem:[#allocation2 + $0xc8] sm:$0xf] %v2616_v54  ;;  %v10022_v39 = vcombine.high %v2849_v8, %v2873_v12  ;;  %v10015_v49 = vcombine.low %v2846_v4, %v2870_v43  ;;  %v10021_v53 = vcombine.low %v2849_v8, %v2873_v12  ;;  %v2824_v63 = vld [vmem:[#allocation9 + $0x448] sm:$0xff]  ;;  %v2803_v4 = vld [vmem:[#allocation9 + $0x3a0] sm:$0xff] }
 0x1e3   :  { %v9876_v54 = vcombine.high %v2704_v28, %v2728_v30  ;;  %v9875_v60 = vcombine.low %v2704_v28, %v2728_v30  ;;  %v2827_v43 = vld [vmem:[#allocation9 + $0x460] sm:$0xff]  ;;  %v2872_v8 = vld [vmem:[#allocation9 + $0x5c8] sm:$0xff] }
 0x1e4   :  { %4631 = vmatpush1.bf16.msra.mxu1 %v10011_v46  ;;  %4754 = vmatpush1.bf16.msra.mxu0 %v10017_v50  ;;  %v2731_v46 = vld [vmem:[#allocation9 + $0x160] sm:$0xff]  ;;  %v2752_v50 = vld [vmem:[#allocation9 + $0x208] sm:$0xff] }
 0x1e5   :  { %4706 = vmatprep.subr.bf16.mxu1 %v9872_v51  ;;  %4829 = vmatprep.subr.bf16.mxu0 %v9878_v55  ;;  %v2776_v51 = vld [vmem:[#allocation9 + $0x2c8] sm:$0xff]  ;;  %v2755_v55 = vld [vmem:[#allocation9 + $0x220] sm:$0xff] }
 0x1e6   :  { %v2851_v12 = vld [vmem:[#allocation9 + $0x520] sm:$0xff] }
 0x1e7   :  { %10046 = vmatmul.mubr.msk.bf16.vlgmr.msra.gmra.mrb[76].mxu1 %vm1555_vm0, %v11879_v42  ;;  %10049 = vmatmul.mubr.msk.bf16.vlgmr.msra.gmra.mrb[76].mxu0 %vm1555_vm0, %v11879_v42 }
 0x1e8   :  { %4707 = vmatpush1.bf16.msra.mxu1 %v9871_v56  ;;  %4830 = vmatpush1.bf16.msra.mxu0 %v9877_v58  ;;  %v2779_v56 = vld [vmem:[#allocation9 + $0x2e0] sm:$0xff] }
 0x1e9   :  { %4708 = vmatprep.subr.bf16.mxu1 %v9920_v59  ;;  %4831 = vmatprep.subr.bf16.mxu0 %v9926_v61  ;;  %v9882_v59 = vcombine.high %v2707_v40, %v2731_v46  ;;  %v9881_v61 = vcombine.low %v2707_v40, %v2731_v46  ;;  %v2709_v46 = vld [vmem:[#allocation9 + $0xb0] sm:$0xff] }
 0x1ea   :  { %v2044_v10 = vpop.f32.mrb[24].mxu1  ;;  %4738 = vmatprep.mubr.bf16.mxu1 %v11711_v0  ;;  %4861 = vmatprep.mubr.bf16.mxu0 %v11711_v0  ;;  %v2167_v14 = vpop.f32.mrb[24].mxu0 }
 0x1eb   :  { %v2045_v48 = vadd.f32 %v2044_v10, %v446_v62  ;;  %v2046_v13 = vpop.f32.mrb[25].mxu1  ;;  %v2168_v19 = vadd.f32 %v2167_v14, %v470_v5  ;;  %v2169_v20 = vpop.f32.mrb[25].mxu0  ;;  %v9924_v62 = vcombine.high %v2752_v50, %v2776_v51  ;;  %v466_v5 = vrot.slane %v12065_v57, %v11993_v32 }
 0x1ec   :  { %v2047_v15 = vadd.f32 %v2046_v13, %v450_v2  ;;  %v2048_v16 = vpop.f32.mrb[26].mxu1  ;;  %4709 = vmatpush1.bf16.msra.mxu1 %v9919_v3  ;;  %4832 = vmatpush1.bf16.msra.mxu0 %v9925_v6  ;;  %v2170_v35 = vadd.f32 %v2169_v20, %v474_v9  ;;  %v2171_v36 = vpop.f32.mrb[26].mxu0  ;;  %v9930_v2 = vcombine.high %v2755_v55, %v2779_v56 }
 0x1ed   :  { %v2565_v21 = vmax.f32 %v2045_v48, 0.0  ;;  %v2049_v25 = vpop.f32.mrb[27].mxu1  ;;  %4710 = vmatprep.subr.bf16.mxu1 %v9968_v7  ;;  %4833 = vmatprep.subr.bf16.mxu0 %v9974_v11  ;;  %v2571_v41 = vmax.f32 %v2168_v19, 0.0  ;;  %v2172_v44 = vpop.f32.mrb[27].mxu0  ;;  %v462_v3 = vrot.slane %v12065_v57, %v11990_v22  ;;  %v9923_v6 = vcombine.low %v2752_v50, %v2776_v51  ;;  %v2848_v7 = vld [vmem:[#allocation9 + $0x508] sm:$0xff]  ;;  %v2733_v50 = vld [vmem:[#allocation9 + $0x170] sm:$0xff] }
 0x1ee   :  { %v2566_v37 = vmax.f32 %v2047_v15, 0.0  ;;  %v2572_v47 = vmax.f32 %v2170_v35, 0.0  ;;  %v486_v9 = vrot.slane %v12095_v1, %v11962_v23  ;;  %v9929_v10 = vcombine.low %v2755_v55, %v2779_v56  ;;  %v2875_v15 = vld [vmem:[#allocation9 + $0x5e0] sm:$0xff]  ;;  %v2778_v55 = vld [vmem:[#allocation9 + $0x2d8] sm:$0xff] }
 0x1ef   :  { %v2613_v45 = vpack.c.bf16 %v2565_v21, %v2565_v21  ;;  %v2619_v52 = vpack.c.bf16 %v2571_v41, %v2571_v41  ;;  %v9972_v11 = vcombine.high %v2800_v29, %v2824_v63  ;;  %v490_v48 = vrot.slane %v12095_v1, %v11965_v24 }
 0x1f0   :  { %v2614_v17 = vpack.c.bf16 %v2566_v37, %v2566_v37  ;;  %4711 = vmatpush1.bf16.msra.mxu1 %v9967_v18  ;;  %4834 = vmatpush1.bf16.msra.mxu0 %v9973_v26  ;;  %v2620_v58 = vpack.c.bf16 %v2572_v47, %v2572_v47  ;;  %v9978_v14 = vcombine.high %v2803_v4, %v2827_v43  ;;  %v2706_v37 = vld [vmem:[#allocation9 + $0x98] sm:$0xff] }
 0x1f1   :  { %2661 = vst [vmem:[#allocation2 + $0xb0] sm:$0xf] %v2613_v45  ;;  %4712 = vmatprep.subr.bf16.mxu1 %v10016_v27  ;;  %4835 = vmatprep.subr.bf16.mxu0 %v10022_v39  ;;  %2667 = vst [vmem:[#allocation2 + $0xe0] sm:$0xf] %v2619_v52  ;;  %v9971_v25 = vcombine.low %v2800_v29, %v2824_v63  ;;  %v9977_v35 = vcombine.low %v2803_v4, %v2827_v43  ;;  %v2730_v39 = vld [vmem:[#allocation9 + $0x158] sm:$0xff]  ;;  %v2781_v29 = vld [vmem:[#allocation9 + $0x2f0] sm:$0xff] }
 0x1f2   :  { %2662 = vst [vmem:[#allocation2 + $0xb8] sm:$0xf] %v2614_v17  ;;  %2668 = vst [vmem:[#allocation2 + $0xe8] sm:$0xf] %v2620_v58  ;;  %v10020_v36 = vcombine.high %v2848_v7, %v2872_v8  ;;  %v10026_v45 = vcombine.high %v2851_v12, %v2875_v15  ;;  %v10025_v58 = vcombine.low %v2851_v12, %v2875_v15  ;;  %v2802_v4 = vld [vmem:[#allocation9 + $0x398] sm:$0xff]  ;;  %v2853_v15 = vld [vmem:[#allocation9 + $0x530] sm:$0xff] }
 0x1f3   :  { %v9879_v63 = vcombine.low %v2706_v37, %v2730_v39  ;;  %v2826_v43 = vld [vmem:[#allocation9 + $0x458] sm:$0xff] }
 0x1f4   :  { %4713 = vmatpush1.bf16.msra.mxu1 %v10015_v49  ;;  %4836 = vmatpush1.bf16.msra.mxu0 %v10021_v53  ;;  %v10019_v53 = vcombine.low %v2848_v7, %v2872_v8  ;;  %v2805_v7 = vld [vmem:[#allocation9 + $0x3b0] sm:$0xff]  ;;  %v2874_v12 = vld [vmem:[#allocation9 + $0x5d8] sm:$0xff] }
 0x1f5   :  { %4788 = vmatprep.subr.bf16.mxu1 %v9876_v54  ;;  %4911 = vmatprep.subr.bf16.mxu0 %v9882_v59  ;;  %v2754_v54 = vld [vmem:[#allocation9 + $0x218] sm:$0xff]  ;;  %v9880_v59 = vcombine.high %v2706_v37, %v2730_v39  ;;  %v2829_v8 = vld [vmem:[#allocation9 + $0x470] sm:$0xff] }
 0x1f6   :  { %v9981_v39 = vcombine.low %v2805_v7, %v2829_v8 }
 0x1f7   :  { %10048 = vmatmul.mubr.msk.bf16.vlgmr.msra.gmra.mrb[80].mxu1 %vm1555_vm0, %v11879_v42  ;;  %10051 = vmatmul.mubr.msk.bf16.vlgmr.msra.gmra.mrb[80].mxu0 %vm1555_vm0, %v11879_v42 }
 0x1f8   :  { %4789 = vmatpush1.bf16.msra.mxu1 %v9875_v60  ;;  %4912 = vmatpush1.bf16.msra.mxu0 %v9881_v61  ;;  %v2757_v60 = vld [vmem:[#allocation9 + $0x230] sm:$0xff] }
 0x1f9   :  { %4790 = vmatprep.subr.bf16.mxu1 %v9924_v62  ;;  %4913 = vmatprep.subr.bf16.mxu0 %v9930_v2  ;;  %v9886_v62 = vcombine.high %v2709_v46, %v2733_v50  ;;  %v9885_v2 = vcombine.low %v2709_v46, %v2733_v50 }
 0x1fa   :  { %v2126_v13 = vpop.f32.mrb[28].mxu1  ;;  %4820 = vmatprep.mubr.bf16.mxu1 %v11711_v0  ;;  %4943 = vmatprep.mubr.bf16.mxu0 %v11711_v0  ;;  %v2249_v19 = vpop.f32.mrb[28].mxu0 }
 0x1fb   :  { %v2127_v16 = vadd.f32 %v2126_v13, %v462_v3  ;;  %v2128_v18 = vpop.f32.mrb[29].mxu1  ;;  %v2250_v26 = vadd.f32 %v2249_v19, %v486_v9  ;;  %v2251_v27 = vpop.f32.mrb[29].mxu0  ;;  %v9928_v3 = vcombine.high %v2754_v54, %v2778_v55  ;;  %v482_v9 = vrot.slane %v12065_v57, %v12019_v34 }
 0x1fc   :  { %v2129_v20 = vadd.f32 %v2128_v18, %v466_v5  ;;  %v2130_v21 = vpop.f32.mrb[30].mxu1  ;;  %4791 = vmatpush1.bf16.msra.mxu1 %v9923_v6  ;;  %4914 = vmatpush1.bf16.msra.mxu0 %v9929_v10  ;;  %v2252_v40 = vadd.f32 %v2251_v27, %v490_v48  ;;  %v2253_v41 = vpop.f32.mrb[30].mxu0  ;;  %v9934_v5 = vcombine.high %v2757_v60, %v2781_v29 }
 0x1fd   :  { %v2569_v28 = vmax.f32 %v2127_v16, 0.0  ;;  %v2131_v30 = vpop.f32.mrb[31].mxu1  ;;  %4792 = vmatprep.subr.bf16.mxu1 %v9972_v11  ;;  %4915 = vmatprep.subr.bf16.mxu0 %v9978_v14  ;;  %v2575_v47 = vmax.f32 %v2250_v26, 0.0  ;;  %v2254_v17 = vpop.f32.mrb[31].mxu0  ;;  %v478_v6 = vrot.slane %v12065_v57, %v12016_v33  ;;  %v9927_v10 = vcombine.low %v2754_v54, %v2778_v55  ;;  %v2850_v11 = vld [vmem:[#allocation9 + $0x518] sm:$0xff]  ;;  %v2708_v41 = vld [vmem:[#allocation9 + $0xa8] sm:$0xff] }
 0x1fe   :  { %v2570_v44 = vmax.f32 %v2129_v20, 0.0  ;;  %v2576_v51 = vmax.f32 %v2252_v40, 0.0  ;;  %v502_v48 = vrot.slane %v12095_v1, %v11970_v31  ;;  %v9933_v13 = vcombine.low %v2757_v60, %v2781_v29  ;;  %v2877_v20 = vld [vmem:[#allocation9 + $0x5f0] sm:$0xff]  ;;  %v2732_v17 = vld [vmem:[#allocation9 + $0x168] sm:$0xff] }
 0x1ff   :  { %v2617_v49 = vpack.c.bf16 %v2569_v28, %v2569_v28  ;;  %v2623_v56 = vpack.c.bf16 %v2575_v47, %v2575_v47  ;;  %v9976_v14 = vcombine.high %v2802_v4, %v2826_v43  ;;  %v506_v16 = vrot.slane %v12095_v1, %v11973_v38  ;;  %v2780_v29 = vld [vmem:[#allocation9 + $0x2e8] sm:$0xff] }
 0x200   :  { %v2618_v52 = vpack.c.bf16 %v2570_v44, %v2570_v44  ;;  %4793 = vmatpush1.bf16.msra.mxu1 %v9971_v25  ;;  %4916 = vmatpush1.bf16.msra.mxu0 %v9977_v35  ;;  %v2624_v61 = vpack.c.bf16 %v2576_v51, %v2576_v51  ;;  %v9982_v19 = vcombine.high %v2805_v7, %v2829_v8 }
 0x201   :  { %2665 = vst [vmem:[#allocation2 + $0xd0] sm:$0xf] %v2617_v49  ;;  %4794 = vmatprep.subr.bf16.mxu1 %v10020_v36  ;;  %4917 = vmatprep.subr.bf16.mxu0 %v10026_v45  ;;  %2671 = vst [vmem:[#allocation2 + $0x100] sm:$0xf] %v2623_v56  ;;  %v9975_v28 = vcombine.low %v2802_v4, %v2826_v43  ;;  %v10024_v40 = vcombine.high %v2850_v11, %v2874_v12  ;;  %v12125_v4 = vld [vmem:[#allocation8 + $0x28] sm:$0xff]  ;;  %v11077_v43 = vld [vmem:[#allocation12] sm:$0xff]  }
 0x202   :  { %2666 = vst [vmem:[#allocation2 + $0xd8] sm:$0xf] %v2618_v52  ;;  %2672 = vst [vmem:[#allocation2 + $0x108] sm:$0xf] %v2624_v61  ;;  %v10030_v47 = vcombine.high %v2853_v15, %v2877_v20  ;;  %v10023_v54 = vcombine.low %v2850_v11, %v2874_v12  ;;  %v10029_v56 = vcombine.low %v2853_v15, %v2877_v20  ;;  %v11076_v61 = vld [vmem:[#allocation12 + $0x40] sm:$0xff]  }
 0x203   :  { %v498_v7 = vrot.slane %v12095_v1, %v11993_v32  ;;  %v518_v11 = vrot.slane %v12125_v4, %v11962_v23 }
 0x204   :  { %4795 = vmatpush1.bf16.msra.mxu1 %v10019_v53  ;;  %4918 = vmatpush1.bf16.msra.mxu0 %v10025_v58  ;;  %v9884_v58 = vcombine.high %v2708_v41, %v2732_v17 }
 0x205   :  { %4870 = vmatprep.subr.bf16.mxu1 %v9880_v59  ;;  %4993 = vmatprep.subr.bf16.mxu0 %v9886_v62  ;;  %v2756_v59 = vld [vmem:[#allocation9 + $0x228] sm:$0xff]  ;;  %v9883_v62 = vcombine.low %v2708_v41, %v2732_v17 }
 0x206   :  { %v9931_v8 = vcombine.low %v2756_v59, %v2780_v29  ;;  %v11082_v17 = vld [vmem:[#allocation12 + $0x58] sm:$0xff]  }
 0x207   :  { %10050 = vmatmul.mubr.msk.bf16.vlgmr.msra.gmra.mrb[84].mxu1 %vm1555_vm0, %v11879_v42  ;;  %10053 = vmatmul.mubr.msk.bf16.vlgmr.msra.gmra.mrb[84].mxu0 %vm1555_vm0, %v11879_v42 }
 0x208   :  { %4871 = vmatpush1.bf16.msra.mxu1 %v9879_v63  ;;  %4994 = vmatpush1.bf16.msra.mxu0 %v9885_v2  ;;  %v9932_v63 = vcombine.high %v2756_v59, %v2780_v29  ;;  %v2804_v2 = vld [vmem:[#allocation9 + $0x3a8] sm:$0xff]  ;;  %v2806_v29 = vld [vmem:[#allocation9 + $0x3b8] sm:$0xff] }
 0x209   :  { %4872 = vmatprep.subr.bf16.mxu1 %v9928_v3  ;;  %4995 = vmatprep.subr.bf16.mxu0 %v9934_v5  ;;  %v2828_v3 = vld [vmem:[#allocation9 + $0x468] sm:$0xff]  ;;  %v494_v5 = vrot.slane %v12095_v1, %v11990_v22 }
 0x20a   :  { %v2208_v18 = vpop.f32.mrb[32].mxu1  ;;  %4902 = vmatprep.mubr.bf16.mxu1 %v11711_v0  ;;  %5025 = vmatprep.mubr.bf16.mxu0 %v11711_v0  ;;  %v2331_v25 = vpop.f32.mrb[32].mxu0  ;;  %v9980_v12 = vcombine.high %v2804_v2, %v2828_v3 }
 0x20b   :  { %v2209_v57 = vadd.f32 %v2208_v18, %v478_v6  ;;  %v2210_v21 = vpop.f32.mrb[33].mxu1  ;;  %v2332_v30 = vadd.f32 %v2331_v25, %v502_v48  ;;  %v2333_v35 = vpop.f32.mrb[33].mxu0  ;;  %v11078_v6 = vld [vmem:[#allocation12 + $0x48] sm:$0xff]   ;;  %v522_v48 = vrot.slane %v12125_v4, %v11965_v24 }
 0x20c   :  { %v2211_v26 = vadd.f32 %v2210_v21, %v482_v9  ;;  %v2212_v27 = vpop.f32.mrb[34].mxu1  ;;  %4873 = vmatpush1.bf16.msra.mxu1 %v9927_v10  ;;  %4996 = vmatpush1.bf16.msra.mxu0 %v9933_v13  ;;  %v2334_v44 = vadd.f32 %v2333_v35, %v506_v16  ;;  %v2335_v45 = vpop.f32.mrb[34].mxu0  ;;  %v2852_v9 = vld [vmem:[#allocation9 + $0x528] sm:$0xff]  ;;  %v9979_v21 = vcombine.low %v2804_v2, %v2828_v3  ;;  %v11086_v2 = vld [vmem:[#allocation12 + $0x68] sm:$0xff]  }
 0x20d   :  { %v2573_v36 = vmax.f32 %v2209_v57, 0.0  ;;  %v2213_v37 = vpop.f32.mrb[35].mxu1  ;;  %4874 = vmatprep.subr.bf16.mxu1 %v9976_v14  ;;  %4997 = vmatprep.subr.bf16.mxu0 %v9982_v19  ;;  %v2579_v49 = vmax.f32 %v2332_v30, 0.0  ;;  %v2336_v50 = vpop.f32.mrb[35].mxu0  ;;  %v2876_v10 = vld [vmem:[#allocation9 + $0x5e8] sm:$0xff]  ;;  %v11079_v14 = vld [vmem:[#allocation12 + $0x8] sm:$0xff]   ;;  %v514_v3 = vrot.slane %v12095_v1, %v12019_v34 }
 0x20e   :  { %v2574_v46 = vmax.f32 %v2211_v26, 0.0  ;;  %v2580_v52 = vmax.f32 %v2334_v44, 0.0  ;;  %v11080_v19 = vld [vmem:[#allocation12 + $0x50] sm:$0xff]   ;;  %v10028_v30 = vcombine.high %v2852_v9, %v2876_v10  ;;  %v10027_v50 = vcombine.low %v2852_v9, %v2876_v10 }
 0x20f   :  { %v2621_v51 = vpack.c.bf16 %v2573_v36, %v2573_v36  ;;  %v2627_v55 = vpack.c.bf16 %v2579_v49, %v2579_v49  ;;  %v11081_v45 = vld [vmem:[#allocation12 + $0x10] sm:$0xff]   ;;  %v538_v10 = vrot.slane %v12125_v4, %v11973_v38 }
 0x210   :  { %v2622_v53 = vpack.c.bf16 %v2574_v46, %v2574_v46  ;;  %4875 = vmatpush1.bf16.msra.mxu1 %v9975_v28  ;;  %4998 = vmatpush1.bf16.msra.mxu0 %v9981_v39  ;;  %v2628_v60 = vpack.c.bf16 %v2580_v52, %v2580_v52  ;;  %v2710_v39 = vld [vmem:[#allocation9 + $0xb8] sm:$0xff] }
 0x211   :  { %2669 = vst [vmem:[#allocation2 + $0xf0] sm:$0xf] %v2621_v51  ;;  %4876 = vmatprep.subr.bf16.mxu1 %v10024_v40  ;;  %4999 = vmatprep.subr.bf16.mxu0 %v10030_v47  ;;  %2675 = vst [vmem:[#allocation2 + $0x120] sm:$0xf] %v2627_v55  ;;  %v2734_v40 = vld [vmem:[#allocation9 + $0x178] sm:$0xff] }
 0x212   :  { %2670 = vst [vmem:[#allocation2 + $0xf8] sm:$0xf] %v2622_v53  ;;  %2676 = vst [vmem:[#allocation2 + $0x128] sm:$0xf] %v2628_v60  ;;  %v9888_v52 = vcombine.high %v2710_v39, %v2734_v40  ;;  %v2758_v53 = vld [vmem:[#allocation9 + $0x238] sm:$0xff]  ;;  %v9887_v59 = vcombine.low %v2710_v39, %v2734_v40 }
 0x214   :  { %4877 = vmatpush1.bf16.msra.mxu1 %v10023_v54  ;;  %5000 = vmatpush1.bf16.msra.mxu0 %v10029_v56  ;;  %v2782_v54 = vld [vmem:[#allocation9 + $0x2f8] sm:$0xff]  ;;  %v11083_v56 = vld [vmem:[#allocation12 + $0x18] sm:$0xff]  }
 0x215   :  { %4952 = vmatprep.subr.bf16.mxu1 %v9884_v58  ;;  %10445 = vmatprep.subr.bf16.mxu0 %v11076_v61  ;;  %v11084_v58 = vld [vmem:[#allocation12 + $0x60] sm:$0xff]   ;;  %v9936_v60 = vcombine.high %v2758_v53, %v2782_v54  ;;  %v2830_v61 = vld [vmem:[#allocation9 + $0x478] sm:$0xff] }
 0x216   :  { %v9984_v9 = vcombine.high %v2806_v29, %v2830_v61 }
 0x217   :  { %10052 = vmatmul.mubr.msk.bf16.vlgmr.msra.gmra.mrb[88].mxu1 %vm1555_vm0, %v11879_v42  ;;  %10055 = vmatmul.mubr.msk.bf16.vlgmr.msra.gmra.mrb[88].mxu0 %vm1555_vm0, %v11879_v42 }
 0x218   :  { %4953 = vmatpush1.bf16.msra.mxu1 %v9883_v62  ;;  %4984 = vmatprep.mubr.bf16.mxu1 %v11711_v0  ;;  %v11085_v62 = vld [vmem:[#allocation12 + $0x20] sm:$0xff]  }
 0x219   :  { %4954 = vmatprep.subr.bf16.mxu1 %v9932_v63  ;;  %10446 = vmatpush3.bf16.msra.mxu0 %v11077_v43  ;;  %v510_v63 = vrot.slane %v12095_v1, %v12016_v33  ;;  %v9935_v43 = vcombine.low %v2758_v53, %v2782_v54  ;;  %v530_v54 = vrot.slane %v12125_v4, %v11993_v32 }
 0x21a   :  { %v2290_v13 = vpop.f32.mrb[36].mxu1  ;;  %10447 = vmatprep.subr.bf16.mxu0 %v11078_v6  ;;  %v2413_v18 = vpop.f32.mrb[36].mxu0  ;;  %v2878_v6 = vld [vmem:[#allocation9 + $0x5f8] sm:$0xff] }
 0x21b   :  { %v2291_v15 = vadd.f32 %v2290_v13, %v494_v5  ;;  %v2292_v16 = vpop.f32.mrb[37].mxu1  ;;  %v2414_v25 = vadd.f32 %v2413_v18, %v518_v11  ;;  %v2415_v26 = vpop.f32.mrb[37].mxu0  ;;  %v2854_v5 = vld [vmem:[#allocation9 + $0x538] sm:$0xff] }
 0x21c   :  { %v2293_v20 = vadd.f32 %v2292_v16, %v498_v7  ;;  %v2294_v57 = vpop.f32.mrb[38].mxu1  ;;  %4955 = vmatpush1.bf16.msra.mxu1 %v9931_v8  ;;  %v2416_v35 = vadd.f32 %v2415_v26, %v522_v48  ;;  %v2417_v36 = vpop.f32.mrb[38].mxu0  ;;  %v534_v7 = vrot.slane %v12125_v4, %v11970_v31  ;;  %v11087_v8 = vld [vmem:[#allocation12 + $0x28] sm:$0xff]   ;;  %v9983_v16 = vcombine.low %v2806_v29, %v2830_v61  ;;  %v11102_v29 = vld [vmem:[#allocation12 + $0x90] sm:$0xff]  }
 0x21d   :  { %v2577_v27 = vmax.f32 %v2291_v15, 0.0  ;;  %v2295_v28 = vpop.f32.mrb[39].mxu1  ;;  %4956 = vmatprep.subr.bf16.mxu1 %v9980_v12  ;;  %10448 = vmatpush3.bf16.msra.mxu0 %v11079_v14  ;;  %v2583_v41 = vmax.f32 %v2414_v25, 0.0  ;;  %v2418_v44 = vpop.f32.mrb[39].mxu0  ;;  %v11088_v12 = vld [vmem:[#allocation12 + $0x70] sm:$0xff]   ;;  %v10032_v57 = vcombine.high %v2854_v5, %v2878_v6  ;;  %v10031_v40 = vcombine.low %v2854_v5, %v2878_v6 }
 0x21e   :  { %v2578_v37 = vmax.f32 %v2293_v20, 0.0  ;;  %v2584_v47 = vmax.f32 %v2416_v35, 0.0  ;;  %10449 = vmatprep.subr.bf16.mxu0 %v11080_v19 }
 0x21f   :  { %v2625_v46 = vpack.c.bf16 %v2577_v27, %v2577_v27  ;;  %v2631_v51 = vpack.c.bf16 %v2583_v41, %v2583_v41 }
 0x220   :  { %v2626_v49 = vpack.c.bf16 %v2578_v37, %v2578_v37  ;;  %4957 = vmatpush1.bf16.msra.mxu1 %v9979_v21  ;;  %v2632_v55 = vpack.c.bf16 %v2584_v47, %v2584_v47  ;;  %v11090_v37 = vld [vmem:[#allocation12 + $0x78] sm:$0xff]   ;;  %v11093_v47 = vld [vmem:[#allocation12 + $0x140] sm:$0xff]  }
 0x221   :  { %2673 = vst [vmem:[#allocation2 + $0x110] sm:$0xf] %v2625_v46  ;;  %4958 = vmatprep.subr.bf16.mxu1 %v10028_v30  ;;  %2679 = vst [vmem:[#allocation2 + $0x140] sm:$0xf] %v2631_v51  ;;  %10450 = vmatpush3.bf16.msra.mxu0 %v11081_v45  ;;  %v11089_v30 = vld [vmem:[#allocation12 + $0x30] sm:$0xff]   ;;  %v11091_v45 = vld [vmem:[#allocation12 + $0x38] sm:$0xff]   ;;  %v526_v51 = vrot.slane %v12125_v4, %v11990_v22 }
 0x222   :  { %2674 = vst [vmem:[#allocation2 + $0x118] sm:$0xf] %v2626_v49  ;;  %2680 = vst [vmem:[#allocation2 + $0x148] sm:$0xf] %v2632_v55  ;;  %10451 = vmatprep.subr.bf16.mxu0 %v11082_v17  ;;  %v11092_v46 = vld [vmem:[#allocation12 + $0xc0] sm:$0xff]   ;;  %v12151_v49 = vld [vmem:[#allocation11] sm:$0xff] }
 0x223   :  { %v11094_v17 = vld [vmem:[#allocation12 + $0x80] sm:$0xff]   ;;  %v2894_v53 = vrot.slane %v12151_v49, %v11962_v23  ;;  %v11100_v55 = vld [vmem:[#allocation12 + $0xd0] sm:$0xff]  }
 0x224   :  { %4959 = vmatpush1.bf16.msra.mxu1 %v10027_v50  ;;  %v11096_v50 = vld [vmem:[#allocation12 + $0xc8] sm:$0xff]  }
 0x225   :  { %5034 = vmatprep.subr.bf16.mxu1 %v9888_v52  ;;  %10452 = vmatpush3.bf16.msra.mxu0 %v11083_v56  ;;  %v11098_v52 = vld [vmem:[#allocation12 + $0x88] sm:$0xff]   ;;  %v2898_v56 = vrot.slane %v12151_v49, %v11965_v24 }
 0x226   :  { %10453 = vmatprep.subr.bf16.mxu0 %v11084_v58 }
 0x227   :  { %10054 = vmatmul.mubr.msk.bf16.vlgmr.msra.gmra.mrb[92].mxu1 %vm1555_vm0, %v11879_v42 }
 0x228   :  { %5035 = vmatpush1.bf16.msra.mxu1 %v9887_v59  ;;  %5066 = vmatprep.mubr.bf16.mxu1 %v11711_v0 }
 0x229   :  { %5036 = vmatprep.subr.bf16.mxu1 %v9936_v60  ;;  %10454 = vmatpush3.bf16.msra.mxu0 %v11085_v62 }
 0x22a   :  { %v2372_v11 = vpop.f32.mrb[40].mxu1  ;;  %v2495_v1 = vpop.f32.mrb[40].mxu0  ;;  %10455 = vmatprep.subr.bf16.mxu0 %v11086_v2 }
 0x22b   :  { %v2373_v48 = vadd.f32 %v2372_v11, %v510_v63  ;;  %v2374_v13 = vpop.f32.mrb[41].mxu1  ;;  %v2496_v18 = vadd.f32 %v2495_v1, %v534_v7  ;;  %v2497_v19 = vpop.f32.mrb[41].mxu0  ;;  %v11104_v7 = vld [vmem:[#allocation12 + $0xd8] sm:$0xff]  }
 0x22c   :  { %v2375_v14 = vadd.f32 %v2374_v13, %v514_v3  ;;  %v2376_v15 = vpop.f32.mrb[42].mxu1  ;;  %5037 = vmatpush1.bf16.msra.mxu1 %v9935_v43  ;;  %v2498_v21 = vadd.f32 %v2497_v19, %v538_v10  ;;  %v2499_v25 = vpop.f32.mrb[42].mxu0  ;;  %v11110_v19 = vld [vmem:[#allocation12 + $0xa0] sm:$0xff]  }
 0x22d   :  { %v2581_v0 = vmax.f32 %v2373_v48, 0.0  ;;  %v2377_v20 = vpop.f32.mrb[43].mxu1  ;;  %5038 = vmatprep.subr.bf16.mxu1 %v9984_v9  ;;  %v2587_v27 = vmax.f32 %v2496_v18, 0.0  ;;  %v2500_v28 = vpop.f32.mrb[43].mxu0  ;;  %10456 = vmatpush3.bf16.msra.mxu0 %v11087_v8  ;;  %v11106_v48 = vld [vmem:[#allocation12 + $0x98] sm:$0xff]   ;;  %v11108_v15 = vld [vmem:[#allocation12 + $0xe0] sm:$0xff]   ;;  %v546_v25 = vrot.slane %v12125_v4, %v12019_v34 }
 0x22e   :  { %v2582_v26 = vmax.f32 %v2375_v14, 0.0  ;;  %v2588_v36 = vmax.f32 %v2498_v21, 0.0  ;;  %10457 = vmatprep.subr.bf16.mxu0 %v11088_v12  ;;  %v542_v20 = vrot.slane %v12125_v4, %v12016_v33  ;;  %v2910_v21 = vrot.slane %v12151_v49, %v11970_v31 }
 0x22f   :  { %v2629_v35 = vpack.c.bf16 %v2581_v0, %v2581_v0  ;;  %v2635_v41 = vpack.c.bf16 %v2587_v27, %v2587_v27  ;;  %v11112_v0 = vld [vmem:[#allocation12 + $0xe8] sm:$0xff]   ;;  %v2914_v27 = vrot.slane %v12151_v49, %v11973_v38 }
 0x230   :  { %v2630_v39 = vpack.c.bf16 %v2582_v26, %v2582_v26  ;;  %5039 = vmatpush1.bf16.msra.mxu1 %v9983_v16  ;;  %v2636_v44 = vpack.c.bf16 %v2588_v36, %v2588_v36  ;;  %v11116_v26 = vld [vmem:[#allocation12 + $0xf0] sm:$0xff]  }
 0x231   :  { %2677 = vst [vmem:[#allocation2 + $0x130] sm:$0xf] %v2629_v35  ;;  %5040 = vmatprep.subr.bf16.mxu1 %v10032_v57  ;;  %2683 = vst [vmem:[#allocation2 + $0x160] sm:$0xf] %v2635_v41  ;;  %10458 = vmatpush3.bf16.msra.mxu0 %v11089_v30  ;;  %v11114_v57 = vld [vmem:[#allocation12 + $0xa8] sm:$0xff]  }
 0x232   :  { %2678 = vst [vmem:[#allocation2 + $0x138] sm:$0xf] %v2630_v39  ;;  %2684 = vst [vmem:[#allocation2 + $0x168] sm:$0xf] %v2636_v44  ;;  %10459 = vmatprep.subr.bf16.mxu0 %v11090_v37  ;;  %v11095_v37 = vld [vmem:[#allocation12 + $0x100] sm:$0xff]   ;;  %v11097_v39 = vld [vmem:[#allocation12 + $0x148] sm:$0xff]  }
 0x234   :  { %5041 = vmatpush1.bf16.msra.mxu1 %v10031_v40 }
 0x235   :  { %10467 = vmatprep.subr.bf16.mxu1 %v11092_v46  ;;  %10460 = vmatpush3.bf16.msra.mxu0 %v11091_v45 }
 0x236   :  { %10489 = vmatprep.subr.bf16.mxu0 %v11093_v47  ;;  %v11118_v47 = vld [vmem:[#allocation12 + $0xb0] sm:$0xff]  }
 0x237   :  { %10056 = vmatmul.mubr.msk.bf16.vlgmr.msra.gmra.mrb[96].mxu1 %vm1555_vm0, %v11879_v42 }
 0x238   :  { %10468 = vmatpush3.bf16.msra.mxu1 %v11094_v17 }
 0x239   :  { %10469 = vmatprep.subr.bf16.mxu1 %v11096_v50 }
 0x23a   :  { %v2454_v58 = vpop.f32.mrb[44].mxu1  ;;  %v4125_v42 = vpop.f32.mrb[44].mxu0 }
 0x23b   :  { %v2455_v59 = vadd.f32 %v2454_v58, %v526_v51  ;;  %v2456_v60 = vpop.f32.mrb[45].mxu1  ;;  %v4126_v61 = vadd.f32 %v4125_v42, %v2894_v53  ;;  %v4127_v63 = vpop.f32.mrb[45].mxu0  ;;  %v11120_v53 = vld [vmem:[#allocation12 + $0xf8] sm:$0xff]   ;;  %v11101_v58 = vld [vmem:[#allocation12 + $0x150] sm:$0xff]  }
 0x23c   :  { %v2457_v62 = vadd.f32 %v2456_v60, %v530_v54  ;;  %v2458_v2 = vpop.f32.mrb[46].mxu1  ;;  %10470 = vmatpush3.bf16.msra.mxu1 %v11098_v52  ;;  %v4128_v43 = vadd.f32 %v4127_v63, %v2898_v56  ;;  %v4129_v6 = vpop.f32.mrb[46].mxu0  ;;  %v11099_v56 = vld [vmem:[#allocation12 + $0x108] sm:$0xff]  }
 0x23d   :  { %v2585_v3 = vmax.f32 %v2455_v59, 0.0  ;;  %v2459_v5 = vpop.f32.mrb[47].mxu1  ;;  %10471 = vmatprep.subr.bf16.mxu1 %v11100_v55  ;;  %v5075_v8 = vmax.f32 %v4126_v61, 0.0  ;;  %v4130_v10 = vpop.f32.mrb[47].mxu0  ;;  %v11124_v2 = vld [vmem:[#allocation12 + $0x1c0] sm:$0xff]   ;;  %v11105_v6 = vld [vmem:[#allocation12 + $0x158] sm:$0xff]  }
 0x23e   :  { %v2586_v9 = vmax.f32 %v2457_v62, 0.0  ;;  %v5076_v12 = vmax.f32 %v4128_v43, 0.0  ;;  %v11103_v43 = vld [vmem:[#allocation12 + $0x110] sm:$0xff]  }
 0x23f   :  { %v2633_v11 = vpack.c.bf16 %v2585_v3, %v2585_v3  ;;  %v5123_v13 = vpack.c.bf16 %v5075_v8, %v5075_v8  ;;  %v11107_v8 = vld [vmem:[#allocation12 + $0x118] sm:$0xff]  }
 0x240   :  { %v2634_v1 = vpack.c.bf16 %v2586_v9, %v2586_v9  ;;  %10472 = vmatpush3.bf16.msra.mxu1 %v11102_v29  ;;  %v5124_v14 = vpack.c.bf16 %v5076_v12, %v5076_v12  ;;  %v11122_v29 = vld [vmem:[#allocation12 + $0xb8] sm:$0xff]   ;;  %v2902_v9 = vrot.slane %v12151_v49, %v11990_v22  ;;  %v11109_v12 = vld [vmem:[#allocation12 + $0x160] sm:$0xff]  }
 0x241   :  { %2681 = vst [vmem:[#allocation2 + $0x150] sm:$0xf] %v2633_v11  ;;  %10473 = vmatprep.subr.bf16.mxu1 %v11104_v7  ;;  %v5219_v16 = vrot.slane %v5123_v13, 4  ;;  %v12171_v7 = vld [vmem:[#allocation11 + $0x8] sm:$0xff]  ;;  %v2906_v11 = vrot.slane %v12151_v49, %v11993_v32 }
 0x242   :  { %2682 = vst [vmem:[#allocation2 + $0x158] sm:$0xf] %v2634_v1  ;;  %v5220_v18 = vrot.slane %v5124_v14, 4  ;;  %v2926_v10 = vrot.slane %v12171_v7, %v11962_v23 }
 0x243   :  { %5315 = vst [vmem:[#allocation2] sm:$0xf0] %v5219_v16  ;;  %v11111_v16 = vld [vmem:[#allocation12 + $0x120] sm:$0xff]  }
 0x244   :  { %10474 = vmatpush3.bf16.msra.mxu1 %v11106_v48  ;;  %5316 = vst [vmem:[#allocation2 + $0x8] sm:$0xf0] %v5220_v18  ;;  %v2930_v48 = vrot.slane %v12171_v7, %v11965_v24 }
 0x245   :  { %10475 = vmatprep.subr.bf16.mxu1 %v11108_v15 }
 0x248   :  { %10476 = vmatpush3.bf16.msra.mxu1 %v11110_v19 }
 0x249   :  { %10477 = vmatprep.subr.bf16.mxu1 %v11112_v0 }
 0x24a   :  { %v2536_v28 = vpop.f32.mrb[48].mxu1  ;;  %v4207_v35 = vpop.f32.mrb[48].mxu0  ;;  %v5363_v51 = vld [vmem:[#allocation2] sm:$0xff] }
 0x24b   :  { %v2537_v30 = vadd.f32 %v2536_v28, %v542_v20  ;;  %v2538_v36 = vpop.f32.mrb[49].mxu1  ;;  %v4208_v40 = vadd.f32 %v4207_v35, %v2910_v21  ;;  %v4209_v44 = vpop.f32.mrb[49].mxu0  ;;  %v5364_v46 = vld [vmem:[#allocation2 + $0x8] sm:$0xff]  ;;  %v11113_v21 = vld [vmem:[#allocation12 + $0x168] sm:$0xff]  }
 0x24c   :  { %v2539_v41 = vadd.f32 %v2538_v36, %v546_v25  ;;  %v2540_v45 = vpop.f32.mrb[50].mxu1  ;;  %10478 = vmatpush3.bf16.msra.mxu1 %v11114_v57  ;;  %v4210_v17 = vadd.f32 %v4209_v44, %v2914_v27  ;;  %8522 = vmatprep.mubr.bf16.mxu0 %v5364_v46  ;;  %v4211_v52 = vpop.f32.mrb[50].mxu0  ;;  %v11115_v36 = vld [vmem:[#allocation12 + $0x128] sm:$0xff]  }
 0x24d   :  { %v2589_v4 = vmax.f32 %v2537_v30, 0.0  ;;  %v2541_v50 = vpop.f32.mrb[51].mxu1  ;;  %10479 = vmatprep.subr.bf16.mxu1 %v11116_v26  ;;  %v5079_v54 = vmax.f32 %v4208_v40, 0.0  ;;  %8523 = vmatmul.mubr.bf16.vlgmr.msra.gmra.mrb[92].mxu0 %v5363_v51  ;;  %v4212_v59 = vpop.f32.mrb[51].mxu0  ;;  %v11121_v52 = vld [vmem:[#allocation12 + $0x178] sm:$0xff]  }
 0x24e   :  { %v2590_v55 = vmax.f32 %v2539_v41, 0.0  ;;  %v5080_v60 = vmax.f32 %v4210_v17, 0.0  ;;  %10490 = vmatpush3.bf16.msra.mxu0 %v11095_v37  ;;  %v11117_v41 = vld [vmem:[#allocation12 + $0x170] sm:$0xff]   ;;  %v11126_v59 = vld [vmem:[#allocation12 + $0x180] sm:$0xff]  }
 0x24f   :  { %v2637_v42 = vpack.c.bf16 %v2589_v4, %v2589_v4  ;;  %v5127_v61 = vpack.c.bf16 %v5079_v54, %v5079_v54  ;;  %10491 = vmatprep.subr.bf16.mxu0 %v11097_v39  ;;  %v11119_v50 = vld [vmem:[#allocation12 + $0x130] sm:$0xff]   ;;  %v2918_v54 = vrot.slane %v12151_v49, %v12016_v33 }
 0x250   :  { %v2638_v62 = vpack.c.bf16 %v2590_v55, %v2590_v55  ;;  %10480 = vmatpush3.bf16.msra.mxu1 %v11118_v47  ;;  %v5128_v63 = vpack.c.bf16 %v5080_v60, %v5080_v60  ;;  %v11125_v55 = vld [vmem:[#allocation12 + $0x240] sm:$0xff]  }
 0x251   :  { %2685 = vst [vmem:[#allocation2 + $0x170] sm:$0xf] %v2637_v42  ;;  %10481 = vmatprep.subr.bf16.mxu1 %v11120_v53  ;;  %v5223_v3 = vrot.slane %v5127_v61, 4  ;;  %v11123_v53 = vld [vmem:[#allocation12 + $0x138] sm:$0xff]   ;;  %v2946_v42 = vrot.slane %v12171_v7, %v11973_v38  ;;  %v11128_v61 = vld [vmem:[#allocation12 + $0x1c8] sm:$0xff]  }
 0x252   :  { %2686 = vst [vmem:[#allocation2 + $0x178] sm:$0xf] %v2638_v62  ;;  %v5224_v5 = vrot.slane %v5128_v63, 4  ;;  %10492 = vmatpush3.bf16.msra.mxu0 %v11099_v56  ;;  %v2942_v56 = vrot.slane %v12171_v7, %v11970_v31 }
 0x253   :  { %5319 = vst [vmem:[#allocation2 + $0x20] sm:$0xf0] %v5223_v3  ;;  %10493 = vmatprep.subr.bf16.mxu0 %v11101_v58  ;;  %v2922_v58 = vrot.slane %v12151_v49, %v12019_v34 }
 0x254   :  { %10482 = vmatpush3.bf16.msra.mxu1 %v11122_v29  ;;  %5320 = vst [vmem:[#allocation2 + $0x28] sm:$0xf0] %v5224_v5  ;;  %v11127_v29 = vld [vmem:[#allocation12 + $0x200] sm:$0xff]  }
 0x255   :  { %10511 = vmatprep.subr.bf16.mxu1 %v11124_v2 }
 0x256   :  { %10494 = vmatpush3.bf16.msra.mxu0 %v11103_v43  ;;  %v11129_v43 = vld [vmem:[#allocation12 + $0x248] sm:$0xff]  }
 0x257   :  { %10495 = vmatprep.subr.bf16.mxu0 %v11105_v6 }
 0x25a   :  { %v4166_v13 = vpop.f32.mrb[52].mxu1  ;;  %10496 = vmatpush3.bf16.msra.mxu0 %v11107_v8  ;;  %v4289_v14 = vpop.f32.mrb[52].mxu0 }
 0x25b   :  { %v4167_v1 = vadd.f32 %v4166_v13, %v2902_v9  ;;  %v4168_v15 = vpop.f32.mrb[53].mxu1  ;;  %v4290_v18 = vadd.f32 %v4289_v14, %v2926_v10  ;;  %v4291_v0 = vpop.f32.mrb[53].mxu0  ;;  %10497 = vmatprep.subr.bf16.mxu0 %v11109_v12  ;;  %v5368_v57 = vld [vmem:[#allocation2 + $0x28] sm:$0xff] }
 0x25c   :  { %v4169_v19 = vadd.f32 %v4168_v15, %v2906_v11  ;;  %v4170_v20 = vpop.f32.mrb[54].mxu1  ;;  %v4292_v26 = vadd.f32 %v4291_v0, %v2930_v48  ;;  %8604 = vmatprep.mubr.bf16.mxu0 %v5368_v57  ;;  %v4293_v28 = vpop.f32.mrb[54].mxu0  ;;  %v5367_v48 = vld [vmem:[#allocation2 + $0x20] sm:$0xff] }
 0x25d   :  { %v5077_v25 = vmax.f32 %v4167_v1, 0.0  ;;  %v4171_v27 = vpop.f32.mrb[55].mxu1  ;;  %v5083_v30 = vmax.f32 %v4290_v18, 0.0  ;;  %v4294_v37 = vpop.f32.mrb[55].mxu0  ;;  %v11131_v18 = vld [vmem:[#allocation12 + $0x208] sm:$0xff]  }
 0x25e   :  { %v5078_v35 = vmax.f32 %v4169_v19, 0.0  ;;  %v5084_v40 = vmax.f32 %v4292_v26, 0.0  ;;  %10498 = vmatpush3.bf16.msra.mxu0 %v11111_v16  ;;  %v11130_v16 = vld [vmem:[#allocation12 + $0x188] sm:$0xff]   ;;  %v11132_v19 = vld [vmem:[#allocation12 + $0x1d0] sm:$0xff]  }
 0x25f   :  { %v5125_v39 = vpack.c.bf16 %v5077_v25, %v5077_v25  ;;  %v5131_v44 = vpack.c.bf16 %v5083_v30, %v5083_v30  ;;  %10499 = vmatprep.subr.bf16.mxu0 %v11113_v21  ;;  %v11133_v21 = vld [vmem:[#allocation12 + $0x250] sm:$0xff]  }
 0x260   :  { %v5126_v45 = vpack.c.bf16 %v5078_v35, %v5078_v35  ;;  %v5132_v47 = vpack.c.bf16 %v5084_v40, %v5084_v40  ;;  %v11134_v30 = vld [vmem:[#allocation12 + $0x190] sm:$0xff]  }
 0x261   :  { %v5221_v46 = vrot.slane %v5125_v39, 4  ;;  %v5227_v4 = vrot.slane %v5131_v44, 4  ;;  %v11135_v37 = vld [vmem:[#allocation12 + $0x210] sm:$0xff]   ;;  %v11136_v39 = vld [vmem:[#allocation12 + $0x1d8] sm:$0xff]   ;;  %v12189_v44 = vld [vmem:[#allocation11 + $0x10] sm:$0xff] }
 0x262   :  { %v5222_v17 = vrot.slane %v5126_v45, 4  ;;  %v5228_v51 = vrot.slane %v5132_v47, 4  ;;  %10500 = vmatpush3.bf16.msra.mxu0 %v11115_v36  ;;  %v11138_v45 = vld [vmem:[#allocation12 + $0x198] sm:$0xff]   ;;  %v2934_v47 = vrot.slane %v12171_v7, %v11990_v22 }
 0x263   :  { %5317 = vst [vmem:[#allocation2 + $0x10] sm:$0xf0] %v5221_v46  ;;  %5323 = vst [vmem:[#allocation2 + $0x40] sm:$0xf0] %v5227_v4  ;;  %10501 = vmatprep.subr.bf16.mxu0 %v11117_v41  ;;  %v11137_v41 = vld [vmem:[#allocation12 + $0x258] sm:$0xff]   ;;  %v11140_v4 = vld [vmem:[#allocation12 + $0x1e0] sm:$0xff]  }
 0x264   :  { %5318 = vst [vmem:[#allocation2 + $0x18] sm:$0xf0] %v5222_v17  ;;  %5324 = vst [vmem:[#allocation2 + $0x48] sm:$0xf0] %v5228_v51  ;;  %v11139_v46 = vld [vmem:[#allocation12 + $0x218] sm:$0xff]   ;;  %v2958_v17 = vrot.slane %v12189_v44, %v11962_v23  ;;  %v11141_v51 = vld [vmem:[#allocation12 + $0x260] sm:$0xff]  }
 0x266   :  { %10502 = vmatpush3.bf16.msra.mxu0 %v11119_v50  ;;  %v2938_v50 = vrot.slane %v12171_v7, %v11993_v32 }
 0x267   :  { %10503 = vmatprep.subr.bf16.mxu0 %v11121_v52  ;;  %v2962_v52 = vrot.slane %v12189_v44, %v11965_v24 }
 0x26a   :  { %v4248_v60 = vpop.f32.mrb[56].mxu1  ;;  %10504 = vmatpush3.bf16.msra.mxu0 %v11123_v53  ;;  %v4371_v63 = vpop.f32.mrb[56].mxu0  ;;  %v5365_v9 = vld [vmem:[#allocation2 + $0x10] sm:$0xff] }
 0x26b   :  { %v4249_v62 = vadd.f32 %v4248_v60, %v2918_v54  ;;  %v4250_v2 = vpop.f32.mrb[57].mxu1  ;;  %v5366_v3 = vld [vmem:[#allocation2 + $0x18] sm:$0xff]  ;;  %v4372_v5 = vadd.f32 %v4371_v63, %v2942_v56  ;;  %v4373_v8 = vpop.f32.mrb[57].mxu0  ;;  %10533 = vmatprep.subr.bf16.mxu0 %v11125_v55  ;;  %v5372_v49 = vld [vmem:[#allocation2 + $0x48] sm:$0xff]  ;;  %v11144_v60 = vld [vmem:[#allocation12 + $0x1e8] sm:$0xff]  }
 0x26c   :  { %v4251_v6 = vadd.f32 %v4250_v2, %v2922_v58  ;;  %8563 = vmatprep.mubr.bf16.mxu1 %v5366_v3  ;;  %v4252_v10 = vpop.f32.mrb[58].mxu1  ;;  %v4374_v12 = vadd.f32 %v4373_v8, %v2946_v42  ;;  %v4375_v13 = vpop.f32.mrb[58].mxu0  ;;  %v11142_v54 = vld [vmem:[#allocation12 + $0x1a0] sm:$0xff]   ;;  %v11145_v63 = vld [vmem:[#allocation12 + $0x268] sm:$0xff]  }
 0x26d   :  { %v5081_v11 = vmax.f32 %v4249_v62, 0.0  ;;  %8564 = vmatmul.mubr.bf16.vlgmr.msra.gmra.mrb[100].mxu1 %v5365_v9  ;;  %v4253_v1 = vpop.f32.mrb[59].mxu1  ;;  %v5087_v14 = vmax.f32 %v4372_v5, 0.0  ;;  %8605 = vmatmul.mubr.bf16.vlgmr.msra.gmra.mrb[96].mxu0 %v5367_v48  ;;  %v4376_v0 = vpop.f32.mrb[59].mxu0  ;;  %v11143_v55 = vld [vmem:[#allocation12 + $0x220] sm:$0xff]   ;;  %v11147_v10 = vld [vmem:[#allocation12 + $0x228] sm:$0xff]  }
 0x26e   :  { %v5082_v15 = vmax.f32 %v4251_v6, 0.0  ;;  %10512 = vmatpush3.bf16.msra.mxu1 %v11126_v59  ;;  %v5088_v57 = vmax.f32 %v4374_v12, 0.0  ;;  %10534 = vmatpush3.bf16.msra.mxu0 %v11127_v29  ;;  %v11149_v1 = vld [vmem:[#allocation12 + $0x270] sm:$0xff]  }
 0x26f   :  { %v5129_v20 = vpack.c.bf16 %v5081_v11, %v5081_v11  ;;  %8686 = vmatprep.mubr.bf16.mxu0 %v5372_v49  ;;  %v5135_v25 = vpack.c.bf16 %v5087_v14, %v5087_v14  ;;  %10513 = vmatprep.subr.bf16.mxu1 %v11128_v61  ;;  %v11146_v49 = vld [vmem:[#allocation12 + $0x1a8] sm:$0xff]   ;;  %v11148_v11 = vld [vmem:[#allocation12 + $0x1f0] sm:$0xff]  }
 0x270   :  { %v5130_v26 = vpack.c.bf16 %v5082_v15, %v5082_v15  ;;  %10535 = vmatprep.subr.bf16.mxu0 %v11129_v43  ;;  %v5136_v28 = vpack.c.bf16 %v5088_v57, %v5088_v57  ;;  %v11151_v57 = vld [vmem:[#allocation12 + $0x230] sm:$0xff]  }
 0x271   :  { %v5225_v27 = vrot.slane %v5129_v20, 4  ;;  %v5231_v35 = vrot.slane %v5135_v25, 4  ;;  %v11150_v20 = vld [vmem:[#allocation12 + $0x1b0] sm:$0xff]   ;;  %v11152_v25 = vld [vmem:[#allocation12 + $0x1f8] sm:$0xff]  }
 0x272   :  { %v5226_v36 = vrot.slane %v5130_v26, 4  ;;  %10514 = vmatpush3.bf16.msra.mxu1 %v11130_v16  ;;  %v5232_v40 = vrot.slane %v5136_v28, 4  ;;  %10536 = vmatpush3.bf16.msra.mxu0 %v11131_v18  ;;  %v11153_v26 = vld [vmem:[#allocation12 + $0x278] sm:$0xff]  }
 0x273   :  { %5321 = vst [vmem:[#allocation2 + $0x30] sm:$0xf0] %v5225_v27  ;;  %10515 = vmatprep.subr.bf16.mxu1 %v11132_v19  ;;  %5327 = vst [vmem:[#allocation2 + $0x60] sm:$0xf0] %v5231_v35  ;;  %10537 = vmatprep.subr.bf16.mxu0 %v11133_v21  ;;  %v11154_v27 = vld [vmem:[#allocation12 + $0x1b8] sm:$0xff]   ;;  %v11156_v35 = vld [vmem:[#allocation12 + $0x2c0] sm:$0xff]  }
 0x274   :  { %5322 = vst [vmem:[#allocation2 + $0x38] sm:$0xf0] %v5226_v36  ;;  %5328 = vst [vmem:[#allocation2 + $0x68] sm:$0xf0] %v5232_v40  ;;  %v11155_v28 = vld [vmem:[#allocation12 + $0x238] sm:$0xff]   ;;  %v2974_v36 = vrot.slane %v12189_v44, %v11970_v31  ;;  %v2978_v40 = vrot.slane %v12189_v44, %v11973_v38 }
 0x276   :  { %10516 = vmatpush3.bf16.msra.mxu1 %v11134_v30  ;;  %10538 = vmatpush3.bf16.msra.mxu0 %v11135_v37  ;;  %v2950_v30 = vrot.slane %v12171_v7, %v12016_v33  ;;  %v2954_v37 = vrot.slane %v12171_v7, %v12019_v34 }
 0x277   :  { %10517 = vmatprep.subr.bf16.mxu1 %v11136_v39  ;;  %10539 = vmatprep.subr.bf16.mxu0 %v11137_v41  ;;  %v11157_v39 = vld [vmem:[#allocation12 + $0x340] sm:$0xff]  }
 0x27a   :  { %10518 = vmatpush3.bf16.msra.mxu1 %v11138_v45  ;;  %v4330_v53 = vpop.f32.mrb[60].mxu1  ;;  %10540 = vmatpush3.bf16.msra.mxu0 %v11139_v46  ;;  %v4453_v58 = vpop.f32.mrb[60].mxu0  ;;  %v11158_v45 = vld [vmem:[#allocation12 + $0x280] sm:$0xff]  }
 0x27b   :  { %v4331_v56 = vadd.f32 %v4330_v53, %v2934_v47  ;;  %v4332_v59 = vpop.f32.mrb[61].mxu1  ;;  %10519 = vmatprep.subr.bf16.mxu1 %v11140_v4  ;;  %v5370_v42 = vld [vmem:[#allocation2 + $0x38] sm:$0xff]  ;;  %v4454_v29 = vadd.f32 %v4453_v58, %v2958_v17  ;;  %v4455_v62 = vpop.f32.mrb[61].mxu0  ;;  %10541 = vmatprep.subr.bf16.mxu0 %v11141_v51  ;;  %v11159_v17 = vld [vmem:[#allocation12 + $0x300] sm:$0xff]  }
 0x27c   :  { %v4333_v61 = vadd.f32 %v4332_v59, %v2938_v50  ;;  %8645 = vmatprep.mubr.bf16.mxu1 %v5370_v42  ;;  %v4334_v2 = vpop.f32.mrb[62].mxu1  ;;  %v4456_v43 = vadd.f32 %v4455_v62, %v2962_v52  ;;  %v4457_v5 = vpop.f32.mrb[62].mxu0  ;;  %v11160_v50 = vld [vmem:[#allocation12 + $0x2c8] sm:$0xff]   ;;  %v5371_v59 = vld [vmem:[#allocation2 + $0x40] sm:$0xff] }
 0x27d   :  { %v5085_v3 = vmax.f32 %v4331_v56, 0.0  ;;  %v4335_v6 = vpop.f32.mrb[63].mxu1  ;;  %v5091_v8 = vmax.f32 %v4454_v29, 0.0  ;;  %v4458_v12 = vpop.f32.mrb[63].mxu0  ;;  %v11161_v42 = vld [vmem:[#allocation12 + $0x348] sm:$0xff]  }
 0x27e   :  { %v5086_v9 = vmax.f32 %v4333_v61, 0.0  ;;  %10520 = vmatpush3.bf16.msra.mxu1 %v11142_v54  ;;  %v5092_v13 = vmax.f32 %v4456_v43, 0.0  ;;  %10542 = vmatpush3.bf16.msra.mxu0 %v11143_v55  ;;  %v5369_v54 = vld [vmem:[#allocation2 + $0x30] sm:$0xff]  ;;  %v11165_v43 = vld [vmem:[#allocation12 + $0x350] sm:$0xff]  }
 0x27f   :  { %v5133_v48 = vpack.c.bf16 %v5085_v3, %v5085_v3  ;;  %10521 = vmatprep.subr.bf16.mxu1 %v11144_v60  ;;  %v5139_v14 = vpack.c.bf16 %v5091_v8, %v5091_v8  ;;  %10543 = vmatprep.subr.bf16.mxu0 %v11145_v63  ;;  %v11162_v60 = vld [vmem:[#allocation12 + $0x288] sm:$0xff]   ;;  %v11164_v3 = vld [vmem:[#allocation12 + $0x2d0] sm:$0xff]  }
 0x280   :  { %v5134_v15 = vpack.c.bf16 %v5086_v9, %v5086_v9  ;;  %v5140_v18 = vpack.c.bf16 %v5092_v13, %v5092_v13  ;;  %v11163_v2 = vld [vmem:[#allocation12 + $0x308] sm:$0xff]   ;;  %v5376_v9 = vld [vmem:[#allocation2 + $0x68] sm:$0xff] }
 0x281   :  { %v5229_v16 = vrot.slane %v5133_v48, 4  ;;  %v5235_v19 = vrot.slane %v5139_v14, 4  ;;  %v11167_v14 = vld [vmem:[#allocation12 + $0x310] sm:$0xff]  }
 0x282   :  { %v5230_v0 = vrot.slane %v5134_v15, 4  ;;  %10522 = vmatpush3.bf16.msra.mxu1 %v11146_v49  ;;  %v5236_v21 = vrot.slane %v5140_v18, 4  ;;  %10544 = vmatpush3.bf16.msra.mxu0 %v11147_v10  ;;  %v11169_v18 = vld [vmem:[#allocation12 + $0x358] sm:$0xff]  }
 0x283   :  { %5325 = vst [vmem:[#allocation2 + $0x50] sm:$0xf0] %v5229_v16  ;;  %10523 = vmatprep.subr.bf16.mxu1 %v11148_v11  ;;  %5331 = vst [vmem:[#allocation2 + $0x80] sm:$0xf0] %v5235_v19  ;;  %10545 = vmatprep.subr.bf16.mxu0 %v11149_v1  ;;  %v11166_v1 = vld [vmem:[#allocation12 + $0x290] sm:$0xff]   ;;  %v11168_v16 = vld [vmem:[#allocation12 + $0x2d8] sm:$0xff]  }
 0x284   :  { %5326 = vst [vmem:[#allocation2 + $0x58] sm:$0xf0] %v5230_v0  ;;  %5332 = vst [vmem:[#allocation2 + $0x88] sm:$0xf0] %v5236_v21  ;;  %v12207_v19 = vld [vmem:[#allocation11 + $0x18] sm:$0xff]  ;;  %v11170_v0 = vld [vmem:[#allocation12 + $0x298] sm:$0xff]  }
 0x285   :  { %v11172_v21 = vld [vmem:[#allocation12 + $0x2e0] sm:$0xff]  }
 0x286   :  { %10524 = vmatpush3.bf16.msra.mxu1 %v11150_v20  ;;  %10546 = vmatpush3.bf16.msra.mxu0 %v11151_v57  ;;  %v11171_v20 = vld [vmem:[#allocation12 + $0x318] sm:$0xff]   ;;  %v2966_v57 = vrot.slane %v12189_v44, %v11990_v22 }
 0x287   :  { %10525 = vmatprep.subr.bf16.mxu1 %v11152_v25  ;;  %10547 = vmatprep.subr.bf16.mxu0 %v11153_v26  ;;  %v2990_v25 = vrot.slane %v12207_v19, %v11962_v23  ;;  %v2970_v26 = vrot.slane %v12189_v44, %v11993_v32 }
 0x28a   :  { %10526 = vmatpush3.bf16.msra.mxu1 %v11154_v27  ;;  %v4412_v41 = vpop.f32.mrb[64].mxu1  ;;  %10548 = vmatpush3.bf16.msra.mxu0 %v11155_v28  ;;  %v4535_v47 = vpop.f32.mrb[64].mxu0  ;;  %v11173_v27 = vld [vmem:[#allocation12 + $0x360] sm:$0xff]   ;;  %v2994_v28 = vrot.slane %v12207_v19, %v11965_v24 }
 0x28b   :  { %v4413_v46 = vadd.f32 %v4412_v41, %v2950_v30  ;;  %v4414_v4 = vpop.f32.mrb[65].mxu1  ;;  %10555 = vmatprep.subr.bf16.mxu1 %v11156_v35  ;;  %v4536_v51 = vadd.f32 %v4535_v47, %v2974_v36  ;;  %v4537_v53 = vpop.f32.mrb[65].mxu0  ;;  %10577 = vmatprep.subr.bf16.mxu0 %v11157_v39  ;;  %v5374_v7 = vld [vmem:[#allocation2 + $0x58] sm:$0xff]  ;;  %v11174_v35 = vld [vmem:[#allocation12 + $0x2a0] sm:$0xff]   ;;  %v11176_v41 = vld [vmem:[#allocation12 + $0x2e8] sm:$0xff]  }
 0x28c   :  { %v4415_v52 = vadd.f32 %v4414_v4, %v2954_v37  ;;  %v4416_v55 = vpop.f32.mrb[66].mxu1  ;;  %v4538_v58 = vadd.f32 %v4537_v53, %v2978_v40  ;;  %v4539_v29 = vpop.f32.mrb[66].mxu0  ;;  %v11175_v40 = vld [vmem:[#allocation12 + $0x320] sm:$0xff]   ;;  %v11177_v4 = vld [vmem:[#allocation12 + $0x368] sm:$0xff]  }
 0x28d   :  { %v5089_v56 = vmax.f32 %v4413_v46, 0.0  ;;  %8646 = vmatmul.mubr.bf16.vlgmr.msra.gmra.mrb[104].mxu1 %v5369_v54  ;;  %v4417_v61 = vpop.f32.mrb[67].mxu1  ;;  %v5095_v62 = vmax.f32 %v4536_v51, 0.0  ;;  %8687 = vmatmul.mubr.bf16.vlgmr.msra.gmra.mrb[100].mxu0 %v5371_v59  ;;  %v4540_v5 = vpop.f32.mrb[67].mxu0  ;;  %v11178_v55 = vld [vmem:[#allocation12 + $0x2a8] sm:$0xff]  }
 0x28e   :  { %v5090_v63 = vmax.f32 %v4415_v52, 0.0  ;;  %10556 = vmatpush3.bf16.msra.mxu1 %v11158_v45  ;;  %v5096_v8 = vmax.f32 %v4538_v58, 0.0  ;;  %8727 = vmatprep.mubr.bf16.mxu1 %v5374_v7  ;;  %v11182_v5 = vld [vmem:[#allocation12 + $0x2b0] sm:$0xff]  }
 0x28f   :  { %v5137_v6 = vpack.c.bf16 %v5089_v56, %v5089_v56  ;;  %10578 = vmatpush3.bf16.msra.mxu0 %v11159_v17  ;;  %v5143_v49 = vpack.c.bf16 %v5095_v62, %v5095_v62  ;;  %8768 = vmatprep.mubr.bf16.mxu0 %v5376_v9  ;;  %v11181_v62 = vld [vmem:[#allocation12 + $0x370] sm:$0xff]   ;;  %v11184_v9 = vld [vmem:[#allocation12 + $0x2f8] sm:$0xff]  }
 0x290   :  { %v5138_v10 = vpack.c.bf16 %v5090_v63, %v5090_v63  ;;  %10557 = vmatprep.subr.bf16.mxu1 %v11160_v50  ;;  %v5144_v12 = vpack.c.bf16 %v5096_v8, %v5096_v8  ;;  %10579 = vmatprep.subr.bf16.mxu0 %v11161_v42  ;;  %v11179_v42 = vld [vmem:[#allocation12 + $0x328] sm:$0xff]   ;;  %v11183_v8 = vld [vmem:[#allocation12 + $0x330] sm:$0xff]  }
 0x291   :  { %v5233_v11 = vrot.slane %v5137_v6, 4  ;;  %v5239_v48 = vrot.slane %v5143_v49, 4  ;;  %v11185_v49 = vld [vmem:[#allocation12 + $0x378] sm:$0xff]  }
 0x292   :  { %v5234_v13 = vrot.slane %v5138_v10, 4  ;;  %10558 = vmatpush3.bf16.msra.mxu1 %v11162_v60  ;;  %v5240_v15 = vrot.slane %v5144_v12, 4  ;;  %v11180_v60 = vld [vmem:[#allocation12 + $0x2f0] sm:$0xff]   ;;  %v11186_v10 = vld [vmem:[#allocation12 + $0x2b8] sm:$0xff]   ;;  %v2982_v12 = vrot.slane %v12189_v44, %v12016_v33 }
 0x293   :  { %5329 = vst [vmem:[#allocation2 + $0x70] sm:$0xf0] %v5233_v11  ;;  %10580 = vmatpush3.bf16.msra.mxu0 %v11163_v2  ;;  %10559 = vmatprep.subr.bf16.mxu1 %v11164_v3  ;;  %5335 = vst [vmem:[#allocation2 + $0xa0] sm:$0xf0] %v5239_v48  ;;  %v11187_v11 = vld [vmem:[#allocation12 + $0x338] sm:$0xff]   ;;  %v11188_v48 = vld [vmem:[#allocation12 + $0x3c0] sm:$0xff]  }
 0x294   :  { %5330 = vst [vmem:[#allocation2 + $0x78] sm:$0xf0] %v5234_v13  ;;  %10581 = vmatprep.subr.bf16.mxu0 %v11165_v43  ;;  %5336 = vst [vmem:[#allocation2 + $0xa8] sm:$0xf0] %v5240_v15  ;;  %v3006_v13 = vrot.slane %v12207_v19, %v11970_v31  ;;  %v3010_v15 = vrot.slane %v12207_v19, %v11973_v38 }
 0x296   :  { %10560 = vmatpush3.bf16.msra.mxu1 %v11166_v1  ;;  %v2986_v1 = vrot.slane %v12189_v44, %v12019_v34 }
 0x297   :  { %10582 = vmatpush3.bf16.msra.mxu0 %v11167_v14  ;;  %10561 = vmatprep.subr.bf16.mxu1 %v11168_v16  ;;  %v11189_v14 = vld [vmem:[#allocation12 + $0x440] sm:$0xff]  }
 0x298   :  { %10583 = vmatprep.subr.bf16.mxu0 %v11169_v18  ;;  %v11190_v18 = vld [vmem:[#allocation12 + $0x380] sm:$0xff]  }
 0x29a   :  { %10562 = vmatpush3.bf16.msra.mxu1 %v11170_v0  ;;  %v4494_v30 = vpop.f32.mrb[68].mxu1  ;;  %v4617_v37 = vpop.f32.mrb[68].mxu0 }
 0x29b   :  { %10584 = vmatpush3.bf16.msra.mxu0 %v11171_v20  ;;  %v4495_v36 = vadd.f32 %v4494_v30, %v2966_v57  ;;  %v4496_v39 = vpop.f32.mrb[69].mxu1  ;;  %10563 = vmatprep.subr.bf16.mxu1 %v11172_v21  ;;  %v4618_v45 = vadd.f32 %v4617_v37, %v2990_v25  ;;  %v4619_v47 = vpop.f32.mrb[69].mxu0  ;;  %v11191_v21 = vld [vmem:[#allocation12 + $0x400] sm:$0xff]   ;;  %v11192_v30 = vld [vmem:[#allocation12 + $0x3c8] sm:$0xff]   ;;  %v5375_v37 = vld [vmem:[#allocation2 + $0x60] sm:$0xff] }
 0x29c   :  { %v4497_v46 = vadd.f32 %v4496_v39, %v2970_v26  ;;  %10585 = vmatprep.subr.bf16.mxu0 %v11173_v27  ;;  %v4498_v17 = vpop.f32.mrb[70].mxu1  ;;  %v4620_v51 = vadd.f32 %v4619_v47, %v2994_v28  ;;  %v4621_v52 = vpop.f32.mrb[70].mxu0  ;;  %v5373_v28 = vld [vmem:[#allocation2 + $0x50] sm:$0xff]  ;;  %v5378_v47 = vld [vmem:[#allocation2 + $0x78] sm:$0xff] }
 0x29d   :  { %v5093_v50 = vmax.f32 %v4495_v36, 0.0  ;;  %v4499_v53 = vpop.f32.mrb[71].mxu1  ;;  %v5099_v54 = vmax.f32 %v4618_v45, 0.0  ;;  %v4622_v56 = vpop.f32.mrb[71].mxu0  ;;  %v11193_v39 = vld [vmem:[#allocation12 + $0x448] sm:$0xff]   ;;  %v5380_v52 = vld [vmem:[#allocation2 + $0x88] sm:$0xff] }
 0x29e   :  { %v5094_v7 = vmax.f32 %v4497_v46, 0.0  ;;  %10564 = vmatpush3.bf16.msra.mxu1 %v11174_v35  ;;  %v5100_v59 = vmax.f32 %v4620_v51, 0.0  ;;  %v11195_v53 = vld [vmem:[#allocation12 + $0x408] sm:$0xff]   ;;  %v11197_v56 = vld [vmem:[#allocation12 + $0x450] sm:$0xff]  }
 0x29f   :  { %v5141_v58 = vpack.c.bf16 %v5093_v50, %v5093_v50  ;;  %10586 = vmatpush3.bf16.msra.mxu0 %v11175_v40  ;;  %10565 = vmatprep.subr.bf16.mxu1 %v11176_v41  ;;  %v5147_v29 = vpack.c.bf16 %v5099_v54, %v5099_v54  ;;  %v11196_v54 = vld [vmem:[#allocation12 + $0x3d0] sm:$0xff]  }
 0x2a0   :  { %v5142_v61 = vpack.c.bf16 %v5094_v7, %v5094_v7  ;;  %10587 = vmatprep.subr.bf16.mxu0 %v11177_v4  ;;  %v5148_v2 = vpack.c.bf16 %v5100_v59, %v5100_v59  ;;  %v11194_v4 = vld [vmem:[#allocation12 + $0x388] sm:$0xff]  }
 0x2a1   :  { %v5237_v63 = vrot.slane %v5141_v58, 4  ;;  %v5243_v3 = vrot.slane %v5147_v29, 4  ;;  %v11198_v29 = vld [vmem:[#allocation12 + $0x390] sm:$0xff]  }
 0x2a2   :  { %v5238_v43 = vrot.slane %v5142_v61, 4  ;;  %10566 = vmatpush3.bf16.msra.mxu1 %v11178_v55  ;;  %v5244_v6 = vrot.slane %v5148_v2, 4  ;;  %v11201_v2 = vld [vmem:[#allocation12 + $0x458] sm:$0xff]  }
 0x2a3   :  { %5333 = vst [vmem:[#allocation2 + $0x90] sm:$0xf0] %v5237_v63  ;;  %10588 = vmatpush3.bf16.msra.mxu0 %v11179_v42  ;;  %10567 = vmatprep.subr.bf16.mxu1 %v11180_v60  ;;  %5339 = vst [vmem:[#allocation2 + $0xc0] sm:$0xf0] %v5243_v3  ;;  %v11200_v63 = vld [vmem:[#allocation12 + $0x3d8] sm:$0xff]   ;;  %v12225_v3 = vld [vmem:[#allocation11 + $0x20] sm:$0xff] }
 0x2a4   :  { %5334 = vst [vmem:[#allocation2 + $0x98] sm:$0xf0] %v5238_v43  ;;  %10589 = vmatprep.subr.bf16.mxu0 %v11181_v62  ;;  %5340 = vst [vmem:[#allocation2 + $0xc8] sm:$0xf0] %v5244_v6  ;;  %v11199_v62 = vld [vmem:[#allocation12 + $0x410] sm:$0xff]   ;;  %v11202_v43 = vld [vmem:[#allocation12 + $0x398] sm:$0xff]   ;;  %v2998_v6 = vrot.slane %v12207_v19, %v11990_v22 }
 0x2a6   :  { %10568 = vmatpush3.bf16.msra.mxu1 %v11182_v5  ;;  %v11203_v5 = vld [vmem:[#allocation12 + $0x418] sm:$0xff]  }
 0x2a7   :  { %10590 = vmatpush3.bf16.msra.mxu0 %v11183_v8  ;;  %10569 = vmatprep.subr.bf16.mxu1 %v11184_v9  ;;  %v11204_v8 = vld [vmem:[#allocation12 + $0x3e0] sm:$0xff]   ;;  %v3022_v9 = vrot.slane %v12225_v3, %v11962_v23 }
 0x2a8   :  { %10591 = vmatprep.subr.bf16.mxu0 %v11185_v49  ;;  %v3002_v49 = vrot.slane %v12207_v19, %v11993_v32 }
 0x2aa   :  { %10570 = vmatpush3.bf16.msra.mxu1 %v11186_v10  ;;  %v4576_v16 = vpop.f32.mrb[72].mxu1  ;;  %v4699_v20 = vpop.f32.mrb[72].mxu0  ;;  %v11205_v10 = vld [vmem:[#allocation12 + $0x460] sm:$0xff]  }
 0x2ab   :  { %10592 = vmatpush3.bf16.msra.mxu0 %v11187_v11  ;;  %v4577_v0 = vadd.f32 %v4576_v16, %v2982_v12  ;;  %v4578_v57 = vpop.f32.mrb[73].mxu1  ;;  %10599 = vmatprep.subr.bf16.mxu1 %v11188_v48  ;;  %v4700_v25 = vadd.f32 %v4699_v20, %v3006_v13  ;;  %v4701_v27 = vpop.f32.mrb[73].mxu0  ;;  %v3026_v11 = vrot.slane %v12225_v3, %v11965_v24  ;;  %v11206_v48 = vld [vmem:[#allocation12 + $0x3a0] sm:$0xff]   ;;  %v11208_v16 = vld [vmem:[#allocation12 + $0x3e8] sm:$0xff]  }
 0x2ac   :  { %v4579_v26 = vadd.f32 %v4578_v57, %v2986_v1  ;;  %10621 = vmatprep.subr.bf16.mxu0 %v11189_v14  ;;  %v4580_v44 = vpop.f32.mrb[74].mxu1  ;;  %v4702_v36 = vadd.f32 %v4701_v27, %v3010_v15  ;;  %v4703_v40 = vpop.f32.mrb[74].mxu0  ;;  %v11207_v15 = vld [vmem:[#allocation12 + $0x420] sm:$0xff]   ;;  %v11209_v57 = vld [vmem:[#allocation12 + $0x468] sm:$0xff]  }
 0x2ad   :  { %v5097_v35 = vmax.f32 %v4577_v0, 0.0  ;;  %8728 = vmatmul.mubr.bf16.vlgmr.msra.gmra.mrb[108].mxu1 %v5373_v28  ;;  %v4581_v41 = vpop.f32.mrb[75].mxu1  ;;  %v5103_v45 = vmax.f32 %v4700_v25, 0.0  ;;  %v4704_v17 = vpop.f32.mrb[75].mxu0  ;;  %v11211_v40 = vld [vmem:[#allocation12 + $0x428] sm:$0xff]  }
 0x2ae   :  { %v5098_v46 = vmax.f32 %v4579_v26, 0.0  ;;  %8769 = vmatmul.mubr.bf16.vlgmr.msra.gmra.mrb[104].mxu0 %v5375_v37  ;;  %10600 = vmatpush3.bf16.msra.mxu1 %v11190_v18  ;;  %v5104_v51 = vmax.f32 %v4702_v36, 0.0  ;;  %v11212_v41 = vld [vmem:[#allocation12 + $0x3f0] sm:$0xff]  }
 0x2af   :  { %v5145_v50 = vpack.c.bf16 %v5097_v35, %v5097_v35  ;;  %8809 = vmatprep.mubr.bf16.mxu1 %v5378_v47  ;;  %10622 = vmatpush3.bf16.msra.mxu0 %v11191_v21  ;;  %v5151_v7 = vpack.c.bf16 %v5103_v45, %v5103_v45  ;;  %v11210_v35 = vld [vmem:[#allocation12 + $0x3a8] sm:$0xff]   ;;  %v11213_v47 = vld [vmem:[#allocation12 + $0x470] sm:$0xff]  }
 0x2b0   :  { %v5146_v55 = vpack.c.bf16 %v5098_v46, %v5098_v46  ;;  %8850 = vmatprep.mubr.bf16.mxu0 %v5380_v52  ;;  %10601 = vmatprep.subr.bf16.mxu1 %v11192_v30  ;;  %v5152_v59 = vpack.c.bf16 %v5104_v51, %v5104_v51  ;;  %v11214_v52 = vld [vmem:[#allocation12 + $0x3b0] sm:$0xff]  }
 0x2b1   :  { %v5241_v58 = vrot.slane %v5145_v50, 4  ;;  %10623 = vmatprep.subr.bf16.mxu0 %v11193_v39  ;;  %v5247_v42 = vrot.slane %v5151_v7, 4  ;;  %v11216_v7 = vld [vmem:[#allocation12 + $0x3f8] sm:$0xff]  }
 0x2b2   :  { %v5242_v60 = vrot.slane %v5146_v55, 4  ;;  %10602 = vmatpush3.bf16.msra.mxu1 %v11194_v4  ;;  %v5248_v61 = vrot.slane %v5152_v59, 4  ;;  %v11217_v55 = vld [vmem:[#allocation12 + $0x478] sm:$0xff]   ;;  %v3014_v59 = vrot.slane %v12207_v19, %v12016_v33 }
 0x2b3   :  { %5337 = vst [vmem:[#allocation2 + $0xb0] sm:$0xf0] %v5241_v58  ;;  %10624 = vmatpush3.bf16.msra.mxu0 %v11195_v53  ;;  %10603 = vmatprep.subr.bf16.mxu1 %v11196_v54  ;;  %5343 = vst [vmem:[#allocation2 + $0xe0] sm:$0xf0] %v5247_v42  ;;  %v11215_v54 = vld [vmem:[#allocation12 + $0x430] sm:$0xff]   ;;  %v11219_v58 = vld [vmem:[#allocation12 + $0x438] sm:$0xff]  }
 0x2b4   :  { %5338 = vst [vmem:[#allocation2 + $0xb8] sm:$0xf0] %v5242_v60  ;;  %10625 = vmatprep.subr.bf16.mxu0 %v11197_v56  ;;  %5344 = vst [vmem:[#allocation2 + $0xe8] sm:$0xf0] %v5248_v61  ;;  %v11218_v56 = vld [vmem:[#allocation12 + $0x3b8] sm:$0xff]   ;;  %v11220_v42 = vld [vmem:[#allocation12 + $0x4c0] sm:$0xff]   ;;  %v3038_v60 = vrot.slane %v12225_v3, %v11970_v31 }
 0x2b5   :  { %v11221_v61 = vld [vmem:[#allocation12 + $0x540] sm:$0xff]  }
 0x2b6   :  { %10604 = vmatpush3.bf16.msra.mxu1 %v11198_v29  ;;  %v3018_v29 = vrot.slane %v12207_v19, %v12019_v34 }
 0x2b7   :  { %10626 = vmatpush3.bf16.msra.mxu0 %v11199_v62  ;;  %10605 = vmatprep.subr.bf16.mxu1 %v11200_v63  ;;  %v3042_v62 = vrot.slane %v12225_v3, %v11973_v38 }
 0x2b8   :  { %10627 = vmatprep.subr.bf16.mxu0 %v11201_v2  ;;  %v11222_v2 = vld [vmem:[#allocation12 + $0x480] sm:$0xff]  }
 0x2ba   :  { %10606 = vmatpush3.bf16.msra.mxu1 %v11202_v43  ;;  %v4658_v12 = vpop.f32.mrb[76].mxu1  ;;  %v4781_v1 = vpop.f32.mrb[76].mxu0 }
 0x2bb   :  { %10628 = vmatpush3.bf16.msra.mxu0 %v11203_v5  ;;  %v4659_v13 = vadd.f32 %v4658_v12, %v2998_v6  ;;  %v4660_v14 = vpop.f32.mrb[77].mxu1  ;;  %10607 = vmatprep.subr.bf16.mxu1 %v11204_v8  ;;  %v4782_v18 = vadd.f32 %v4781_v1, %v3022_v9  ;;  %v4783_v20 = vpop.f32.mrb[77].mxu0  ;;  %v11223_v8 = vld [vmem:[#allocation12 + $0x500] sm:$0xff]   ;;  %v11224_v12 = vld [vmem:[#allocation12 + $0x4c8] sm:$0xff]   ;;  %v5379_v1 = vld [vmem:[#allocation2 + $0x80] sm:$0xff] }
 0x2bc   :  { %v4661_v0 = vadd.f32 %v4660_v14, %v3002_v49  ;;  %10629 = vmatprep.subr.bf16.mxu0 %v11205_v10  ;;  %v4662_v21 = vpop.f32.mrb[78].mxu1  ;;  %v4784_v26 = vadd.f32 %v4783_v20, %v3026_v11  ;;  %v4785_v27 = vpop.f32.mrb[78].mxu0  ;;  %v5377_v11 = vld [vmem:[#allocation2 + $0x70] sm:$0xff]  ;;  %v5382_v20 = vld [vmem:[#allocation2 + $0x98] sm:$0xff] }
 0x2bd   :  { %v5101_v25 = vmax.f32 %v4659_v13, 0.0  ;;  %v4663_v28 = vpop.f32.mrb[79].mxu1  ;;  %v5107_v30 = vmax.f32 %v4782_v18, 0.0  ;;  %v4786_v36 = vpop.f32.mrb[79].mxu0  ;;  %v11225_v14 = vld [vmem:[#allocation12 + $0x548] sm:$0xff]   ;;  %v5384_v27 = vld [vmem:[#allocation2 + $0xa8] sm:$0xff] }
 0x2be   :  { %v5102_v44 = vmax.f32 %v4661_v0, 0.0  ;;  %10608 = vmatpush3.bf16.msra.mxu1 %v11206_v48  ;;  %v5108_v39 = vmax.f32 %v4784_v26, 0.0  ;;  %v11227_v28 = vld [vmem:[#allocation12 + $0x508] sm:$0xff]   ;;  %v11229_v36 = vld [vmem:[#allocation12 + $0x550] sm:$0xff]  }
 0x2bf   :  { %v5149_v37 = vpack.c.bf16 %v5101_v25, %v5101_v25  ;;  %10630 = vmatpush3.bf16.msra.mxu0 %v11207_v15  ;;  %10609 = vmatprep.subr.bf16.mxu1 %v11208_v16  ;;  %v5155_v45 = vpack.c.bf16 %v5107_v30, %v5107_v30  ;;  %v11228_v30 = vld [vmem:[#allocation12 + $0x4d0] sm:$0xff]  }
 0x2c0   :  { %v5150_v46 = vpack.c.bf16 %v5102_v44, %v5102_v44  ;;  %10631 = vmatprep.subr.bf16.mxu0 %v11209_v57  ;;  %v5156_v17 = vpack.c.bf16 %v5108_v39, %v5108_v39  ;;  %v11226_v57 = vld [vmem:[#allocation12 + $0x488] sm:$0xff]  }
 0x2c1   :  { %v5245_v4 = vrot.slane %v5149_v37, 4  ;;  %v5251_v50 = vrot.slane %v5155_v45, 4  ;;  %v11230_v45 = vld [vmem:[#allocation12 + $0x490] sm:$0xff]  }
 0x2c2   :  { %v5246_v51 = vrot.slane %v5150_v46, 4  ;;  %10610 = vmatpush3.bf16.msra.mxu1 %v11210_v35  ;;  %v5252_v53 = vrot.slane %v5156_v17, 4  ;;  %v11233_v17 = vld [vmem:[#allocation12 + $0x558] sm:$0xff]  }
 0x2c3   :  { %5341 = vst [vmem:[#allocation2 + $0xd0] sm:$0xf0] %v5245_v4  ;;  %10632 = vmatpush3.bf16.msra.mxu0 %v11211_v40  ;;  %10611 = vmatprep.subr.bf16.mxu1 %v11212_v41  ;;  %5347 = vst [vmem:[#allocation2 + $0x100] sm:$0xf0] %v5251_v50  ;;  %v11232_v4 = vld [vmem:[#allocation12 + $0x4d8] sm:$0xff]  }
 0x2c4   :  { %5342 = vst [vmem:[#allocation2 + $0xd8] sm:$0xf0] %v5246_v51  ;;  %10633 = vmatprep.subr.bf16.mxu0 %v11213_v47  ;;  %5348 = vst [vmem:[#allocation2 + $0x108] sm:$0xf0] %v5252_v53  ;;  %v11231_v47 = vld [vmem:[#allocation12 + $0x510] sm:$0xff]   ;;  %v12243_v50 = vld [vmem:[#allocation11 + $0x28] sm:$0xff]  ;;  %v3030_v53 = vrot.slane %v12225_v3, %v11990_v22 }
 0x2c5   :  { %v11234_v51 = vld [vmem:[#allocation12 + $0x498] sm:$0xff]  }
 0x2c6   :  { %10612 = vmatpush3.bf16.msra.mxu1 %v11214_v52  ;;  %v11235_v52 = vld [vmem:[#allocation12 + $0x518] sm:$0xff]  }
 0x2c7   :  { %10634 = vmatpush3.bf16.msra.mxu0 %v11215_v54  ;;  %10613 = vmatprep.subr.bf16.mxu1 %v11216_v7  ;;  %v11236_v54 = vld [vmem:[#allocation12 + $0x4e0] sm:$0xff]   ;;  %v3054_v7 = vrot.slane %v12243_v50, %v11962_v23 }
 0x2c8   :  { %10635 = vmatprep.subr.bf16.mxu0 %v11217_v55  ;;  %v3034_v55 = vrot.slane %v12225_v3, %v11993_v32 }
 0x2ca   :  { %10614 = vmatpush3.bf16.msra.mxu1 %v11218_v56  ;;  %v4740_v63 = vpop.f32.mrb[80].mxu1  ;;  %v4863_v5 = vpop.f32.mrb[80].mxu0  ;;  %v11237_v56 = vld [vmem:[#allocation12 + $0x560] sm:$0xff]  }
 0x2cb   :  { %10636 = vmatpush3.bf16.msra.mxu0 %v11219_v58  ;;  %v4741_v43 = vadd.f32 %v4740_v63, %v3014_v59  ;;  %v4742_v6 = vpop.f32.mrb[81].mxu1  ;;  %10643 = vmatprep.subr.bf16.mxu1 %v11220_v42  ;;  %v4864_v9 = vadd.f32 %v4863_v5, %v3038_v60  ;;  %v4865_v10 = vpop.f32.mrb[81].mxu0  ;;  %v3058_v58 = vrot.slane %v12243_v50, %v11965_v24  ;;  %v11238_v42 = vld [vmem:[#allocation12 + $0x4a0] sm:$0xff]   ;;  %v11240_v63 = vld [vmem:[#allocation12 + $0x4e8] sm:$0xff]  }
 0x2cc   :  { %v4743_v49 = vadd.f32 %v4742_v6, %v3018_v29  ;;  %10665 = vmatprep.subr.bf16.mxu0 %v11221_v61  ;;  %v4744_v19 = vpop.f32.mrb[82].mxu1  ;;  %v4866_v13 = vadd.f32 %v4865_v10, %v3042_v62  ;;  %v4867_v15 = vpop.f32.mrb[82].mxu0  ;;  %v11239_v62 = vld [vmem:[#allocation12 + $0x520] sm:$0xff]   ;;  %v11241_v5 = vld [vmem:[#allocation12 + $0x568] sm:$0xff]  }
 0x2cd   :  { %v5105_v48 = vmax.f32 %v4741_v43, 0.0  ;;  %8810 = vmatmul.mubr.bf16.vlgmr.msra.gmra.mrb[112].mxu1 %v5377_v11  ;;  %v4745_v16 = vpop.f32.mrb[83].mxu1  ;;  %v5111_v18 = vmax.f32 %v4864_v9, 0.0  ;;  %v4868_v21 = vpop.f32.mrb[83].mxu0 }
 0x2ce   :  { %v5106_v0 = vmax.f32 %v4743_v49, 0.0  ;;  %8851 = vmatmul.mubr.bf16.vlgmr.msra.gmra.mrb[108].mxu0 %v5379_v1  ;;  %10644 = vmatpush3.bf16.msra.mxu1 %v11222_v2  ;;  %v5112_v26 = vmax.f32 %v4866_v13, 0.0  ;;  %v11243_v1 = vld [vmem:[#allocation12 + $0x528] sm:$0xff]  }
 0x2cf   :  { %v5153_v25 = vpack.c.bf16 %v5105_v48, %v5105_v48  ;;  %8891 = vmatprep.mubr.bf16.mxu1 %v5382_v20  ;;  %10666 = vmatpush3.bf16.msra.mxu0 %v11223_v8  ;;  %v5159_v44 = vpack.c.bf16 %v5111_v18, %v5111_v18  ;;  %v11245_v18 = vld [vmem:[#allocation12 + $0x570] sm:$0xff]  }
 0x2d0   :  { %v5154_v35 = vpack.c.bf16 %v5106_v0, %v5106_v0  ;;  %8932 = vmatprep.mubr.bf16.mxu0 %v5384_v27  ;;  %10645 = vmatprep.subr.bf16.mxu1 %v11224_v12  ;;  %v5160_v39 = vpack.c.bf16 %v5112_v26, %v5112_v26  ;;  %v11242_v12 = vld [vmem:[#allocation12 + $0x4a8] sm:$0xff]   ;;  %v11247_v27 = vld [vmem:[#allocation12 + $0x530] sm:$0xff]  }
 0x2d1   :  { %v5249_v37 = vrot.slane %v5153_v25, 4  ;;  %10667 = vmatprep.subr.bf16.mxu0 %v11225_v14  ;;  %v5255_v40 = vrot.slane %v5159_v44, 4  ;;  %v11244_v14 = vld [vmem:[#allocation12 + $0x4f0] sm:$0xff]   ;;  %v11250_v44 = vld [vmem:[#allocation12 + $0x4b8] sm:$0xff]  }
 0x2d2   :  { %v5250_v41 = vrot.slane %v5154_v35, 4  ;;  %10646 = vmatpush3.bf16.msra.mxu1 %v11226_v57  ;;  %v5256_v46 = vrot.slane %v5160_v39, 4  ;;  %v11246_v25 = vld [vmem:[#allocation12 + $0x4b0] sm:$0xff]   ;;  %v11251_v35 = vld [vmem:[#allocation12 + $0x538] sm:$0xff]   ;;  %v3070_v39 = vrot.slane %v12243_v50, %v11970_v31  ;;  %v5381_v31 = vld [vmem:[#allocation2 + $0x90] sm:$0xff] }
 0x2d3   :  { %5345 = vst [vmem:[#allocation2 + $0xf0] sm:$0xf0] %v5249_v37  ;;  %10668 = vmatpush3.bf16.msra.mxu0 %v11227_v28  ;;  %10647 = vmatprep.subr.bf16.mxu1 %v11228_v30  ;;  %5351 = vst [vmem:[#allocation2 + $0x120] sm:$0xf0] %v5255_v40  ;;  %v11248_v28 = vld [vmem:[#allocation12 + $0x4f8] sm:$0xff]   ;;  %v11252_v37 = vld [vmem:[#allocation12 + $0x5c0] sm:$0xff]   ;;  %v3050_v40 = vrot.slane %v12225_v3, %v12019_v34 }
 0x2d4   :  { %5346 = vst [vmem:[#allocation2 + $0xf8] sm:$0xf0] %v5250_v41  ;;  %10669 = vmatprep.subr.bf16.mxu0 %v11229_v36  ;;  %5352 = vst [vmem:[#allocation2 + $0x128] sm:$0xf0] %v5256_v46  ;;  %v11249_v30 = vld [vmem:[#allocation12 + $0x578] sm:$0xff]   ;;  %v3046_v36 = vrot.slane %v12225_v3, %v12016_v33  ;;  %v11253_v41 = vld [vmem:[#allocation12 + $0x640] sm:$0xff]  }
 0x2d6   :  { %10648 = vmatpush3.bf16.msra.mxu1 %v11230_v45  ;;  %v3074_v45 = vrot.slane %v12243_v50, %v11973_v38  ;;  %v5383_v38 = vld [vmem:[#allocation2 + $0xa0] sm:$0xff] }
 0x2d7   :  { %10670 = vmatpush3.bf16.msra.mxu0 %v11231_v47  ;;  %10649 = vmatprep.subr.bf16.mxu1 %v11232_v4  ;;  %v11254_v47 = vld [vmem:[#allocation12 + $0x580] sm:$0xff]  }
 0x2d8   :  { %10671 = vmatprep.subr.bf16.mxu0 %v11233_v17 }
 0x2da   :  { %10650 = vmatpush3.bf16.msra.mxu1 %v11234_v51  ;;  %v4822_v59 = vpop.f32.mrb[84].mxu1  ;;  %v4945_v29 = vpop.f32.mrb[84].mxu0 }
 0x2db   :  { %10672 = vmatpush3.bf16.msra.mxu0 %v11235_v52  ;;  %v4823_v60 = vadd.f32 %v4822_v59, %v3030_v53  ;;  %v4824_v61 = vpop.f32.mrb[85].mxu1  ;;  %10651 = vmatprep.subr.bf16.mxu1 %v11236_v54  ;;  %v4946_v2 = vadd.f32 %v4945_v29, %v3054_v7  ;;  %v4947_v23 = vpop.f32.mrb[85].mxu0  ;;  %v11255_v52 = vld [vmem:[#allocation12 + $0x600] sm:$0xff]   ;;  %v11257_v59 = vld [vmem:[#allocation12 + $0x648] sm:$0xff]  }
 0x2dc   :  { %v4825_v43 = vadd.f32 %v4824_v61, %v3034_v55  ;;  %10673 = vmatprep.subr.bf16.mxu0 %v11237_v56  ;;  %v4826_v6 = vpop.f32.mrb[86].mxu1  ;;  %v4948_v9 = vadd.f32 %v4947_v23, %v3058_v58  ;;  %v4949_v49 = vpop.f32.mrb[86].mxu0  ;;  %v11256_v55 = vld [vmem:[#allocation12 + $0x5c8] sm:$0xff]  }
 0x2dd   :  { %v5109_v8 = vmax.f32 %v4823_v60, 0.0  ;;  %v4827_v24 = vpop.f32.mrb[87].mxu1  ;;  %v5115_v10 = vmax.f32 %v4946_v2, 0.0  ;;  %v4950_v19 = vpop.f32.mrb[87].mxu0  ;;  %v11259_v6 = vld [vmem:[#allocation12 + $0x608] sm:$0xff]  }
 0x2de   :  { %v5110_v11 = vmax.f32 %v4825_v43, 0.0  ;;  %10652 = vmatpush3.bf16.msra.mxu1 %v11238_v42  ;;  %v5116_v13 = vmax.f32 %v4948_v9, 0.0  ;;  %v11261_v24 = vld [vmem:[#allocation12 + $0x650] sm:$0xff]  }
 0x2df   :  { %v5157_v48 = vpack.c.bf16 %v5109_v8, %v5109_v8  ;;  %10674 = vmatpush3.bf16.msra.mxu0 %v11239_v62  ;;  %10653 = vmatprep.subr.bf16.mxu1 %v11240_v63  ;;  %v5163_v15 = vpack.c.bf16 %v5115_v10, %v5115_v10  ;;  %v5386_v62 = vld [vmem:[#allocation2 + $0xb8] sm:$0xff]  ;;  %v11258_v63 = vld [vmem:[#allocation12 + $0x588] sm:$0xff]  }
 0x2e0   :  { %v5158_v16 = vpack.c.bf16 %v5110_v11, %v5110_v11  ;;  %10675 = vmatprep.subr.bf16.mxu0 %v11241_v5  ;;  %v5164_v20 = vpack.c.bf16 %v5116_v13, %v5116_v13  ;;  %v5388_v5 = vld [vmem:[#allocation2 + $0xc8] sm:$0xff]  ;;  %v11260_v8 = vld [vmem:[#allocation12 + $0x5d0] sm:$0xff]  }
 0x2e1   :  { %v5253_v0 = vrot.slane %v5157_v48, 4  ;;  %v5259_v57 = vrot.slane %v5163_v15, 4  ;;  %v11262_v48 = vld [vmem:[#allocation12 + $0x590] sm:$0xff]   ;;  %v11265_v15 = vld [vmem:[#allocation12 + $0x658] sm:$0xff]  }
 0x2e2   :  { %v5254_v21 = vrot.slane %v5158_v16, 4  ;;  %10654 = vmatpush3.bf16.msra.mxu1 %v11242_v12  ;;  %v5260_v26 = vrot.slane %v5164_v20, 4  ;;  %v11266_v16 = vld [vmem:[#allocation12 + $0x598] sm:$0xff]   ;;  %v11268_v20 = vld [vmem:[#allocation12 + $0x5e0] sm:$0xff]  }
 0x2e3   :  { %5349 = vst [vmem:[#allocation2 + $0x110] sm:$0xf0] %v5253_v0  ;;  %10676 = vmatpush3.bf16.msra.mxu0 %v11243_v1  ;;  %10655 = vmatprep.subr.bf16.mxu1 %v11244_v14  ;;  %5355 = vst [vmem:[#allocation2 + $0x140] sm:$0xf0] %v5259_v57  ;;  %v11263_v1 = vld [vmem:[#allocation12 + $0x610] sm:$0xff]   ;;  %v11264_v14 = vld [vmem:[#allocation12 + $0x5d8] sm:$0xff]   ;;  %v3062_v0 = vrot.slane %v12243_v50, %v11990_v22  ;;  %v3066_v57 = vrot.slane %v12243_v50, %v11993_v32 }
 0x2e4   :  { %5350 = vst [vmem:[#allocation2 + $0x118] sm:$0xf0] %v5254_v21  ;;  %10677 = vmatprep.subr.bf16.mxu0 %v11245_v18  ;;  %5356 = vst [vmem:[#allocation2 + $0x148] sm:$0xf0] %v5260_v26  ;;  %v11267_v18 = vld [vmem:[#allocation12 + $0x618] sm:$0xff]   ;;  %v11269_v21 = vld [vmem:[#allocation12 + $0x660] sm:$0xff]  }
 0x2e5   :  { %v11270_v26 = vld [vmem:[#allocation12 + $0x5a0] sm:$0xff]  }
 0x2e6   :  { %10656 = vmatpush3.bf16.msra.mxu1 %v11246_v25 }
 0x2e7   :  { %10678 = vmatpush3.bf16.msra.mxu0 %v11247_v27  ;;  %10657 = vmatprep.subr.bf16.mxu1 %v11248_v28 }
 0x2e8   :  { %10679 = vmatprep.subr.bf16.mxu0 %v11249_v30  ;;  %v11271_v30 = vld [vmem:[#allocation12 + $0x620] sm:$0xff]  }
 0x2ea   :  { %10658 = vmatpush3.bf16.msra.mxu1 %v11250_v44  ;;  %v4904_v46 = vpop.f32.mrb[88].mxu1  ;;  %v5027_v17 = vpop.f32.mrb[88].mxu0  ;;  %v11272_v44 = vld [vmem:[#allocation12 + $0x5e8] sm:$0xff]  }
 0x2eb   :  { %10680 = vmatpush3.bf16.msra.mxu0 %v11251_v35  ;;  %v4905_v4 = vadd.f32 %v4904_v46, %v3046_v36  ;;  %v4906_v51 = vpop.f32.mrb[89].mxu1  ;;  %10687 = vmatprep.subr.bf16.mxu1 %v11252_v37  ;;  %v5028_v53 = vadd.f32 %v5027_v17, %v3070_v39  ;;  %v5029_v7 = vpop.f32.mrb[89].mxu0  ;;  %v11273_v36 = vld [vmem:[#allocation12 + $0x668] sm:$0xff]   ;;  %v11276_v46 = vld [vmem:[#allocation12 + $0x5f0] sm:$0xff]  }
 0x2ec   :  { %v4907_v54 = vadd.f32 %v4906_v51, %v3050_v40  ;;  %10709 = vmatprep.subr.bf16.mxu0 %v11253_v41  ;;  %v4908_v3 = vpop.f32.mrb[90].mxu1  ;;  %v5030_v58 = vadd.f32 %v5029_v7, %v3074_v45  ;;  %v5031_v60 = vpop.f32.mrb[90].mxu0  ;;  %v11274_v41 = vld [vmem:[#allocation12 + $0x5a8] sm:$0xff]   ;;  %v11281_v7 = vld [vmem:[#allocation12 + $0x678] sm:$0xff]  }
 0x2ed   :  { %v5113_v56 = vmax.f32 %v4905_v4, 0.0  ;;  %8892 = vmatmul.mubr.bf16.vlgmr.msra.gmra.mrb[116].mxu1 %v5381_v31  ;;  %v4909_v42 = vpop.f32.mrb[91].mxu1  ;;  %v5119_v29 = vmax.f32 %v5028_v53, 0.0  ;;  %v5032_v2 = vpop.f32.mrb[91].mxu0  ;;  %v11275_v45 = vld [vmem:[#allocation12 + $0x628] sm:$0xff]   ;;  %v11277_v4 = vld [vmem:[#allocation12 + $0x670] sm:$0xff]   ;;  %v3078_v3 = vrot.slane %v12243_v50, %v12016_v33 }
 0x2ee   :  { %v5114_v61 = vmax.f32 %v4907_v54, 0.0  ;;  %8933 = vmatmul.mubr.bf16.vlgmr.msra.gmra.mrb[112].mxu0 %v5383_v38  ;;  %10688 = vmatpush3.bf16.msra.mxu1 %v11254_v47  ;;  %v5120_v23 = vmax.f32 %v5030_v58, 0.0  ;;  %v11279_v53 = vld [vmem:[#allocation12 + $0x630] sm:$0xff]   ;;  %v11280_v54 = vld [vmem:[#allocation12 + $0x5f8] sm:$0xff]   ;;  %v3082_v58 = vrot.slane %v12243_v50, %v12019_v34  ;;  %v11285_v38 = vld [vmem:[#allocation12 + $0x740] sm:$0xff]  }
 0x2ef   :  { %v5161_v43 = vpack.c.bf16 %v5113_v56, %v5113_v56  ;;  %8973 = vmatprep.mubr.bf16.mxu1 %v5386_v62  ;;  %10710 = vmatpush3.bf16.msra.mxu0 %v11255_v52  ;;  %v5167_v9 = vpack.c.bf16 %v5119_v29, %v5119_v29  ;;  %v11278_v52 = vld [vmem:[#allocation12 + $0x5b0] sm:$0xff]   ;;  %v11282_v31 = vld [vmem:[#allocation12 + $0x5b8] sm:$0xff]   ;;  %v11284_v56 = vld [vmem:[#allocation12 + $0x6c0] sm:$0xff]  }
 0x2f0   :  { %v5162_v49 = vpack.c.bf16 %v5114_v61, %v5114_v61  ;;  %9014 = vmatprep.mubr.bf16.mxu0 %v5388_v5  ;;  %10689 = vmatprep.subr.bf16.mxu1 %v11256_v55  ;;  %v5168_v11 = vpack.c.bf16 %v5120_v23, %v5120_v23  ;;  %v11283_v55 = vld [vmem:[#allocation12 + $0x638] sm:$0xff]   ;;  %v11286_v42 = vld [vmem:[#allocation12 + $0x680] sm:$0xff]   ;;  %v11288_v2 = vld [vmem:[#allocation12 + $0x6c8] sm:$0xff]  }
 0x2f1   :  { %v5257_v10 = vrot.slane %v5161_v43, 4  ;;  %10711 = vmatprep.subr.bf16.mxu0 %v11257_v59  ;;  %v5263_v12 = vrot.slane %v5167_v9, 4  ;;  %v11287_v61 = vld [vmem:[#allocation12 + $0x700] sm:$0xff]   ;;  %v5387_v23 = vld [vmem:[#allocation2 + $0xc0] sm:$0xff]  ;;  %v11289_v5 = vld [vmem:[#allocation12 + $0x748] sm:$0xff]  }
 0x2f2   :  { %v5258_v19 = vrot.slane %v5162_v49, 4  ;;  %10690 = vmatpush3.bf16.msra.mxu1 %v11258_v63  ;;  %v5264_v13 = vrot.slane %v5168_v11, 4  ;;  %v5385_v63 = vld [vmem:[#allocation2 + $0xb0] sm:$0xff]  ;;  %v5390_v50 = vld [vmem:[#allocation2 + $0xd8] sm:$0xff]  ;;  %v5392_v49 = vld [vmem:[#allocation2 + $0xe8] sm:$0xff] }
 0x2f3   :  { %5353 = vst [vmem:[#allocation2 + $0x130] sm:$0xf0] %v5257_v10  ;;  %10712 = vmatpush3.bf16.msra.mxu0 %v11259_v6  ;;  %10691 = vmatprep.subr.bf16.mxu1 %v11260_v8  ;;  %5359 = vst [vmem:[#allocation2 + $0x160] sm:$0xf0] %v5263_v12  ;;  %v11290_v8 = vld [vmem:[#allocation12 + $0x688] sm:$0xff]   ;;  %v11292_v10 = vld [vmem:[#allocation12 + $0x6d0] sm:$0xff]  }
 0x2f4   :  { %5354 = vst [vmem:[#allocation2 + $0x138] sm:$0xf0] %v5258_v19  ;;  %10713 = vmatprep.subr.bf16.mxu0 %v11261_v24  ;;  %5360 = vst [vmem:[#allocation2 + $0x168] sm:$0xf0] %v5264_v13  ;;  %v11291_v24 = vld [vmem:[#allocation12 + $0x708] sm:$0xff]   ;;  %v11293_v12 = vld [vmem:[#allocation12 + $0x750] sm:$0xff]  }
 0x2f5   :  { %v11294_v13 = vld [vmem:[#allocation12 + $0x690] sm:$0xff]  }
 0x2f6   :  { %10692 = vmatpush3.bf16.msra.mxu1 %v11262_v48 }
 0x2f7   :  { %10714 = vmatpush3.bf16.msra.mxu0 %v11263_v1  ;;  %10693 = vmatprep.subr.bf16.mxu1 %v11264_v14  ;;  %v11295_v1 = vld [vmem:[#allocation12 + $0x710] sm:$0xff]   ;;  %v11296_v14 = vld [vmem:[#allocation12 + $0x6d8] sm:$0xff]  }
 0x2f8   :  { %10715 = vmatprep.subr.bf16.mxu0 %v11265_v15  ;;  %v11297_v15 = vld [vmem:[#allocation12 + $0x758] sm:$0xff]  }
 0x2fa   :  { %10694 = vmatpush3.bf16.msra.mxu1 %v11266_v16  ;;  %v4986_v25 = vpop.f32.mrb[92].mxu1  ;;  %v11298_v16 = vld [vmem:[#allocation12 + $0x698] sm:$0xff]  }
 0x2fb   :  { %10716 = vmatpush3.bf16.msra.mxu0 %v11267_v18  ;;  %v4987_v27 = vadd.f32 %v4986_v25, %v3062_v0  ;;  %v4988_v28 = vpop.f32.mrb[93].mxu1  ;;  %10695 = vmatprep.subr.bf16.mxu1 %v11268_v20  ;;  %v11299_v18 = vld [vmem:[#allocation12 + $0x718] sm:$0xff]   ;;  %v11300_v0 = vld [vmem:[#allocation12 + $0x6e0] sm:$0xff]   ;;  %v11304_v25 = vld [vmem:[#allocation12 + $0x6e8] sm:$0xff]  }
 0x2fc   :  { %v4989_v35 = vadd.f32 %v4988_v28, %v3066_v57  ;;  %10717 = vmatprep.subr.bf16.mxu0 %v11269_v21  ;;  %v4990_v37 = vpop.f32.mrb[94].mxu1  ;;  %v11301_v20 = vld [vmem:[#allocation12 + $0x760] sm:$0xff]   ;;  %v11307_v28 = vld [vmem:[#allocation12 + $0x728] sm:$0xff]  }
 0x2fd   :  { %v5117_v22 = vmax.f32 %v4987_v27, 0.0  ;;  %v4991_v39 = vpop.f32.mrb[95].mxu1  ;;  %v11302_v57 = vld [vmem:[#allocation12 + $0x6a0] sm:$0xff]   ;;  %v11306_v27 = vld [vmem:[#allocation12 + $0x6a8] sm:$0xff]   ;;  %v11310_v37 = vld [vmem:[#allocation12 + $0x6b0] sm:$0xff]  }
 0x2fe   :  { %v5118_v40 = vmax.f32 %v4989_v35, 0.0  ;;  %10696 = vmatpush3.bf16.msra.mxu1 %v11270_v26  ;;  %v11303_v21 = vld [vmem:[#allocation12 + $0x720] sm:$0xff]   ;;  %v11305_v26 = vld [vmem:[#allocation12 + $0x768] sm:$0xff]  }
 0x2ff   :  { %v5165_v32 = vpack.c.bf16 %v5117_v22, %v5117_v22  ;;  %10718 = vmatpush3.bf16.msra.mxu0 %v11271_v30  ;;  %10697 = vmatprep.subr.bf16.mxu1 %v11272_v44  ;;  %v11308_v30 = vld [vmem:[#allocation12 + $0x6f0] sm:$0xff]  }
 0x300   :  { %v5166_v47 = vpack.c.bf16 %v5118_v40, %v5118_v40  ;;  %10719 = vmatprep.subr.bf16.mxu0 %v11273_v36  ;;  %v11309_v44 = vld [vmem:[#allocation12 + $0x770] sm:$0xff]  }
 0x301   :  { %v5261_v17 = vrot.slane %v5165_v32, 4  ;;  %v11311_v40 = vld [vmem:[#allocation12 + $0x730] sm:$0xff]  }
 0x302   :  { %v5262_v51 = vrot.slane %v5166_v47, 4  ;;  %10698 = vmatpush3.bf16.msra.mxu1 %v11274_v41  ;;  %v11312_v41 = vld [vmem:[#allocation12 + $0x6f8] sm:$0xff]  }
 0x303   :  { %5357 = vst [vmem:[#allocation2 + $0x150] sm:$0xf0] %v5261_v17  ;;  %10720 = vmatpush3.bf16.msra.mxu0 %v11275_v45  ;;  %10699 = vmatprep.subr.bf16.mxu1 %v11276_v46  ;;  %v11313_v45 = vld [vmem:[#allocation12 + $0x778] sm:$0xff]   ;;  %v11316_v17 = vld [vmem:[#allocation12 + $0x7c0] sm:$0xff]  }
 0x304   :  { %5358 = vst [vmem:[#allocation2 + $0x158] sm:$0xf0] %v5262_v51  ;;  %10721 = vmatprep.subr.bf16.mxu0 %v11277_v4  ;;  %v11314_v47 = vld [vmem:[#allocation12 + $0x6b8] sm:$0xff]   ;;  %v11317_v51 = vld [vmem:[#allocation12 + $0x840] sm:$0xff]  }
 0x305   :  { %v11315_v4 = vld [vmem:[#allocation12 + $0x738] sm:$0xff]  }
 0x306   :  { %10700 = vmatpush3.bf16.msra.mxu1 %v11278_v52  ;;  %v11318_v52 = vld [vmem:[#allocation12 + $0x780] sm:$0xff]  }
 0x307   :  { %10722 = vmatpush3.bf16.msra.mxu0 %v11279_v53  ;;  %10701 = vmatprep.subr.bf16.mxu1 %v11280_v54  ;;  %v11319_v53 = vld [vmem:[#allocation12 + $0x800] sm:$0xff]   ;;  %v5389_v54 = vld [vmem:[#allocation2 + $0xd0] sm:$0xff] }
 0x308   :  { %10723 = vmatprep.subr.bf16.mxu0 %v11281_v7  ;;  %v11320_v7 = vld [vmem:[#allocation12 + $0x7c8] sm:$0xff]  }
 0x30a   :  { %10702 = vmatpush3.bf16.msra.mxu1 %v11282_v31  ;;  %v5068_v59 = vpop.f32.mrb[96].mxu1  ;;  %v5391_v31 = vld [vmem:[#allocation2 + $0xe0] sm:$0xff] }
 0x30b   :  { %10724 = vmatpush3.bf16.msra.mxu0 %v11283_v55  ;;  %v5069_v60 = vadd.f32 %v5068_v59, %v3078_v3  ;;  %v5070_v29 = vpop.f32.mrb[97].mxu1  ;;  %10731 = vmatprep.subr.bf16.mxu1 %v11284_v56  ;;  %v11321_v55 = vld [vmem:[#allocation12 + $0x848] sm:$0xff]   ;;  %v5394_v3 = vld [vmem:[#allocation2 + $0xf8] sm:$0xff] }
 0x30c   :  { %v5071_v62 = vadd.f32 %v5070_v29, %v3082_v58  ;;  %10753 = vmatprep.subr.bf16.mxu0 %v11285_v38  ;;  %v5072_v43 = vpop.f32.mrb[98].mxu1  ;;  %v11322_v56 = vld [vmem:[#allocation12 + $0x788] sm:$0xff]   ;;  %v5396_v58 = vld [vmem:[#allocation2 + $0x108] sm:$0xff]  ;;  %v11324_v59 = vld [vmem:[#allocation12 + $0x7d0] sm:$0xff]  }
 0x30d   :  { %v5121_v33 = vmax.f32 %v5069_v60, 0.0  ;;  %8974 = vmatmul.mubr.bf16.vlgmr.msra.gmra.mrb[120].mxu1 %v5385_v63  ;;  %v5073_v6 = vpop.f32.mrb[99].mxu1  ;;  %v11323_v38 = vld [vmem:[#allocation12 + $0x808] sm:$0xff]   ;;  %v11326_v60 = vld [vmem:[#allocation12 + $0x790] sm:$0xff]   ;;  %v11330_v63 = vld [vmem:[#allocation12 + $0x798] sm:$0xff]  }
 0x30e   :  { %v5122_v34 = vmax.f32 %v5071_v62, 0.0  ;;  %9015 = vmatmul.mubr.bf16.vlgmr.msra.gmra.mrb[116].mxu0 %v5387_v23  ;;  %10732 = vmatpush3.bf16.msra.mxu1 %v11286_v42  ;;  %v11325_v42 = vld [vmem:[#allocation12 + $0x850] sm:$0xff]   ;;  %v11329_v62 = vld [vmem:[#allocation12 + $0x858] sm:$0xff]   ;;  %v11332_v43 = vld [vmem:[#allocation12 + $0x7e0] sm:$0xff]  }
 0x30f   :  { %v5169_v9 = vpack.c.bf16 %v5121_v33, %v5121_v33  ;;  %9055 = vmatprep.mubr.bf16.mxu1 %v5390_v50  ;;  %10754 = vmatpush3.bf16.msra.mxu0 %v11287_v61  ;;  %v11327_v29 = vld [vmem:[#allocation12 + $0x810] sm:$0xff]   ;;  %v11328_v61 = vld [vmem:[#allocation12 + $0x7d8] sm:$0xff]   ;;  %v11333_v33 = vld [vmem:[#allocation12 + $0x860] sm:$0xff]  }
 0x310   :  { %v5170_v11 = vpack.c.bf16 %v5122_v34, %v5122_v34  ;;  %9096 = vmatprep.mubr.bf16.mxu0 %v5392_v49  ;;  %10733 = vmatprep.subr.bf16.mxu1 %v11288_v2  ;;  %v11331_v2 = vld [vmem:[#allocation12 + $0x818] sm:$0xff]   ;;  %v11334_v23 = vld [vmem:[#allocation12 + $0x7a0] sm:$0xff]   ;;  %v11336_v6 = vld [vmem:[#allocation12 + $0x7e8] sm:$0xff]  }
 0x311   :  { %v5265_v19 = vrot.slane %v5169_v9, 4  ;;  %10755 = vmatprep.subr.bf16.mxu0 %v11289_v5  ;;  %v11335_v5 = vld [vmem:[#allocation12 + $0x820] sm:$0xff]   ;;  %v11337_v34 = vld [vmem:[#allocation12 + $0x868] sm:$0xff]   ;;  %v11340_v49 = vld [vmem:[#allocation12 + $0x7f0] sm:$0xff]  }
 0x312   :  { %v5266_v48 = vrot.slane %v5170_v11, 4  ;;  %10734 = vmatpush3.bf16.msra.mxu1 %v11290_v8  ;;  %v11338_v50 = vld [vmem:[#allocation12 + $0x7a8] sm:$0xff]   ;;  %v10057_v8 = vld [vmem:[#allocation14] ss:$0 sm:$0xff] }
 0x313   :  { %5361 = vst [vmem:[#allocation2 + $0x170] sm:$0xf0] %v5265_v19  ;;  %10756 = vmatpush3.bf16.msra.mxu0 %v11291_v24  ;;  %10735 = vmatprep.subr.bf16.mxu1 %v11292_v10  ;;  %v11339_v9 = vld [vmem:[#allocation12 + $0x828] sm:$0xff]   ;;  %v11341_v10 = vld [vmem:[#allocation12 + $0x870] sm:$0xff]  }
 0x314   :  { %5362 = vst [vmem:[#allocation2 + $0x178] sm:$0xf0] %v5266_v48  ;;  %10757 = vmatprep.subr.bf16.mxu0 %v11293_v12 }
 0x316   :  { %10736 = vmatpush3.bf16.msra.mxu1 %v11294_v13 }
 0x317   :  { %10758 = vmatpush3.bf16.msra.mxu0 %v11295_v1  ;;  %10737 = vmatprep.subr.bf16.mxu1 %v11296_v14  ;;  %v11342_v14 = vld [vmem:[#allocation12 + $0x7b0] sm:$0xff]  }
 0x318   :  { %10759 = vmatprep.subr.bf16.mxu0 %v11297_v15 }
 0x31a   :  { %10738 = vmatpush3.bf16.msra.mxu1 %v11298_v16 }
 0x31b   :  { %10760 = vmatpush3.bf16.msra.mxu0 %v11299_v18  ;;  %10739 = vmatprep.subr.bf16.mxu1 %v11300_v0  ;;  %v11343_v0 = vld [vmem:[#allocation12 + $0x830] sm:$0xff]  }
 0x31c   :  { %10761 = vmatprep.subr.bf16.mxu0 %v11301_v20  ;;  %v11344_v20 = vld [vmem:[#allocation12 + $0x7f8] sm:$0xff]  }
 0x31e   :  { %10740 = vmatpush3.bf16.msra.mxu1 %v11302_v57 }
 0x31f   :  { %10762 = vmatpush3.bf16.msra.mxu0 %v11303_v21  ;;  %10741 = vmatprep.subr.bf16.mxu1 %v11304_v25 }
 0x320   :  { %10763 = vmatprep.subr.bf16.mxu0 %v11305_v26  ;;  %v10461_v35 = vpop.f32.mrb[92].mxu0 }
 0x321   :  { %v10462_v36 = vpop.f32.mrb[93].mxu0 }
 0x322   :  { %10742 = vmatpush3.bf16.msra.mxu1 %v11306_v27  ;;  %v12269_v22 = vadd.f32 %v10462_v36, %v10461_v35  ;;  %v10464_v39 = vpop.f32.mrb[94].mxu0  ;;  %v11345_v27 = vld [vmem:[#allocation12 + $0x878] sm:$0xff]  }
 0x323   :  { %10764 = vmatpush3.bf16.msra.mxu0 %v11307_v28  ;;  %10743 = vmatprep.subr.bf16.mxu1 %v11308_v30  ;;  %v10465_v32 = vpop.f32.mrb[95].mxu0  ;;  %v11347_v36 = vld [vmem:[#allocation12 + $0x838] sm:$0xff]  }
 0x324   :  { %10765 = vmatprep.subr.bf16.mxu0 %v11309_v44  ;;  %v12271_v46 = vadd.f32 %v10465_v32, %v10464_v39  ;;  %v8525_v19 = vadd.f32 %v12269_v22, %v10057_v8  ;;  %v11346_v44 = vld [vmem:[#allocation12 + $0x7b8] sm:$0xff]   ;;  %v11349_v22 = vld [vmem:[#allocation12 + $0x940] sm:$0xff]   ;;  %v5393_v32 = vld [vmem:[#allocation2 + $0xf0] sm:$0xff] }
 0x326   :  { %10744 = vmatpush3.bf16.msra.mxu1 %v11310_v37  ;;  %v8528_v57 = vadd.f32 %v12271_v46, %v10057_v8  ;;  %v11348_v37 = vld [vmem:[#allocation12 + $0x8c0] sm:$0xff]   ;;  %v5395_v46 = vld [vmem:[#allocation2 + $0x100] sm:$0xff]  ;;  %v11374_v8 = vld [vmem:[#allocation12 + $0x8b0] sm:$0xff]  }
 0x327   :  { %10766 = vmatpush3.bf16.msra.mxu0 %v11311_v40  ;;  %10745 = vmatprep.subr.bf16.mxu1 %v11312_v41  ;;  %v11350_v40 = vld [vmem:[#allocation12 + $0x880] sm:$0xff]  }
 0x328   :  { %10767 = vmatprep.subr.bf16.mxu0 %v11313_v45  ;;  %v11351_v41 = vld [vmem:[#allocation12 + $0x900] sm:$0xff]   ;;  %v11352_v45 = vld [vmem:[#allocation12 + $0x8c8] sm:$0xff]  }
 0x32a   :  { %10746 = vmatpush3.bf16.msra.mxu1 %v11314_v47  ;;  %v11353_v47 = vld [vmem:[#allocation12 + $0x948] sm:$0xff]  }
 0x32b   :  { %10768 = vmatpush3.bf16.msra.mxu0 %v11315_v4  ;;  %10775 = vmatprep.subr.bf16.mxu1 %v11316_v17  ;;  %v5398_v4 = vld [vmem:[#allocation2 + $0x118] sm:$0xff]  ;;  %v11354_v17 = vld [vmem:[#allocation12 + $0x888] sm:$0xff]  }
 0x32c   :  { %10797 = vmatprep.subr.bf16.mxu0 %v11317_v51  ;;  %v5400_v51 = vld [vmem:[#allocation2 + $0x128] sm:$0xff] }
 0x32d   :  { %9056 = vmatmul.mubr.bf16.vlgmr.msra.gmra.mrb[124].mxu1 %v5389_v54  ;;  %v11357_v54 = vld [vmem:[#allocation12 + $0x950] sm:$0xff]  }
 0x32e   :  { %9097 = vmatmul.mubr.bf16.vlgmr.msra.gmra.mrb[120].mxu0 %v5391_v31  ;;  %10776 = vmatpush3.bf16.msra.mxu1 %v11318_v52  ;;  %v11355_v52 = vld [vmem:[#allocation12 + $0x908] sm:$0xff]   ;;  %v11359_v31 = vld [vmem:[#allocation12 + $0x910] sm:$0xff]  }
 0x32f   :  { %9137 = vmatprep.mubr.bf16.mxu1 %v5394_v3  ;;  %10798 = vmatpush3.bf16.msra.mxu0 %v11319_v53  ;;  %v11356_v53 = vld [vmem:[#allocation12 + $0x8d0] sm:$0xff]   ;;  %v11361_v3 = vld [vmem:[#allocation12 + $0x958] sm:$0xff]  }
 0x330   :  { %9178 = vmatprep.mubr.bf16.mxu0 %v5396_v58  ;;  %10777 = vmatprep.subr.bf16.mxu1 %v11320_v7  ;;  %v11358_v7 = vld [vmem:[#allocation12 + $0x890] sm:$0xff]   ;;  %v11363_v58 = vld [vmem:[#allocation12 + $0x918] sm:$0xff]  }
 0x331   :  { %10799 = vmatprep.subr.bf16.mxu0 %v11321_v55  ;;  %v11360_v55 = vld [vmem:[#allocation12 + $0x8d8] sm:$0xff]  }
 0x332   :  { %10778 = vmatpush3.bf16.msra.mxu1 %v11322_v56  ;;  %v11362_v56 = vld [vmem:[#allocation12 + $0x898] sm:$0xff]  }
 0x333   :  { %10800 = vmatpush3.bf16.msra.mxu0 %v11323_v38  ;;  %10779 = vmatprep.subr.bf16.mxu1 %v11324_v59  ;;  %v11364_v38 = vld [vmem:[#allocation12 + $0x8e0] sm:$0xff]  }
 0x334   :  { %10801 = vmatprep.subr.bf16.mxu0 %v11325_v42  ;;  %v11365_v59 = vld [vmem:[#allocation12 + $0x960] sm:$0xff]  }
 0x335   :  { %v11366_v42 = vld [vmem:[#allocation12 + $0x8a0] sm:$0xff]  }
 0x336   :  { %10780 = vmatpush3.bf16.msra.mxu1 %v11326_v60  ;;  %v11367_v60 = vld [vmem:[#allocation12 + $0x920] sm:$0xff]  }
 0x337   :  { %10802 = vmatpush3.bf16.msra.mxu0 %v11327_v29  ;;  %10781 = vmatprep.subr.bf16.mxu1 %v11328_v61  ;;  %v11368_v29 = vld [vmem:[#allocation12 + $0x8e8] sm:$0xff]  }
 0x338   :  { %10803 = vmatprep.subr.bf16.mxu0 %v11329_v62  ;;  %v11369_v61 = vld [vmem:[#allocation12 + $0x968] sm:$0xff]  }
 0x339   :  { %v11370_v62 = vld [vmem:[#allocation12 + $0x8a8] sm:$0xff]  }
 0x33a   :  { %10782 = vmatpush3.bf16.msra.mxu1 %v11330_v63  ;;  %v11371_v63 = vld [vmem:[#allocation12 + $0x928] sm:$0xff]  }
 0x33b   :  { %10804 = vmatpush3.bf16.msra.mxu0 %v11331_v2  ;;  %10783 = vmatprep.subr.bf16.mxu1 %v11332_v43  ;;  %v11372_v2 = vld [vmem:[#allocation12 + $0x8f0] sm:$0xff]  }
 0x33c   :  { %10805 = vmatprep.subr.bf16.mxu0 %v11333_v33  ;;  %v11373_v33 = vld [vmem:[#allocation12 + $0x970] sm:$0xff]  }
 0x33e   :  { %10784 = vmatpush3.bf16.msra.mxu1 %v11334_v23 }
 0x33f   :  { %10806 = vmatpush3.bf16.msra.mxu0 %v11335_v5  ;;  %10785 = vmatprep.subr.bf16.mxu1 %v11336_v6 }
 0x340   :  { %v10483_v24 = vpop.f32.mrb[100].mxu1  ;;  %10807 = vmatprep.subr.bf16.mxu0 %v11337_v34  ;;  %v10505_v11 = vpop.f32.mrb[96].mxu0 }
 0x341   :  { %v10484_v12 = vpop.f32.mrb[101].mxu1  ;;  %v10506_v48 = vpop.f32.mrb[97].mxu0 }
 0x342   :  { %v10485_v13 = vadd.f32 %v10484_v12, %v10483_v24  ;;  %10786 = vmatpush3.bf16.msra.mxu1 %v11338_v50  ;;  %v10486_v1 = vpop.f32.mrb[102].mxu1  ;;  %v10507_v15 = vadd.f32 %v10506_v48, %v10505_v11  ;;  %v10508_v16 = vpop.f32.mrb[98].mxu0  ;;  %v11376_v11 = vld [vmem:[#allocation12 + $0x8f8] sm:$0xff]  }
 0x343   :  { %10808 = vmatpush3.bf16.msra.mxu0 %v11339_v9  ;;  %v10487_v18 = vpop.f32.mrb[103].mxu1  ;;  %10787 = vmatprep.subr.bf16.mxu1 %v11340_v49  ;;  %v10509_v25 = vpop.f32.mrb[99].mxu0 }
 0x344   :  { %v8566_v21 = vadd.f32 %v10485_v13, %v8525_v19  ;;  %v10488_v26 = vadd.f32 %v10487_v18, %v10486_v1  ;;  %10809 = vmatprep.subr.bf16.mxu0 %v11341_v10  ;;  %v10510_v28 = vadd.f32 %v10509_v25, %v10508_v16  ;;  %v11375_v10 = vld [vmem:[#allocation12 + $0x930] sm:$0xff]   ;;  %v11377_v13 = vld [vmem:[#allocation12 + $0x978] sm:$0xff]   ;;  %v11383_v25 = vld [vmem:[#allocation12 + $0xa00] sm:$0xff]  }
 0x345   :  { %v11378_v16 = vld [vmem:[#allocation12 + $0x8b8] sm:$0xff]  }
 0x346   :  { %v8569_v30 = vadd.f32 %v10488_v26, %v8528_v57  ;;  %10788 = vmatpush3.bf16.msra.mxu1 %v11342_v14  ;;  %v12275_v35 = vadd.f32 %v10507_v15, %v8566_v21  ;;  %v11379_v18 = vld [vmem:[#allocation12 + $0x938] sm:$0xff]   ;;  %v11381_v57 = vld [vmem:[#allocation12 + $0xa40] sm:$0xff]   ;;  %v5397_v26 = vld [vmem:[#allocation2 + $0x110] sm:$0xff] }
 0x347   :  { %10810 = vmatpush3.bf16.msra.mxu0 %v11343_v0  ;;  %10789 = vmatprep.subr.bf16.mxu1 %v11344_v20  ;;  %v11380_v0 = vld [vmem:[#allocation12 + $0x9c0] sm:$0xff]  }
 0x348   :  { %10811 = vmatprep.subr.bf16.mxu0 %v11345_v27  ;;  %v12277_v39 = vadd.f32 %v10510_v28, %v8569_v30  ;;  %v11382_v21 = vld [vmem:[#allocation12 + $0x980] sm:$0xff]   ;;  %v11384_v27 = vld [vmem:[#allocation12 + $0x9c8] sm:$0xff]   ;;  %v5399_v28 = vld [vmem:[#allocation2 + $0x120] sm:$0xff] }
 0x349   :  { %v11385_v30 = vld [vmem:[#allocation12 + $0xa48] sm:$0xff]  }
 0x34a   :  { %10790 = vmatpush3.bf16.msra.mxu1 %v11346_v44  ;;  %v5402_v44 = vld [vmem:[#allocation2 + $0x138] sm:$0xff] }
 0x34b   :  { %10812 = vmatpush3.bf16.msra.mxu0 %v11347_v36  ;;  %10819 = vmatprep.subr.bf16.mxu1 %v11348_v37  ;;  %v5404_v36 = vld [vmem:[#allocation2 + $0x148] sm:$0xff]  ;;  %v11387_v37 = vld [vmem:[#allocation12 + $0xa08] sm:$0xff]  }
 0x34c   :  { %10841 = vmatprep.subr.bf16.mxu0 %v11349_v22  ;;  %v11388_v22 = vld [vmem:[#allocation12 + $0x9d0] sm:$0xff]  }
 0x34d   :  { %9138 = vmatmul.mubr.bf16.vlgmr.msra.gmra.mrb[128].mxu1 %v5393_v32  ;;  %v11392_v32 = vld [vmem:[#allocation12 + $0x9d8] sm:$0xff]  }
 0x34e   :  { %9179 = vmatmul.mubr.bf16.vlgmr.msra.gmra.mrb[124].mxu0 %v5395_v46  ;;  %10820 = vmatpush3.bf16.msra.mxu1 %v11350_v40  ;;  %v11390_v40 = vld [vmem:[#allocation12 + $0x990] sm:$0xff]   ;;  %v11394_v46 = vld [vmem:[#allocation12 + $0x998] sm:$0xff]  }
 0x34f   :  { %9219 = vmatprep.mubr.bf16.mxu1 %v5398_v4  ;;  %10842 = vmatpush3.bf16.msra.mxu0 %v11351_v41  ;;  %v11391_v41 = vld [vmem:[#allocation12 + $0xa10] sm:$0xff]   ;;  %v11396_v4 = vld [vmem:[#allocation12 + $0x9e0] sm:$0xff]  }
 0x350   :  { %9260 = vmatprep.mubr.bf16.mxu0 %v5400_v51  ;;  %10821 = vmatprep.subr.bf16.mxu1 %v11352_v45  ;;  %v11393_v45 = vld [vmem:[#allocation12 + $0xa58] sm:$0xff]   ;;  %v11398_v51 = vld [vmem:[#allocation12 + $0x9a0] sm:$0xff]  }
 0x351   :  { %10843 = vmatprep.subr.bf16.mxu0 %v11353_v47  ;;  %v11395_v47 = vld [vmem:[#allocation12 + $0xa18] sm:$0xff]  }
 0x352   :  { %10822 = vmatpush3.bf16.msra.mxu1 %v11354_v17  ;;  %v11397_v17 = vld [vmem:[#allocation12 + $0xa60] sm:$0xff]  }
 0x353   :  { %10844 = vmatpush3.bf16.msra.mxu0 %v11355_v52  ;;  %10823 = vmatprep.subr.bf16.mxu1 %v11356_v53  ;;  %v11399_v52 = vld [vmem:[#allocation12 + $0xa20] sm:$0xff]   ;;  %v11400_v53 = vld [vmem:[#allocation12 + $0x9e8] sm:$0xff]  }
 0x354   :  { %10845 = vmatprep.subr.bf16.mxu0 %v11357_v54  ;;  %v11401_v54 = vld [vmem:[#allocation12 + $0xa68] sm:$0xff]  }
 0x356   :  { %10824 = vmatpush3.bf16.msra.mxu1 %v11358_v7  ;;  %v11402_v7 = vld [vmem:[#allocation12 + $0x9a8] sm:$0xff]  }
 0x357   :  { %10846 = vmatpush3.bf16.msra.mxu0 %v11359_v31  ;;  %10825 = vmatprep.subr.bf16.mxu1 %v11360_v55  ;;  %v11403_v31 = vld [vmem:[#allocation12 + $0xa28] sm:$0xff]   ;;  %v11404_v55 = vld [vmem:[#allocation12 + $0x9f0] sm:$0xff]  }
 0x358   :  { %10847 = vmatprep.subr.bf16.mxu0 %v11361_v3 }
 0x35a   :  { %10826 = vmatpush3.bf16.msra.mxu1 %v11362_v56  ;;  %v11405_v56 = vld [vmem:[#allocation12 + $0xa70] sm:$0xff]  }
 0x35b   :  { %10848 = vmatpush3.bf16.msra.mxu0 %v11363_v58  ;;  %10827 = vmatprep.subr.bf16.mxu1 %v11364_v38 }
 0x35c   :  { %10849 = vmatprep.subr.bf16.mxu0 %v11365_v59 }
 0x35e   :  { %10828 = vmatpush3.bf16.msra.mxu1 %v11366_v42 }
 0x35f   :  { %10850 = vmatpush3.bf16.msra.mxu0 %v11367_v60  ;;  %10829 = vmatprep.subr.bf16.mxu1 %v11368_v29  ;;  %v11406_v29 = vld [vmem:[#allocation12 + $0x9b0] sm:$0xff]  }
 0x360   :  { %v10527_v43 = vpop.f32.mrb[104].mxu1  ;;  %10851 = vmatprep.subr.bf16.mxu0 %v11369_v61  ;;  %v10549_v23 = vpop.f32.mrb[100].mxu0 }
 0x361   :  { %v10528_v5 = vpop.f32.mrb[105].mxu1  ;;  %v10550_v34 = vpop.f32.mrb[101].mxu0 }
 0x362   :  { %v10529_v6 = vadd.f32 %v10528_v5, %v10527_v43  ;;  %v10530_v50 = vpop.f32.mrb[106].mxu1  ;;  %10830 = vmatpush3.bf16.msra.mxu1 %v11370_v62  ;;  %v10551_v9 = vadd.f32 %v10550_v34, %v10549_v23  ;;  %v10552_v49 = vpop.f32.mrb[102].mxu0  ;;  %v11408_v43 = vld [vmem:[#allocation12 + $0x9f8] sm:$0xff]  }
 0x363   :  { %10852 = vmatpush3.bf16.msra.mxu0 %v11371_v63  ;;  %v10531_v24 = vpop.f32.mrb[107].mxu1  ;;  %10831 = vmatprep.subr.bf16.mxu1 %v11372_v2  ;;  %v10553_v48 = vpop.f32.mrb[103].mxu0  ;;  %v11407_v2 = vld [vmem:[#allocation12 + $0xa30] sm:$0xff]  }
 0x364   :  { %v8648_v12 = vadd.f32 %v10529_v6, %v12275_v35  ;;  %v10532_v19 = vadd.f32 %v10531_v24, %v10530_v50  ;;  %10853 = vmatprep.subr.bf16.mxu0 %v11373_v33  ;;  %v10554_v1 = vadd.f32 %v10553_v48, %v10552_v49  ;;  %v11386_v35 = vld [vmem:[#allocation12 + $0x988] sm:$0xff]   ;;  %v11409_v6 = vld [vmem:[#allocation12 + $0xa78] sm:$0xff]   ;;  %v11412_v24 = vld [vmem:[#allocation12 + $0xac0] sm:$0xff]  }
 0x365   :  { %v11411_v49 = vld [vmem:[#allocation12 + $0xa38] sm:$0xff]   ;;  %v5401_v48 = vld [vmem:[#allocation2 + $0x130] sm:$0xff] }
 0x366   :  { %v12280_v14 = vadd.f32 %v10551_v9, %v8648_v12  ;;  %v8651_v15 = vadd.f32 %v10532_v19, %v12277_v39  ;;  %10832 = vmatpush3.bf16.msra.mxu1 %v11374_v8  ;;  %v11389_v39 = vld [vmem:[#allocation12 + $0xa50] sm:$0xff]   ;;  %v11410_v9 = vld [vmem:[#allocation12 + $0x9b8] sm:$0xff]   ;;  %v11414_v12 = vld [vmem:[#allocation12 + $0xa80] sm:$0xff]  }
 0x367   :  { %10854 = vmatpush3.bf16.msra.mxu0 %v11375_v10  ;;  %10833 = vmatprep.subr.bf16.mxu1 %v11376_v11  ;;  %v11413_v11 = vld [vmem:[#allocation12 + $0xb40] sm:$0xff]  }
 0x368   :  { %v12283_v20 = vadd.f32 %v10554_v1, %v8651_v15  ;;  %10855 = vmatprep.subr.bf16.mxu0 %v11377_v13  ;;  %v11415_v19 = vld [vmem:[#allocation12 + $0xb00] sm:$0xff]   ;;  %v11416_v13 = vld [vmem:[#allocation12 + $0xac8] sm:$0xff]   ;;  %v5403_v1 = vld [vmem:[#allocation2 + $0x140] sm:$0xff] }
 0x369   :  { %v5406_v15 = vld [vmem:[#allocation2 + $0x158] sm:$0xff] }
 0x36a   :  { %10834 = vmatpush3.bf16.msra.mxu1 %v11378_v16  ;;  %v11418_v16 = vld [vmem:[#allocation12 + $0xa88] sm:$0xff]  }
 0x36b   :  { %10856 = vmatpush3.bf16.msra.mxu0 %v11379_v18  ;;  %10863 = vmatprep.subr.bf16.mxu1 %v11380_v0  ;;  %v5408_v18 = vld [vmem:[#allocation2 + $0x168] sm:$0xff]  ;;  %v11419_v0 = vld [vmem:[#allocation12 + $0xb08] sm:$0xff]  }
 0x36c   :  { %10885 = vmatprep.subr.bf16.mxu0 %v11381_v57  ;;  %v11421_v57 = vld [vmem:[#allocation12 + $0xb50] sm:$0xff]  }
 0x36d   :  { %9220 = vmatmul.mubr.bf16.vlgmr.msra.gmra.mrb[132].mxu1 %v5397_v26  ;;  %v11424_v26 = vld [vmem:[#allocation12 + $0xad8] sm:$0xff]  }
 0x36e   :  { %9261 = vmatmul.mubr.bf16.vlgmr.msra.gmra.mrb[128].mxu0 %v5399_v28  ;;  %10864 = vmatpush3.bf16.msra.mxu1 %v11382_v21  ;;  %v11422_v21 = vld [vmem:[#allocation12 + $0xa90] sm:$0xff]   ;;  %v11426_v28 = vld [vmem:[#allocation12 + $0xa98] sm:$0xff]  }
 0x36f   :  { %9301 = vmatprep.mubr.bf16.mxu1 %v5402_v44  ;;  %10886 = vmatpush3.bf16.msra.mxu0 %v11383_v25  ;;  %v11423_v25 = vld [vmem:[#allocation12 + $0xb10] sm:$0xff]   ;;  %v11428_v44 = vld [vmem:[#allocation12 + $0xae0] sm:$0xff]  }
 0x370   :  { %9342 = vmatprep.mubr.bf16.mxu0 %v5404_v36  ;;  %10865 = vmatprep.subr.bf16.mxu1 %v11384_v27  ;;  %v11425_v27 = vld [vmem:[#allocation12 + $0xb58] sm:$0xff]   ;;  %v11430_v36 = vld [vmem:[#allocation12 + $0xaa0] sm:$0xff]  }
 0x371   :  { %10887 = vmatprep.subr.bf16.mxu0 %v11385_v30  ;;  %v11427_v30 = vld [vmem:[#allocation12 + $0xb18] sm:$0xff]  }
 0x372   :  { %10866 = vmatpush3.bf16.msra.mxu1 %v11386_v35  ;;  %v11429_v35 = vld [vmem:[#allocation12 + $0xb60] sm:$0xff]  }
 0x373   :  { %10888 = vmatpush3.bf16.msra.mxu0 %v11387_v37  ;;  %10867 = vmatprep.subr.bf16.mxu1 %v11388_v22  ;;  %v11431_v37 = vld [vmem:[#allocation12 + $0xb20] sm:$0xff]   ;;  %v11432_v22 = vld [vmem:[#allocation12 + $0xae8] sm:$0xff]  }
 0x374   :  { %10889 = vmatprep.subr.bf16.mxu0 %v11389_v39  ;;  %v11433_v39 = vld [vmem:[#allocation12 + $0xb68] sm:$0xff]  }
 0x376   :  { %10868 = vmatpush3.bf16.msra.mxu1 %v11390_v40  ;;  %v11434_v40 = vld [vmem:[#allocation12 + $0xaa8] sm:$0xff]  }
 0x377   :  { %10890 = vmatpush3.bf16.msra.mxu0 %v11391_v41  ;;  %10869 = vmatprep.subr.bf16.mxu1 %v11392_v32  ;;  %v11435_v41 = vld [vmem:[#allocation12 + $0xb28] sm:$0xff]   ;;  %v11436_v32 = vld [vmem:[#allocation12 + $0xaf0] sm:$0xff]  }
 0x378   :  { %10891 = vmatprep.subr.bf16.mxu0 %v11393_v45 }
 0x37a   :  { %10870 = vmatpush3.bf16.msra.mxu1 %v11394_v46  ;;  %v11437_v46 = vld [vmem:[#allocation12 + $0xb70] sm:$0xff]  }
 0x37b   :  { %10892 = vmatpush3.bf16.msra.mxu0 %v11395_v47  ;;  %10871 = vmatprep.subr.bf16.mxu1 %v11396_v4 }
 0x37c   :  { %10893 = vmatprep.subr.bf16.mxu0 %v11397_v17 }
 0x37e   :  { %10872 = vmatpush3.bf16.msra.mxu1 %v11398_v51 }
 0x37f   :  { %10894 = vmatpush3.bf16.msra.mxu0 %v11399_v52  ;;  %10873 = vmatprep.subr.bf16.mxu1 %v11400_v53  ;;  %v11438_v53 = vld [vmem:[#allocation12 + $0xab0] sm:$0xff]  }
 0x380   :  { %v10571_v3 = vpop.f32.mrb[108].mxu1  ;;  %10895 = vmatprep.subr.bf16.mxu0 %v11401_v54 }
 0x381   :  { %v10593_v58 = vpop.f32.mrb[104].mxu0  ;;  %v10572_v38 = vpop.f32.mrb[109].mxu1 }
 0x382   :  { %v10573_v59 = vadd.f32 %v10572_v38, %v10571_v3  ;;  %v10594_v42 = vpop.f32.mrb[105].mxu0  ;;  %v10574_v60 = vpop.f32.mrb[110].mxu1  ;;  %10874 = vmatpush3.bf16.msra.mxu1 %v11402_v7  ;;  %v11440_v3 = vld [vmem:[#allocation12 + $0xaf8] sm:$0xff]  }
 0x383   :  { %v10595_v61 = vadd.f32 %v10594_v42, %v10593_v58  ;;  %v10596_v62 = vpop.f32.mrb[106].mxu0  ;;  %10896 = vmatpush3.bf16.msra.mxu0 %v11403_v31  ;;  %v10575_v63 = vpop.f32.mrb[111].mxu1  ;;  %10875 = vmatprep.subr.bf16.mxu1 %v11404_v55  ;;  %v11439_v55 = vld [vmem:[#allocation12 + $0xb30] sm:$0xff]  }
 0x384   :  { %v8730_v33 = vadd.f32 %v10573_v59, %v12280_v14  ;;  %v10576_v23 = vadd.f32 %v10575_v63, %v10574_v60  ;;  %v10597_v5 = vpop.f32.mrb[107].mxu0  ;;  %10897 = vmatprep.subr.bf16.mxu0 %v11405_v56  ;;  %v11417_v14 = vld [vmem:[#allocation12 + $0xb48] sm:$0xff]   ;;  %v11441_v59 = vld [vmem:[#allocation12 + $0xb78] sm:$0xff]   ;;  %v11444_v63 = vld [vmem:[#allocation12 + $0xbc0] sm:$0xff]  }
 0x385   :  { %v10598_v34 = vadd.f32 %v10597_v5, %v10596_v62  ;;  %v11443_v62 = vld [vmem:[#allocation12 + $0xb38] sm:$0xff]  }
 0x386   :  { %v12286_v50 = vadd.f32 %v10595_v61, %v8730_v33  ;;  %v8733_v8 = vadd.f32 %v10576_v23, %v12283_v20  ;;  %10876 = vmatpush3.bf16.msra.mxu1 %v11406_v29  ;;  %v11420_v20 = vld [vmem:[#allocation12 + $0xad0] sm:$0xff]   ;;  %v11442_v61 = vld [vmem:[#allocation12 + $0xab8] sm:$0xff]   ;;  %v11446_v33 = vld [vmem:[#allocation12 + $0xbc8] sm:$0xff]  }
 0x387   :  { %10898 = vmatpush3.bf16.msra.mxu0 %v11407_v2  ;;  %10877 = vmatprep.subr.bf16.mxu1 %v11408_v43  ;;  %v11445_v43 = vld [vmem:[#allocation12 + $0xb80] sm:$0xff]   ;;  %v5405_v23 = vld [vmem:[#allocation2 + $0x150] sm:$0xff]  ;;  %v5407_v5 = vld [vmem:[#allocation2 + $0x160] sm:$0xff] }
 0x388   :  { %v12289_v10 = vadd.f32 %v10598_v34, %v8733_v8  ;;  %10899 = vmatprep.subr.bf16.mxu0 %v11409_v6  ;;  %v5410_v6 = vld [vmem:[#allocation2 + $0x178] sm:$0xff]  ;;  %v11447_v34 = vld [vmem:[#allocation12 + $0xb88] sm:$0xff]  }
 0x389   :  { %v11449_v8 = vld [vmem:[#allocation12 + $0xb90] sm:$0xff]  }
 0x38a   :  { %10878 = vmatpush3.bf16.msra.mxu1 %v11410_v9  ;;  %v11450_v9 = vld [vmem:[#allocation12 + $0xbd8] sm:$0xff]  }
 0x38b   :  { %10900 = vmatpush3.bf16.msra.mxu0 %v11411_v49  ;;  %10907 = vmatprep.subr.bf16.mxu1 %v11412_v24  ;;  %v11451_v49 = vld [vmem:[#allocation12 + $0xb98] sm:$0xff]   ;;  %v11452_v24 = vld [vmem:[#allocation12 + $0xbe0] sm:$0xff]  }
 0x38c   :  { %10929 = vmatprep.subr.bf16.mxu0 %v11413_v11  ;;  %v11454_v11 = vld [vmem:[#allocation12 + $0xbe8] sm:$0xff]  }
 0x38d   :  { %9302 = vmatmul.mubr.bf16.vlgmr.msra.gmra.mrb[136].mxu1 %v5401_v48 }
 0x38e   :  { %9343 = vmatmul.mubr.bf16.vlgmr.msra.gmra.mrb[132].mxu0 %v5403_v1  ;;  %10908 = vmatpush3.bf16.msra.mxu1 %v11414_v12  ;;  %v11455_v12 = vld [vmem:[#allocation12 + $0xba8] sm:$0xff]  }
 0x38f   :  { %9383 = vmatprep.mubr.bf16.mxu1 %v5406_v15  ;;  %10930 = vmatpush3.bf16.msra.mxu0 %v11415_v19  ;;  %v11456_v19 = vld [vmem:[#allocation12 + $0xbf0] sm:$0xff]  }
 0x390   :  { %9424 = vmatprep.mubr.bf16.mxu0 %v5408_v18  ;;  %10909 = vmatprep.subr.bf16.mxu1 %v11416_v13  ;;  %v11457_v18 = vld [vmem:[#allocation12 + $0xbb0] sm:$0xff]  }
 0x391   :  { %10931 = vmatprep.subr.bf16.mxu0 %v11417_v14 }
 0x392   :  { %10910 = vmatpush3.bf16.msra.mxu1 %v11418_v16 }
 0x393   :  { %10932 = vmatpush3.bf16.msra.mxu0 %v11419_v0  ;;  %10911 = vmatprep.subr.bf16.mxu1 %v11420_v20 }
 0x394   :  { %10933 = vmatprep.subr.bf16.mxu0 %v11421_v57 }
 0x396   :  { %10912 = vmatpush3.bf16.msra.mxu1 %v11422_v21  ;;  %v11458_v21 = vld [vmem:[#allocation12 + $0xbf8] sm:$0xff]  }
 0x397   :  { %10934 = vmatpush3.bf16.msra.mxu0 %v11423_v25  ;;  %10913 = vmatprep.subr.bf16.mxu1 %v11424_v26 }
 0x398   :  { %10935 = vmatprep.subr.bf16.mxu0 %v11425_v27 }
 0x39a   :  { %10914 = vmatpush3.bf16.msra.mxu1 %v11426_v28 }
 0x39b   :  { %10936 = vmatpush3.bf16.msra.mxu0 %v11427_v30  ;;  %10915 = vmatprep.subr.bf16.mxu1 %v11428_v44 }
 0x39c   :  { %10937 = vmatprep.subr.bf16.mxu0 %v11429_v35  ;;  %v11459_v35 = vld [vmem:[#allocation12 + $0xbb8] sm:$0xff]  }
 0x39e   :  { %10916 = vmatpush3.bf16.msra.mxu1 %v11430_v36 }
 0x39f   :  { %10938 = vmatpush3.bf16.msra.mxu0 %v11431_v37  ;;  %10917 = vmatprep.subr.bf16.mxu1 %v11432_v22  ;;  %v5409_v37 = vld [vmem:[#allocation2 + $0x170] sm:$0xff] }
 0x3a0   :  { %v10615_v45 = vpop.f32.mrb[112].mxu1  ;;  %10939 = vmatprep.subr.bf16.mxu0 %v11433_v39 }
 0x3a1   :  { %v10637_v47 = vpop.f32.mrb[108].mxu0  ;;  %v10616_v4 = vpop.f32.mrb[113].mxu1 }
 0x3a2   :  { %v10617_v17 = vadd.f32 %v10616_v4, %v10615_v45  ;;  %v10638_v51 = vpop.f32.mrb[109].mxu0  ;;  %v10618_v52 = vpop.f32.mrb[114].mxu1  ;;  %10918 = vmatpush3.bf16.msra.mxu1 %v11434_v40 }
 0x3a3   :  { %v10639_v54 = vadd.f32 %v10638_v51, %v10637_v47  ;;  %v10640_v7 = vpop.f32.mrb[110].mxu0  ;;  %10940 = vmatpush3.bf16.msra.mxu0 %v11435_v41  ;;  %v10619_v31 = vpop.f32.mrb[115].mxu1  ;;  %10919 = vmatprep.subr.bf16.mxu1 %v11436_v32 }
 0x3a4   :  { %v8812_v56 = vadd.f32 %v10617_v17, %v12286_v50  ;;  %v10620_v58 = vadd.f32 %v10619_v31, %v10618_v52  ;;  %v10641_v38 = vpop.f32.mrb[111].mxu0  ;;  %10941 = vmatprep.subr.bf16.mxu0 %v11437_v46  ;;  %v11448_v50 = vld [vmem:[#allocation12 + $0xbd0] sm:$0xff]  }
 0x3a5   :  { %v10642_v42 = vadd.f32 %v10641_v38, %v10640_v7 }
 0x3a6   :  { %v8853_v60 = vadd.f32 %v10639_v54, %v8812_v56  ;;  %v8815_v29 = vadd.f32 %v10620_v58, %v12289_v10  ;;  %10920 = vmatpush3.bf16.msra.mxu1 %v11438_v53  ;;  %v11453_v10 = vld [vmem:[#allocation12 + $0xba0] sm:$0xff]  }
 0x3a7   :  { %10942 = vmatpush3.bf16.msra.mxu0 %v11439_v55  ;;  %10921 = vmatprep.subr.bf16.mxu1 %v11440_v3 }
 0x3a8   :  { %v8856_v2 = vadd.f32 %v10642_v42, %v8815_v29  ;;  %10943 = vmatprep.subr.bf16.mxu0 %v11441_v59 }
 0x3aa   :  { %10922 = vmatpush3.bf16.msra.mxu1 %v11442_v61 }
 0x3ab   :  { %10944 = vmatpush3.bf16.msra.mxu0 %v11443_v62  ;;  %10951 = vmatprep.subr.bf16.mxu1 %v11444_v63 }
 0x3ad   :  { %9384 = vmatmul.mubr.bf16.vlgmr.msra.gmra.mrb[140].mxu1 %v5405_v23 }
 0x3ae   :  { %9425 = vmatmul.mubr.bf16.vlgmr.msra.gmra.mrb[136].mxu0 %v5407_v5  ;;  %10952 = vmatpush3.bf16.msra.mxu1 %v11445_v43  ;;  %v9476_v5 = vld [vmem:[#allocation15] sm:$0xff] }
 0x3af   :  { %9465 = vmatprep.mubr.bf16.mxu1 %v5410_v6  ;;  %10953 = vmatprep.subr.bf16.mxu1 %v11446_v33  ;;  %v9477_v6 = vld [vmem:[#allocation15 + $0x8] sm:$0xff] }
 0x3b2   :  { %10954 = vmatpush3.bf16.msra.mxu1 %v11447_v34  ;;  %v9478_v34 = vld [vmem:[#allocation15 + $0x10] sm:$0xff] }
 0x3b3   :  { %10955 = vmatprep.subr.bf16.mxu1 %v11448_v50  ;;  %v11026_v50 = vpack.c.bf16 %v9477_v6, %v9476_v5 }
 0x3b5   :  { %11027 = vmatprep.subr.bf16.mxu0 %v11026_v50 }
 0x3b6   :  { %10956 = vmatpush3.bf16.msra.mxu1 %v11449_v8  ;;  %v9479_v8 = vld [vmem:[#allocation15 + $0x18] sm:$0xff]  ;;  %11029 = vmatpush3.bf16.msra.mxu0 %v11026_v50 }
 0x3b7   :  { %10957 = vmatprep.subr.bf16.mxu1 %v11450_v9  ;;  %v11030_v9 = vpack.c.bf16 %v9479_v8, %v9478_v34 }
 0x3b9   :  { %11031 = vmatprep.subr.bf16.mxu0 %v11030_v9 }
 0x3ba   :  { %10958 = vmatpush3.bf16.msra.mxu1 %v11451_v49  ;;  %v9480_v49 = vld [vmem:[#allocation15 + $0x20] sm:$0xff]  ;;  %11033 = vmatpush3.bf16.msra.mxu0 %v11030_v9 }
 0x3bb   :  { %10959 = vmatprep.subr.bf16.mxu1 %v11452_v24  ;;  %v9481_v24 = vld [vmem:[#allocation15 + $0x28] sm:$0xff] }
 0x3be   :  { %10960 = vmatpush3.bf16.msra.mxu1 %v11453_v10  ;;  %v11034_v10 = vpack.c.bf16 %v9481_v24, %v9480_v49 }
 0x3bf   :  { %10961 = vmatprep.subr.bf16.mxu1 %v11454_v11  ;;  %v9482_v11 = vld [vmem:[#allocation15 + $0x30] sm:$0xff] }
 0x3c0   :  { %v10659_v48 = vpop.f32.mrb[116].mxu1  ;;  %11035 = vmatprep.subr.bf16.mxu0 %v11034_v10 }
 0x3c1   :  { %v10681_v13 = vpop.f32.mrb[112].mxu0  ;;  %v10660_v1 = vpop.f32.mrb[117].mxu1  ;;  %11037 = vmatpush3.bf16.msra.mxu0 %v11034_v10 }
 0x3c2   :  { %v10661_v14 = vadd.f32 %v10660_v1, %v10659_v48  ;;  %v10682_v15 = vpop.f32.mrb[113].mxu0  ;;  %v10662_v16 = vpop.f32.mrb[118].mxu1  ;;  %10962 = vmatpush3.bf16.msra.mxu1 %v11455_v12  ;;  %v9483_v12 = vld [vmem:[#allocation15 + $0x38] sm:$0xff]  ;;  %v9484_v48 = vld [vmem:[#allocation15 + $0x40] sm:$0xff] }
 0x3c3   :  { %v10683_v0 = vadd.f32 %v10682_v15, %v10681_v13  ;;  %v10684_v20 = vpop.f32.mrb[114].mxu0  ;;  %v10663_v57 = vpop.f32.mrb[119].mxu1  ;;  %10963 = vmatprep.subr.bf16.mxu1 %v11456_v19  ;;  %v11038_v19 = vpack.c.bf16 %v9483_v12, %v9482_v11  ;;  %v9485_v13 = vld [vmem:[#allocation15 + $0x48] sm:$0xff]  ;;  %v9487_v15 = vld [vmem:[#allocation15 + $0x58] sm:$0xff] }
 0x3c4   :  { %v8894_v25 = vadd.f32 %v10661_v14, %v8853_v60  ;;  %v10664_v26 = vadd.f32 %v10663_v57, %v10662_v16  ;;  %v10685_v27 = vpop.f32.mrb[115].mxu0  ;;  %v11042_v1 = vpack.c.bf16 %v9485_v13, %v9484_v48  ;;  %v9486_v14 = vld [vmem:[#allocation15 + $0x50] sm:$0xff]  ;;  %v9488_v57 = vld [vmem:[#allocation15 + $0x60] sm:$0xff] }
 0x3c5   :  { %v10686_v28 = vadd.f32 %v10685_v27, %v10684_v20  ;;  %11039 = vmatprep.subr.bf16.mxu0 %v11038_v19  ;;  %v11046_v16 = vpack.c.bf16 %v9487_v15, %v9486_v14 }
 0x3c6   :  { %v8935_v30 = vadd.f32 %v10683_v0, %v8894_v25  ;;  %v8897_v44 = vadd.f32 %v10664_v26, %v8856_v2  ;;  %10964 = vmatpush3.bf16.msra.mxu1 %v11457_v18  ;;  %11041 = vmatpush3.bf16.msra.mxu0 %v11038_v19 }
 0x3c7   :  { %10965 = vmatprep.subr.bf16.mxu1 %v11458_v21  ;;  %11043 = vmatprep.subr.bf16.mxu0 %v11042_v1  ;;  %v9489_v21 = vld [vmem:[#allocation15 + $0x68] sm:$0xff] }
 0x3c8   :  { %v8938_v36 = vadd.f32 %v10686_v28, %v8897_v44  ;;  %v11050_v28 = vpack.c.bf16 %v9489_v21, %v9488_v57 }
 0x3ca   :  { %10966 = vmatpush3.bf16.msra.mxu1 %v11459_v35  ;;  %11045 = vmatpush3.bf16.msra.mxu0 %v11042_v1 }
 0x3cb   :  { %11047 = vmatprep.subr.bf16.mxu0 %v11046_v16 }
 0x3cd   :  { %9466 = vmatmul.mubr.bf16.vlgmr.msra.gmra.mrb[144].mxu1 %v5409_v37 }
 0x3ce   :  { %11049 = vmatpush3.bf16.msra.mxu0 %v11046_v16 }
 0x3cf   :  { %11051 = vmatprep.subr.bf16.mxu0 %v11050_v28 }
 0x3d2   :  { %11053 = vmatpush3.bf16.msra.mxu0 %v11050_v28 }
 0x3e0   :  { %v10703_v22 = vpop.f32.mrb[120].mxu1 }
 0x3e1   :  { %v10725_v39 = vpop.f32.mrb[116].mxu0  ;;  %v10704_v40 = vpop.f32.mrb[121].mxu1 }
 0x3e2   :  { %v10705_v41 = vadd.f32 %v10704_v40, %v10703_v22  ;;  %v10726_v32 = vpop.f32.mrb[117].mxu0  ;;  %v10706_v45 = vpop.f32.mrb[122].mxu1  ;;  %v9490_v40 = vld [vmem:[#allocation15 + $0x70] sm:$0xff] }
 0x3e3   :  { %v10727_v46 = vadd.f32 %v10726_v32, %v10725_v39  ;;  %v10728_v47 = vpop.f32.mrb[118].mxu0  ;;  %v10707_v4 = vpop.f32.mrb[123].mxu1 }
 0x3e4   :  { %v8976_v17 = vadd.f32 %v10705_v41, %v8935_v30  ;;  %v10708_v51 = vadd.f32 %v10707_v4, %v10706_v45  ;;  %v10729_v52 = vpop.f32.mrb[119].mxu0  ;;  %v9491_v41 = vld [vmem:[#allocation15 + $0x78] sm:$0xff] }
 0x3e5   :  { %v10730_v53 = vadd.f32 %v10729_v52, %v10728_v47  ;;  %v12296_v4 = vld [vmem:[%s12324_s9] sm:$0xff]  ;;  %s11712_s9 = smov 2  }
 0x3e6   :  { %v9017_v54 = vadd.f32 %v10727_v46, %v8976_v17  ;;  %v8979_v7 = vadd.f32 %v10708_v51, %v8938_v36  ;;  %v11054_v46 = vpack.c.bf16 %v9491_v41, %v9490_v40  ;;  %v9583_v17 = vmul.f32 %v12296_v4, %v12296_v4 }
 0x3e8   :  { %v9020_v31 = vadd.f32 %v10730_v53, %v8979_v7  ;;  %11055 = vmatprep.subr.bf16.mxu0 %v11054_v46  ;;  %v9585_v51 = vsel %vm9584_vm1, %v9583_v17, 0.0 }
 0x3e9   :  { %11057 = vmatpush3.bf16.msra.mxu0 %v11054_v46  ;;  %9586 = vadd.xlane.f32.xlu0 %v9585_v51 }
 0x400   :  { %v10747_v55 = vpop.f32.mrb[124].mxu1 }
 0x401   :  { %v10769_v3 = vpop.f32.mrb[120].mxu0  ;;  %v10748_v56 = vpop.f32.mrb[125].mxu1 }
 0x402   :  { %v10749_v58 = vadd.f32 %v10748_v56, %v10747_v55  ;;  %v10770_v38 = vpop.f32.mrb[121].mxu0  ;;  %v10750_v59 = vpop.f32.mrb[126].mxu1 }
 0x403   :  { %v10771_v42 = vadd.f32 %v10770_v38, %v10769_v3  ;;  %v10772_v60 = vpop.f32.mrb[122].mxu0  ;;  %v10751_v29 = vpop.f32.mrb[127].mxu1 }
 0x404   :  { %v9058_v61 = vadd.f32 %v10749_v58, %v9017_v54  ;;  %v10752_v62 = vadd.f32 %v10751_v29, %v10750_v59  ;;  %v10773_v63 = vpop.f32.mrb[123].mxu0 }
 0x405   :  { %v10774_v2 = vadd.f32 %v10773_v63, %v10772_v60 }
 0x406   :  { %v9099_v43 = vadd.f32 %v10771_v42, %v9058_v61  ;;  %v9061_v33 = vadd.f32 %v10752_v62, %v9020_v31 }
 0x408   :  { %v9102_v23 = vadd.f32 %v10774_v2, %v9061_v33 }
 0x420   :  { %v10791_v18 = vpop.f32.mrb[128].mxu1 }
 0x421   :  { %v10813_v0 = vpop.f32.mrb[124].mxu0  ;;  %v10792_v20 = vpop.f32.mrb[129].mxu1 }
 0x422   :  { %v10793_v25 = vadd.f32 %v10792_v20, %v10791_v18  ;;  %v10814_v26 = vpop.f32.mrb[125].mxu0  ;;  %v10794_v27 = vpop.f32.mrb[130].mxu1 }
 0x423   :  { %v10815_v30 = vadd.f32 %v10814_v26, %v10813_v0  ;;  %v10816_v44 = vpop.f32.mrb[126].mxu0  ;;  %v10795_v35 = vpop.f32.mrb[131].mxu1 }
 0x424   :  { %v9140_v36 = vadd.f32 %v10793_v25, %v9099_v43  ;;  %v10796_v37 = vadd.f32 %v10795_v35, %v10794_v27  ;;  %v10817_v22 = vpop.f32.mrb[127].mxu0 }
 0x425   :  { %v10818_v39 = vadd.f32 %v10817_v22, %v10816_v44 }
 0x426   :  { %v9181_v32 = vadd.f32 %v10815_v30, %v9140_v36  ;;  %v9143_v45 = vadd.f32 %v10796_v37, %v9102_v23 }
 0x428   :  { %v9184_v47 = vadd.f32 %v10818_v39, %v9143_v45  ;;  %v10442_v45 = vld [vmem:[#allocation17] ss:$0 sm:$0xff] }
 0x440   :  { %v10835_v52 = vpop.f32.mrb[132].mxu1 }
 0x441   :  { %v10857_v53 = vpop.f32.mrb[128].mxu0  ;;  %v10836_v54 = vpop.f32.mrb[133].mxu1 }
 0x442   :  { %v10837_v7 = vadd.f32 %v10836_v54, %v10835_v52  ;;  %v10858_v31 = vpop.f32.mrb[129].mxu0  ;;  %v10838_v55 = vpop.f32.mrb[134].mxu1 }
 0x443   :  { %v10859_v3 = vadd.f32 %v10858_v31, %v10857_v53  ;;  %v10860_v56 = vpop.f32.mrb[130].mxu0  ;;  %v10839_v58 = vpop.f32.mrb[135].mxu1 }
 0x444   :  { %v9222_v38 = vadd.f32 %v10837_v7, %v9181_v32  ;;  %v10840_v59 = vadd.f32 %v10839_v58, %v10838_v55  ;;  %v10861_v42 = vpop.f32.mrb[131].mxu0  ;;  %v9581_v7 = vmul.f32 0.05, %v12296_v4 }
 0x445   :  { %v10862_v60 = vadd.f32 %v10861_v42, %v10860_v56 }
 0x446   :  { %v9263_v29 = vadd.f32 %v10859_v3, %v9222_v38  ;;  %v9225_v61 = vadd.f32 %v10840_v59, %v9184_v47 }
 0x448   :  { %v9266_v62 = vadd.f32 %v10862_v60, %v9225_v61 }
 0x460   :  { %v10879_v63 = vpop.f32.mrb[136].mxu1 }
 0x461   :  { %v10901_v2 = vpop.f32.mrb[132].mxu0  ;;  %v10880_v43 = vpop.f32.mrb[137].mxu1 }
 0x462   :  { %v10881_v33 = vadd.f32 %v10880_v43, %v10879_v63  ;;  %v10902_v23 = vpop.f32.mrb[133].mxu0  ;;  %v10882_v5 = vpop.f32.mrb[138].mxu1 }
 0x463   :  { %v10903_v6 = vadd.f32 %v10902_v23, %v10901_v2  ;;  %v10904_v34 = vpop.f32.mrb[134].mxu0  ;;  %v10883_v50 = vpop.f32.mrb[139].mxu1 }
 0x464   :  { %v9304_v8 = vadd.f32 %v10881_v33, %v9263_v29  ;;  %v10884_v9 = vadd.f32 %v10883_v50, %v10882_v5  ;;  %v10905_v49 = vpop.f32.mrb[135].mxu0 }
 0x465   :  { %v10906_v24 = vadd.f32 %v10905_v49, %v10904_v34 }
 0x466   :  { %v9345_v10 = vadd.f32 %v10903_v6, %v9304_v8  ;;  %v9307_v11 = vadd.f32 %v10884_v9, %v9266_v62 }
 0x468   :  { %v9348_v12 = vadd.f32 %v10906_v24, %v9307_v11 }
 0x476   :  { %v9587_v3 = vpop.xlane.xlu0 %9586 }
 0x477   :  { %v9588_v56 = vmul.f32 -0.5, %v9587_v3 }
 0x479   :  { %v10444_v59 = vadd.f32 4.1535873, %v9588_v56 }
 0x480   :  { %v10923_v19 = vpop.f32.mrb[140].mxu1 }
 0x481   :  { %v10945_v48 = vpop.f32.mrb[136].mxu0  ;;  %v10924_v13 = vpop.f32.mrb[141].mxu1 }
 0x482   :  { %v10925_v1 = vadd.f32 %v10924_v13, %v10923_v19  ;;  %v10946_v14 = vpop.f32.mrb[137].mxu0  ;;  %v10926_v15 = vpop.f32.mrb[142].mxu1 }
 0x483   :  { %v10947_v16 = vadd.f32 %v10946_v14, %v10945_v48  ;;  %v10948_v18 = vpop.f32.mrb[138].mxu0  ;;  %v10927_v0 = vpop.f32.mrb[143].mxu1 }
 0x484   :  { %v9386_v20 = vadd.f32 %v10925_v1, %v9345_v10  ;;  %v10928_v57 = vadd.f32 %v10927_v0, %v10926_v15  ;;  %v10949_v21 = vpop.f32.mrb[139].mxu0 }
 0x485   :  { %v10950_v25 = vadd.f32 %v10949_v21, %v10948_v18 }
 0x486   :  { %v9427_v26 = vadd.f32 %v10947_v16, %v9386_v20  ;;  %v9389_v27 = vadd.f32 %v10928_v57, %v9348_v12 }
 0x488   :  { %v9430_v28 = vadd.f32 %v10950_v25, %v9389_v27 }
 0x4a0   :  { %v10967_v30 = vpop.f32.mrb[144].mxu1 }
 0x4a1   :  { %v10968_v44 = vpop.f32.mrb[145].mxu1 }
 0x4a2   :  { %v10969_v35 = vadd.f32 %v10968_v44, %v10967_v30  ;;  %v10970_v36 = vpop.f32.mrb[146].mxu1 }
 0x4a3   :  { %v10971_v37 = vpop.f32.mrb[147].mxu1 }
 0x4a4   :  { %v9468_v22 = vadd.f32 %v10969_v35, %v9427_v26  ;;  %v10972_v39 = vadd.f32 %v10971_v37, %v10970_v36 }
 0x4a6   :  { %v9474_v40 = vmax.f32 %v9468_v22, 0.0  ;;  %v9471_v41 = vadd.f32 %v10972_v39, %v9430_v28 }
 0x4a8   :  { %v9475_v32 = vmax.f32 %v9471_v41, 0.0  ;;  %11023 = vmatprep.mubr.f32.mxu0 %v9474_v40 }
 0x4aa   :  { %11024 = vmatmul.mubr.f32.vlgmr.msra.gmra.mrb[140].mxu0 %v9475_v32 }
 0x57d   :  { %v11025_v46 = vpop.f32.mrb[140].mxu0 }
 0x57e   :  { %v9571_v47 = vadd.f32 %v11025_v46, %v10442_v45  ;;  %v9565_v17 = vpop.f32.mrb[141].mxu0 }
 0x57f   :  { %v9566_v51 = vadd.f32 %v10442_v45, %v9565_v17 }
 0x580   :  { %9595 = vrot.lane.b32.xlu1 %v9571_v47, %s11712_s9 }
 0x581   :  { %v10443_v52 = vmul.f32 -1.442695, %v9566_v51 }
 0x583   :  { %11460 = vpow2.f32 %v10443_v52 }
 0x58d   :  { %v11461_v53 = vpop.eup %11460 }
 0x58e   :  { %v9577_v54 = vadd.f32 1.0, %v11461_v53 }
 0x590   :  { %11462 = vrcp.f32 %v9577_v54 }
 0x59a   :  { %v11463_v31 = vpop.eup %11462 }
 0x59b   :  { %9591 = vrot.lane.b32.xlu0 %v11463_v31, %s11712_s9  ;;  %v9582_v55 = vadd.f32 %v11463_v31, %v9581_v7 }
 0x5f2   :  { %v9596_v38 = vpop.permute.xlu1 %9595 }
 0x60d   :  { %v9592_v58 = vpop.permute.xlu0 %9591 }
 0x60e   :  { %v9598_v42 = vsel %vm9584_vm1, %v9582_v55, %v9592_v58 }
 0x60f   :  { %v9600_v60 = vsel %vm9599_vm2, %v9598_v42, %v9596_v38 }
 0x610   :  { %v9602_v29 = vsel %vm9601_vm3, %v9600_v60, %v10444_v59 }
 0x611   :  { %v9604_v61 = vsel %vm9603_vm4, %v9602_v29, 0.0 }
 0x612   :  { %9605 = vst [vmem:[#allocation18] sm:$0xff] %v9604_v61 }
 0x613   :  { %11673 = shalt.err (!%p11670_p6)
}
 0x614   :  { %s11674_s17 = scalar_lea.hbm %s12325_s10, 128 }
 0x615   :  { %p11675_p7 = scmp.ne.s32.totalorder %s12325_s10, %s11674_s17  ;;  %p11678_p8 = scmp.lt.u32.totalorder %s11674_s17, %s12325_s10 }
 0x617   :  { %p11680_p9 = pnand %p11678_p8, %p11675_p7 }
 0x619   :  { %11683 = shalt.err (!%p11680_p9)
}
 0x61a   :  { %9615 = dma.vmem_to_hbm [thread:$0]  %s9613_s29, 128, %s12325_s10, [#allocation5]  }
 0x61b   :  { %11694 = dma.done.wait [#allocation5], 128  }
 0x61c   :  { %11695 = vsyncadd [#allocation5], 4294967168 }
 0x61d   :  { %9619 = vsyncpa [#allocation4], 1 }
 0x61e   :  { %9620 = vsyncpa [#allocation7], 1 }
 0x61f   :  { %9621 = vsyncpa [#allocation10], 1 }
 0x620   :  { %9622 = vsyncpa [#allocation13], 1 }
 0x621   :  { %9623 = vsyncpa [#allocation16], 1 }
 0x622   :  { %9624 = vsyncpa [#allocation5], 1 }

</bundles_post_ra>
